<compile_context>
chip_gen: v6e
topology: v6e:2x2x1
jax: 0.10.0
libtpu: 0.0.40
codegen_flags: <defaults>
</compile_context>

<pallas_src>
import functools

import jax
import jax.numpy as jnp
from jax.experimental import pallas as pl
from jax.experimental.pallas import tpu as pltpu


def _silu(x):
    return x * jax.nn.sigmoid(x)


# ---------------------------------------------------------------------------
# Fused GhostConv kernel (one (batch, row-tile) grid step per invocation).
# ---------------------------------------------------------------------------
def _ghost_kernel(xt_ref, xc_ref, xb_ref, w1_ref, b1_ref, w2_ref, b2_ref,
                  o_ref, yp_ref, *, K, th, W, C_, lpad):
    """Refs per grid step:
      xt_ref : (1, pad, W, C1)   last `pad` x rows of the tile above (halo)
      xc_ref : (1, th,  W, C1)   x rows of this tile
      xb_ref : (1, pad, W, C1)   first `pad` x rows of the tile below (halo)
      w1_ref : (C1, C_)          1x1 weights, BN scale folded in
      b1_ref : (1, C_)           folded BN bias for cv1
      w2_ref : (K, K, C_)        depthwise weights, BN scale folded in
      b2_ref : (1, C_)           folded BN bias for cv2
      o_ref  : (1, 2, th, W, C_) slot 0 = y (cv1), slot 1 = z (cv2) -> concat
      yp_ref : (th+2*pad, lpad+W+pad, C_) zero-padded y window (VMEM scratch)
    """
    pad = K // 2
    h = pl.program_id(1)
    n_h = pl.num_programs(1)

    def cv1(x3d):                      # (R, W, C1) -> (R, W, C_) on the MXU
        r = x3d.shape[0]
        acc = jnp.dot(x3d.reshape(r * W, x3d.shape[-1]).astype(jnp.float32),
                      w1_ref[...], preferred_element_type=jnp.float32)
        return _silu(acc + b1_ref[...]).reshape(r, W, C_)

    y = cv1(xc_ref[0])                                        # (th, W, C_)

    # Zero-padded y window in VMEM (replaces the old HBM jnp.pad round trip).
    # Real data lives in columns [lpad, lpad+W) (lpad is 8-aligned so the
    # interior stores are unmasked) and rows [pad, pad+th).
    yp_ref[...] = jnp.zeros_like(yp_ref)
    yp_ref[pad:pad + th, lpad:lpad + W, :] = y
    top_ok = (h > 0).astype(jnp.float32)        # image border -> keep zeros
    bot_ok = (h < n_h - 1).astype(jnp.float32)
    yp_ref[0:pad, lpad:lpad + W, :] = cv1(xt_ref[0]) * top_ok
    yp_ref[pad + th:2 * pad + th, lpad:lpad + W, :] = cv1(xb_ref[0]) * bot_ok

    # cv2: depthwise KxK as K*K shifted multiply-adds (pure VPU work).
    # TODO(synk): realize the dx shift with pltpu.roll (XLU) instead of
    # sublane-offset loads for extra headroom on VALU-bound shapes.
    c0 = lpad - pad
    acc = jnp.zeros((th, W, C_), jnp.float32)
    for dy in range(K):
        for dx in range(K):
            tap = yp_ref[dy:dy + th, c0 + dx:c0 + dx + W, :]
            acc = acc + tap * w2_ref[dy, dx, :]
    z = _silu(acc + b2_ref[...])

    # Fused torch.cat((y, z), dim=1): write both halves of the output block.
    o_ref[0, 0] = y.astype(o_ref.dtype)
    o_ref[0, 1] = z.astype(o_ref.dtype)


def _pick_row_tile(H, W, c_in, c_out, pad=2, vmem_budget=6 << 20):
    """Largest row tile (divisor of H, halo-compatible) fitting the budget."""
    def nbytes(th):
        x_blk = th * W * c_in * 4
        out_blk = 2 * th * W * c_out * 4
        scratch = (th + 2 * pad) * (W + 8 + pad) * c_out * 4
        return 2 * (x_blk + out_blk) + scratch      # ~double-buffered in/out
    cands = [t for t in range(H, 0, -1)
             if H % t == 0 and (t == H or (t % pad == 0 and t >= pad))]
    for t in cands:
        if nbytes(t) <= vmem_budget:
            return t
    return cands[-1]


# ---------------------------------------------------------------------------
# GhostConv forward (NCHW in / NCHW out, like the PyTorch module).
# ---------------------------------------------------------------------------
def ghost_conv(x_nchw, params, *, row_tile=None):
    # TODO(synk): only GhostConv's defaults are implemented (cv1 k=1, s=1, g=1).
    B, C1, H, W = x_nchw.shape
    w1, b1 = params["w1"], params["bias1"]
    w2, b2 = params["w2"], params["bias2"]
    C_ = w1.shape[1]
    K = w2.shape[0]
    pad = K // 2
    lpad = -(-pad // 8) * 8                     # 8-aligned left column padding

    x = jnp.transpose(x_nchw, (0, 2, 3, 1))     # NHWC: channels on lane axis

    th = _pick_row_tile(H, W, C1, C_, pad) if row_tile is None else row_tile
    assert H % th == 0, "row tile must divide H"
    n_h = H // th
    assert n_h == 1 or (th % pad == 0 and th >= pad), "halo needs th % pad == 0"
    last_halo_blk = max((H + pad - 1) // pad - 1, 0)

    def cur_map(b, h):
        return (b, h, 0, 0)

    def top_map(b, h):                          # last `pad` rows of tile h-1
        return (b, jnp.maximum(h * (th // pad) - 1, 0), 0, 0)

    def bot_map(b, h):                          # first `pad` rows of tile h+1
        return (b, jnp.minimum((h + 1) * (th // pad), last_halo_blk), 0, 0)

    out5 = pl.pallas_call(
        functools.partial(_ghost_kernel, K=K, th=th, W=W, C_=C_, lpad=lpad),
        out_shape=jax.ShapeDtypeStruct((B, 2, H, W, C_), x.dtype),
        grid_spec=pltpu.PrefetchScalarGridSpec(
            num_scalar_prefetch=0,
            grid=(B, n_h),
            in_specs=[
                pl.BlockSpec((1, pad, W, C1), top_map),
                pl.BlockSpec((1, th, W, C1), cur_map),
                pl.BlockSpec((1, pad, W, C1), bot_map),
                pl.BlockSpec((C1, C_), lambda b, h: (0, 0)),
                pl.BlockSpec((1, C_), lambda b, h: (0, 0)),
                pl.BlockSpec((K, K, C_), lambda b, h: (0, 0, 0)),
                pl.BlockSpec((1, C_), lambda b, h: (0, 0)),
            ],
            out_specs=pl.BlockSpec((1, 2, th, W, C_),
                                   lambda b, h: (b, 0, h, 0, 0)),
            scratch_shapes=[
                pltpu.VMEM((th + 2 * pad, lpad + W + pad, C_), jnp.float32)],
        ),
        compiler_params=pltpu.CompilerParams(
            dimension_semantics=("parallel", "parallel")),
    )(x, x, x, w1, b1, w2, b2)

    # (B, 2, H, W, C_) -> (B, 2*C_, H, W). The y/z concat already happened in
    # the kernel's output layout; this is only the NCHW boundary transpose.
    return jnp.transpose(out5, (0, 1, 4, 2, 3)).reshape(B, 2 * C_, H, W)


# ---------------------------------------------------------------------------
# Deterministic params (eval-mode BatchNorm folded into the conv weights).
# ---------------------------------------------------------------------------
def init_params(key, c1, c2):
    c_ = c2 // 2
    ks = jax.random.split(key, 10)
    w1 = jax.random.normal(ks[0], (c1, c_), jnp.float32) * 0.1     # 1x1 (Cin,Cout)
    w2 = jax.random.normal(ks[1], (5, 5, c_), jnp.float32) * 0.1   # dw 5x5 (kh,kw,C)
    eps = 1e-5                                                     # BatchNorm2d default

    def fold_bn(kg, kb, km, kv, c):
        gamma = jax.random.uniform(kg, (c,), jnp.float32, 0.5, 1.5)
        beta = jax.random.normal(kb, (c,), jnp.float32) * 0.1
        mean = jax.random.normal(km, (c,), jnp.float32) * 0.1
        var = jax.random.uniform(kv, (c,), jnp.float32, 0.5, 1.5)
        scale = gamma / jnp.sqrt(var + eps)
        return scale, beta - mean * scale

    s1, b1 = fold_bn(ks[2], ks[3], ks[4], ks[5], c_)
    s2, b2 = fold_bn(ks[6], ks[7], ks[8], ks[9], c_)
    # One-time BN-scale fold:  silu((x.w)*s + b) == silu(x.(w*s) + b)
    return dict(w1=w1 * s1[None, :], bias1=b1[None, :],
                w2=w2 * s2[None, None, :], bias2=b2[None, :])


# ---------------------------------------------------------------------------
# Pure-JAX reference (lax.conv) for correctness.
# ---------------------------------------------------------------------------
def ghost_conv_ref(x_nchw, params):
    x = jnp.transpose(x_nchw, (0, 2, 3, 1))
    c1 = x.shape[-1]
    c_ = params["w1"].shape[1]
    K = params["w2"].shape[0]
    y = jax.lax.conv_general_dilated(
        x, params["w1"].reshape(1, 1, c1, c_), (1, 1), "VALID",
        dimension_numbers=("NHWC", "HWIO", "NHWC"))
    y = _silu(y + params["bias1"])
    z = jax.lax.conv_general_dilated(
        y, params["w2"].reshape(K, K, 1, c_), (1, 1), "SAME",
        feature_group_count=c_,
        dimension_numbers=("NHWC", "HWIO", "NHWC"))
    z = _silu(z + params["bias2"])
    out = jnp.concatenate([y, z], axis=-1)
    return jnp.transpose(out, (0, 3, 1, 2))


if __name__ == "__main__":
    key = jax.random.PRNGKey(0)
    kx1, kp1, kx2, kp2 = jax.random.split(key, 4)

    # Test 1: module-spec small shapes (single row tile per image).
    B, C1, C2, H, W = 2, 4, 8, 16, 16            # c_ = C2 // 2 = 4
    x = jax.random.normal(kx1, (B, C1, H, W), jnp.float32)
    params = init_params(kp1, C1, C2)
    out = jax.block_until_ready(ghost_conv(x, params))
    ref = ghost_conv_ref(x, params)
    assert out.shape == (B, C2, H, W), out.shape
    assert jnp.allclose(out, ref, atol=1e-4, rtol=1e-4), "mismatch (test 1)"

    # Test 2: forces H row tiling (grid = (1, 4)) to exercise the halo path.
    B2, C1b, C2b, H2, W2 = 1, 8, 16, 32, 16
    x2 = jax.random.normal(kx2, (B2, C1b, H2, W2), jnp.float32)
    params2 = init_params(kp2, C1b, C2b)
    out2 = jax.block_until_ready(ghost_conv(x2, params2, row_tile=8))
    ref2 = ghost_conv_ref(x2, params2)
    assert out2.shape == (B2, C2b, H2, W2), out2.shape
    assert jnp.allclose(out2, ref2, atol=1e-4, rtol=1e-4), "mismatch (test 2)"

    print("KERNEL_OK")
</pallas_src>

<mosaic_0001>
module attributes {stable_mosaic.version = 11 : i64} {
  func.func @_ghost_kernel(%arg0: i32, %arg1: i32, %arg2: memref<1x2x16x4xf32, #tpu.memory_space<vmem>>, %arg3: memref<1x16x16x4xf32, #tpu.memory_space<vmem>>, %arg4: memref<1x2x16x4xf32, #tpu.memory_space<vmem>>, %arg5: memref<4x4xf32, #tpu.memory_space<vmem>>, %arg6: memref<1x4xf32, #tpu.memory_space<vmem>>, %arg7: memref<5x5x4xf32, #tpu.memory_space<vmem>>, %arg8: memref<1x4xf32, #tpu.memory_space<vmem>>, %arg9: memref<1x2x16x16x4xf32, #tpu.memory_space<vmem>>, %arg10: memref<20x26x4xf32, #tpu.memory_space<vmem>>) attributes {dimension_semantics = [#tpu.dimension_semantics<parallel>, #tpu.dimension_semantics<parallel>], iteration_bounds = array<i64: 2, 1>, scalar_prefetch = 0 : i64, scratch_operands = 1 : i64, tpu.core_type = #tpu.core_type<tc>, window_params = [{transform_indices = @transform_0, window_bounds = array<i64: 1, 2, 16, 4>}, {transform_indices = @transform_1, window_bounds = array<i64: 1, 16, 16, 4>}, {transform_indices = @transform_2, window_bounds = array<i64: 1, 2, 16, 4>}, {pipeline_mode = #tpu.pipeline_mode<synchronous>, transform_indices = @transform_3, window_bounds = array<i64: 4, 4>}, {pipeline_mode = #tpu.pipeline_mode<synchronous>, transform_indices = @transform_4, window_bounds = array<i64: 1, 4>}, {pipeline_mode = #tpu.pipeline_mode<synchronous>, transform_indices = @transform_5, window_bounds = array<i64: 5, 5, 4>}, {pipeline_mode = #tpu.pipeline_mode<synchronous>, transform_indices = @transform_6, window_bounds = array<i64: 1, 4>}, {transform_indices = @transform_7, window_bounds = array<i64: 1, 2, 16, 16, 4>}]} {
    %c0 = arith.constant 0 : index
    %c0_0 = arith.constant 0 : index
    %c0_1 = arith.constant 0 : index
    %c0_2 = arith.constant 0 : index
    %0 = vector.load %arg3[%c0, %c0_0, %c0_1, %c0_2] : memref<1x16x16x4xf32, #tpu.memory_space<vmem>>, vector<1x16x16x4xf32>
    %1 = vector.shape_cast %0 : vector<1x16x16x4xf32> to vector<16x16x4xf32>
    %2 = vector.shape_cast %1 : vector<16x16x4xf32> to vector<256x4xf32>
    %c0_3 = arith.constant 0 : index
    %c0_4 = arith.constant 0 : index
    %3 = vector.load %arg5[%c0_3, %c0_4] : memref<4x4xf32, #tpu.memory_space<vmem>>, vector<4x4xf32>
    %cst = arith.constant dense<0.000000e+00> : vector<256x4xf32>
    %4 = tpu.matmul %2, %3, %cst {dimension_numbers = #tpu.dot_dimension_numbers<[1], [0], [0], [1], [0, 0, 1, 1], [], []>} : vector<256x4xf32>, vector<4x4xf32>, vector<256x4xf32> -> vector<256x4xf32>
    %c0_5 = arith.constant 0 : index
    %c0_6 = arith.constant 0 : index
    %5 = vector.load %arg6[%c0_5, %c0_6] : memref<1x4xf32, #tpu.memory_space<vmem>>, vector<1x4xf32>
    %6 = vector.broadcast %5 : vector<1x4xf32> to vector<256x4xf32>
    %7 = arith.addf %4, %6 : vector<256x4xf32>
    %8 = arith.negf %7 : vector<256x4xf32>
    %9 = math.exp %8 : vector<256x4xf32>
    %cst_7 = arith.constant 1.000000e+00 : f32
    %10 = vector.broadcast %cst_7 : f32 to vector<256x4xf32>
    %11 = arith.addf %10, %9 : vector<256x4xf32>
    %12 = arith.divf %10, %11 : vector<256x4xf32>
    %13 = arith.mulf %7, %12 : vector<256x4xf32>
    %14 = vector.shape_cast %13 : vector<256x4xf32> to vector<16x16x4xf32>
    %cst_8 = arith.constant 0.000000e+00 : f32
    %15 = vector.broadcast %cst_8 : f32 to vector<20x26x4xf32>
    %c0_9 = arith.constant 0 : index
    %c0_10 = arith.constant 0 : index
    %c0_11 = arith.constant 0 : index
    %16 = vector.load %arg10[%c0_9, %c0_10, %c0_11] : memref<20x26x4xf32, #tpu.memory_space<vmem>>, vector<20x26x4xf32>
    tpu.vector_store %arg10[%c0_9, %c0_10, %c0_11], %15 {strides = array<i32>} : memref<20x26x4xf32, #tpu.memory_space<vmem>>, vector<20x26x4xf32>,
    %c2 = arith.constant 2 : index
    %c8 = arith.constant 8 : index
    %c0_12 = arith.constant 0 : index
    %17 = vector.load %arg10[%c2, %c8, %c0_12] : memref<20x26x4xf32, #tpu.memory_space<vmem>>, vector<16x16x4xf32>
    tpu.vector_store %arg10[%c2, %c8, %c0_12], %14 {strides = array<i32>} : memref<20x26x4xf32, #tpu.memory_space<vmem>>, vector<16x16x4xf32>,
    %c0_i32 = arith.constant 0 : i32
    %18 = arith.cmpi sgt, %arg1, %c0_i32 : i32
    %19 = arith.extui %18 : i1 to i32
    %20 = arith.sitofp %19 : i32 to f32
    %c0_i32_13 = arith.constant 0 : i32
    %21 = arith.cmpi slt, %arg1, %c0_i32_13 : i32
    %22 = arith.extui %21 : i1 to i32
    %23 = arith.sitofp %22 : i32 to f32
    %c0_14 = arith.constant 0 : index
    %c0_15 = arith.constant 0 : index
    %c0_16 = arith.constant 0 : index
    %c0_17 = arith.constant 0 : index
    %24 = vector.load %arg2[%c0_14, %c0_15, %c0_16, %c0_17] : memref<1x2x16x4xf32, #tpu.memory_space<vmem>>, vector<1x2x16x4xf32>
    %25 = vector.shape_cast %24 : vector<1x2x16x4xf32> to vector<2x16x4xf32>
    %26 = vector.shape_cast %25 : vector<2x16x4xf32> to vector<32x4xf32>
    %c0_18 = arith.constant 0 : index
    %c0_19 = arith.constant 0 : index
    %27 = vector.load %arg5[%c0_18, %c0_19] : memref<4x4xf32, #tpu.memory_space<vmem>>, vector<4x4xf32>
    %cst_20 = arith.constant dense<0.000000e+00> : vector<32x4xf32>
    %28 = tpu.matmul %26, %27, %cst_20 {dimension_numbers = #tpu.dot_dimension_numbers<[1], [0], [0], [1], [0, 0, 1, 1], [], []>} : vector<32x4xf32>, vector<4x4xf32>, vector<32x4xf32> -> vector<32x4xf32>
    %c0_21 = arith.constant 0 : index
    %c0_22 = arith.constant 0 : index
    %29 = vector.load %arg6[%c0_21, %c0_22] : memref<1x4xf32, #tpu.memory_space<vmem>>, vector<1x4xf32>
    %30 = vector.broadcast %29 : vector<1x4xf32> to vector<32x4xf32>
    %31 = arith.addf %28, %30 : vector<32x4xf32>
    %32 = arith.negf %31 : vector<32x4xf32>
    %33 = math.exp %32 : vector<32x4xf32>
    %cst_23 = arith.constant 1.000000e+00 : f32
    %34 = vector.broadcast %cst_23 : f32 to vector<32x4xf32>
    %35 = arith.addf %34, %33 : vector<32x4xf32>
    %36 = arith.divf %34, %35 : vector<32x4xf32>
    %37 = arith.mulf %31, %36 : vector<32x4xf32>
    %38 = vector.shape_cast %37 : vector<32x4xf32> to vector<2x16x4xf32>
    %39 = vector.broadcast %20 : f32 to vector<2x16x4xf32>
    %40 = arith.mulf %38, %39 : vector<2x16x4xf32>
    %c0_24 = arith.constant 0 : index
    %c8_25 = arith.constant 8 : index
    %c0_26 = arith.constant 0 : index
    %41 = vector.load %arg10[%c0_24, %c8_25, %c0_26] : memref<20x26x4xf32, #tpu.memory_space<vmem>>, vector<2x16x4xf32>
    tpu.vector_store %arg10[%c0_24, %c8_25, %c0_26], %40 {strides = array<i32>} : memref<20x26x4xf32, #tpu.memory_space<vmem>>, vector<2x16x4xf32>,
    %c0_27 = arith.constant 0 : index
    %c0_28 = arith.constant 0 : index
    %c0_29 = arith.constant 0 : index
    %c0_30 = arith.constant 0 : index
    %42 = vector.load %arg4[%c0_27, %c0_28, %c0_29, %c0_30] : memref<1x2x16x4xf32, #tpu.memory_space<vmem>>, vector<1x2x16x4xf32>
    %43 = vector.shape_cast %42 : vector<1x2x16x4xf32> to vector<2x16x4xf32>
    %44 = vector.shape_cast %43 : vector<2x16x4xf32> to vector<32x4xf32>
    %c0_31 = arith.constant 0 : index
    %c0_32 = arith.constant 0 : index
    %45 = vector.load %arg5[%c0_31, %c0_32] : memref<4x4xf32, #tpu.memory_space<vmem>>, vector<4x4xf32>
    %cst_33 = arith.constant dense<0.000000e+00> : vector<32x4xf32>
    %46 = tpu.matmul %44, %45, %cst_33 {dimension_numbers = #tpu.dot_dimension_numbers<[1], [0], [0], [1], [0, 0, 1, 1], [], []>} : vector<32x4xf32>, vector<4x4xf32>, vector<32x4xf32> -> vector<32x4xf32>
    %c0_34 = arith.constant 0 : index
    %c0_35 = arith.constant 0 : index
    %47 = vector.load %arg6[%c0_34, %c0_35] : memref<1x4xf32, #tpu.memory_space<vmem>>, vector<1x4xf32>
    %48 = vector.broadcast %47 : vector<1x4xf32> to vector<32x4xf32>
    %49 = arith.addf %46, %48 : vector<32x4xf32>
    %50 = arith.negf %49 : vector<32x4xf32>
    %51 = math.exp %50 : vector<32x4xf32>
    %cst_36 = arith.constant 1.000000e+00 : f32
    %52 = vector.broadcast %cst_36 : f32 to vector<32x4xf32>
    %53 = arith.addf %52, %51 : vector<32x4xf32>
    %54 = arith.divf %52, %53 : vector<32x4xf32>
    %55 = arith.mulf %49, %54 : vector<32x4xf32>
    %56 = vector.shape_cast %55 : vector<32x4xf32> to vector<2x16x4xf32>
    %57 = vector.broadcast %23 : f32 to vector<2x16x4xf32>
    %58 = arith.mulf %56, %57 : vector<2x16x4xf32>
    %c18 = arith.constant 18 : index
    %c8_37 = arith.constant 8 : index
    %c0_38 = arith.constant 0 : index
    %59 = vector.load %arg10[%c18, %c8_37, %c0_38] : memref<20x26x4xf32, #tpu.memory_space<vmem>>, vector<2x16x4xf32>
    tpu.vector_store %arg10[%c18, %c8_37, %c0_38], %58 {strides = array<i32>} : memref<20x26x4xf32, #tpu.memory_space<vmem>>, vector<2x16x4xf32>,
    %cst_39 = arith.constant 0.000000e+00 : f32
    %60 = vector.broadcast %cst_39 : f32 to vector<16x16x4xf32>
    %c0_40 = arith.constant 0 : index
    %c6 = arith.constant 6 : index
    %c0_41 = arith.constant 0 : index
    %61 = vector.load %arg10[%c0_40, %c6, %c0_41] : memref<20x26x4xf32, #tpu.memory_space<vmem>>, vector<16x16x4xf32>
    %c0_42 = arith.constant 0 : index
    %c0_43 = arith.constant 0 : index
    %c0_44 = arith.constant 0 : index
    %62 = vector.load %arg7[%c0_42, %c0_43, %c0_44] : memref<5x5x4xf32, #tpu.memory_space<vmem>>, vector<1x1x4xf32>
    %63 = vector.shape_cast %62 : vector<1x1x4xf32> to vector<4xf32>
    %64 = vector.shape_cast %63 : vector<4xf32> to vector<1x1x4xf32>
    %65 = vector.broadcast %64 : vector<1x1x4xf32> to vector<16x16x4xf32>
    %66 = arith.mulf %61, %65 : vector<16x16x4xf32>
    %67 = arith.addf %60, %66 : vector<16x16x4xf32>
    %c0_45 = arith.constant 0 : index
    %c7 = arith.constant 7 : index
    %c0_46 = arith.constant 0 : index
    %68 = vector.load %arg10[%c0_45, %c7, %c0_46] : memref<20x26x4xf32, #tpu.memory_space<vmem>>, vector<16x16x4xf32>
    %c0_47 = arith.constant 0 : index
    %c1 = arith.constant 1 : index
    %c0_48 = arith.constant 0 : index
    %69 = vector.load %arg7[%c0_47, %c1, %c0_48] : memref<5x5x4xf32, #tpu.memory_space<vmem>>, vector<1x1x4xf32>
    %70 = vector.shape_cast %69 : vector<1x1x4xf32> to vector<4xf32>
    %71 = vector.shape_cast %70 : vector<4xf32> to vector<1x1x4xf32>
    %72 = vector.broadcast %71 : vector<1x1x4xf32> to vector<16x16x4xf32>
    %73 = arith.mulf %68, %72 : vector<16x16x4xf32>
    %74 = arith.addf %67, %73 : vector<16x16x4xf32>
    %c0_49 = arith.constant 0 : index
    %c8_50 = arith.constant 8 : index
    %c0_51 = arith.constant 0 : index
    %75 = vector.load %arg10[%c0_49, %c8_50, %c0_51] : memref<20x26x4xf32, #tpu.memory_space<vmem>>, vector<16x16x4xf32>
    %c0_52 = arith.constant 0 : index
    %c2_53 = arith.constant 2 : index
    %c0_54 = arith.constant 0 : index
    %76 = vector.load %arg7[%c0_52, %c2_53, %c0_54] : memref<5x5x4xf32, #tpu.memory_space<vmem>>, vector<1x1x4xf32>
    %77 = vector.shape_cast %76 : vector<1x1x4xf32> to vector<4xf32>
    %78 = vector.shape_cast %77 : vector<4xf32> to vector<1x1x4xf32>
    %79 = vector.broadcast %78 : vector<1x1x4xf32> to vector<16x16x4xf32>
    %80 = arith.mulf %75, %79 : vector<16x16x4xf32>
    %81 = arith.addf %74, %80 : vector<16x16x4xf32>
    %c0_55 = arith.constant 0 : index
    %c9 = arith.constant 9 : index
    %c0_56 = arith.constant 0 : index
    %82 = vector.load %arg10[%c0_55, %c9, %c0_56] : memref<20x26x4xf32, #tpu.memory_space<vmem>>, vector<16x16x4xf32>
    %c0_57 = arith.constant 0 : index
    %c3 = arith.constant 3 : index
    %c0_58 = arith.constant 0 : index
    %83 = vector.load %arg7[%c0_57, %c3, %c0_58] : memref<5x5x4xf32, #tpu.memory_space<vmem>>, vector<1x1x4xf32>
    %84 = vector.shape_cast %83 : vector<1x1x4xf32> to vector<4xf32>
    %85 = vector.shape_cast %84 : vector<4xf32> to vector<1x1x4xf32>
    %86 = vector.broadcast %85 : vector<1x1x4xf32> to vector<16x16x4xf32>
    %87 = arith.mulf %82, %86 : vector<16x16x4xf32>
    %88 = arith.addf %81, %87 : vector<16x16x4xf32>
    %c0_59 = arith.constant 0 : index
    %c10 = arith.constant 10 : index
    %c0_60 = arith.constant 0 : index
    %89 = vector.load %arg10[%c0_59, %c10, %c0_60] : memref<20x26x4xf32, #tpu.memory_space<vmem>>, vector<16x16x4xf32>
    %c0_61 = arith.constant 0 : index
    %c4 = arith.constant 4 : index
    %c0_62 = arith.constant 0 : index
    %90 = vector.load %arg7[%c0_61, %c4, %c0_62] : memref<5x5x4xf32, #tpu.memory_space<vmem>>, vector<1x1x4xf32>
    %91 = vector.shape_cast %90 : vector<1x1x4xf32> to vector<4xf32>
    %92 = vector.shape_cast %91 : vector<4xf32> to vector<1x1x4xf32>
    %93 = vector.broadcast %92 : vector<1x1x4xf32> to vector<16x16x4xf32>
    %94 = arith.mulf %89, %93 : vector<16x16x4xf32>
    %95 = arith.addf %88, %94 : vector<16x16x4xf32>
    %c1_63 = arith.constant 1 : index
    %c6_64 = arith.constant 6 : index
    %c0_65 = arith.constant 0 : index
    %96 = vector.load %arg10[%c1_63, %c6_64, %c0_65] : memref<20x26x4xf32, #tpu.memory_space<vmem>>, vector<16x16x4xf32>
    %c1_66 = arith.constant 1 : index
    %c0_67 = arith.constant 0 : index
    %c0_68 = arith.constant 0 : index
    %97 = vector.load %arg7[%c1_66, %c0_67, %c0_68] : memref<5x5x4xf32, #tpu.memory_space<vmem>>, vector<1x1x4xf32>
    %98 = vector.shape_cast %97 : vector<1x1x4xf32> to vector<4xf32>
    %99 = vector.shape_cast %98 : vector<4xf32> to vector<1x1x4xf32>
    %100 = vector.broadcast %99 : vector<1x1x4xf32> to vector<16x16x4xf32>
    %101 = arith.mulf %96, %100 : vector<16x16x4xf32>
    %102 = arith.addf %95, %101 : vector<16x16x4xf32>
    %c1_69 = arith.constant 1 : index
    %c7_70 = arith.constant 7 : index
    %c0_71 = arith.constant 0 : index
    %103 = vector.load %arg10[%c1_69, %c7_70, %c0_71] : memref<20x26x4xf32, #tpu.memory_space<vmem>>, vector<16x16x4xf32>
    %c1_72 = arith.constant 1 : index
    %c1_73 = arith.constant 1 : index
    %c0_74 = arith.constant 0 : index
    %104 = vector.load %arg7[%c1_72, %c1_73, %c0_74] : memref<5x5x4xf32, #tpu.memory_space<vmem>>, vector<1x1x4xf32>
    %105 = vector.shape_cast %104 : vector<1x1x4xf32> to vector<4xf32>
    %106 = vector.shape_cast %105 : vector<4xf32> to vector<1x1x4xf32>
    %107 = vector.broadcast %106 : vector<1x1x4xf32> to vector<16x16x4xf32>
    %108 = arith.mulf %103, %107 : vector<16x16x4xf32>
    %109 = arith.addf %102, %108 : vector<16x16x4xf32>
    %c1_75 = arith.constant 1 : index
    %c8_76 = arith.constant 8 : index
    %c0_77 = arith.constant 0 : index
    %110 = vector.load %arg10[%c1_75, %c8_76, %c0_77] : memref<20x26x4xf32, #tpu.memory_space<vmem>>, vector<16x16x4xf32>
    %c1_78 = arith.constant 1 : index
    %c2_79 = arith.constant 2 : index
    %c0_80 = arith.constant 0 : index
    %111 = vector.load %arg7[%c1_78, %c2_79, %c0_80] : memref<5x5x4xf32, #tpu.memory_space<vmem>>, vector<1x1x4xf32>
    %112 = vector.shape_cast %111 : vector<1x1x4xf32> to vector<4xf32>
    %113 = vector.shape_cast %112 : vector<4xf32> to vector<1x1x4xf32>
    %114 = vector.broadcast %113 : vector<1x1x4xf32> to vector<16x16x4xf32>
    %115 = arith.mulf %110, %114 : vector<16x16x4xf32>
    %116 = arith.addf %109, %115 : vector<16x16x4xf32>
    %c1_81 = arith.constant 1 : index
    %c9_82 = arith.constant 9 : index
    %c0_83 = arith.constant 0 : index
    %117 = vector.load %arg10[%c1_81, %c9_82, %c0_83] : memref<20x26x4xf32, #tpu.memory_space<vmem>>, vector<16x16x4xf32>
    %c1_84 = arith.constant 1 : index
    %c3_85 = arith.constant 3 : index
    %c0_86 = arith.constant 0 : index
    %118 = vector.load %arg7[%c1_84, %c3_85, %c0_86] : memref<5x5x4xf32, #tpu.memory_space<vmem>>, vector<1x1x4xf32>
    %119 = vector.shape_cast %118 : vector<1x1x4xf32> to vector<4xf32>
    %120 = vector.shape_cast %119 : vector<4xf32> to vector<1x1x4xf32>
    %121 = vector.broadcast %120 : vector<1x1x4xf32> to vector<16x16x4xf32>
    %122 = arith.mulf %117, %121 : vector<16x16x4xf32>
    %123 = arith.addf %116, %122 : vector<16x16x4xf32>
    %c1_87 = arith.constant 1 : index
    %c10_88 = arith.constant 10 : index
    %c0_89 = arith.constant 0 : index
    %124 = vector.load %arg10[%c1_87, %c10_88, %c0_89] : memref<20x26x4xf32, #tpu.memory_space<vmem>>, vector<16x16x4xf32>
    %c1_90 = arith.constant 1 : index
    %c4_91 = arith.constant 4 : index
    %c0_92 = arith.constant 0 : index
    %125 = vector.load %arg7[%c1_90, %c4_91, %c0_92] : memref<5x5x4xf32, #tpu.memory_space<vmem>>, vector<1x1x4xf32>
    %126 = vector.shape_cast %125 : vector<1x1x4xf32> to vector<4xf32>
    %127 = vector.shape_cast %126 : vector<4xf32> to vector<1x1x4xf32>
    %128 = vector.broadcast %127 : vector<1x1x4xf32> to vector<16x16x4xf32>
    %129 = arith.mulf %124, %128 : vector<16x16x4xf32>
    %130 = arith.addf %123, %129 : vector<16x16x4xf32>
    %c2_93 = arith.constant 2 : index
    %c6_94 = arith.constant 6 : index
    %c0_95 = arith.constant 0 : index
    %131 = vector.load %arg10[%c2_93, %c6_94, %c0_95] : memref<20x26x4xf32, #tpu.memory_space<vmem>>, vector<16x16x4xf32>
    %c2_96 = arith.constant 2 : index
    %c0_97 = arith.constant 0 : index
    %c0_98 = arith.constant 0 : index
    %132 = vector.load %arg7[%c2_96, %c0_97, %c0_98] : memref<5x5x4xf32, #tpu.memory_space<vmem>>, vector<1x1x4xf32>
    %133 = vector.shape_cast %132 : vector<1x1x4xf32> to vector<4xf32>
    %134 = vector.shape_cast %133 : vector<4xf32> to vector<1x1x4xf32>
    %135 = vector.broadcast %134 : vector<1x1x4xf32> to vector<16x16x4xf32>
    %136 = arith.mulf %131, %135 : vector<16x16x4xf32>
    %137 = arith.addf %130, %136 : vector<16x16x4xf32>
    %c2_99 = arith.constant 2 : index
    %c7_100 = arith.constant 7 : index
    %c0_101 = arith.constant 0 : index
    %138 = vector.load %arg10[%c2_99, %c7_100, %c0_101] : memref<20x26x4xf32, #tpu.memory_space<vmem>>, vector<16x16x4xf32>
    %c2_102 = arith.constant 2 : index
    %c1_103 = arith.constant 1 : index
    %c0_104 = arith.constant 0 : index
    %139 = vector.load %arg7[%c2_102, %c1_103, %c0_104] : memref<5x5x4xf32, #tpu.memory_space<vmem>>, vector<1x1x4xf32>
    %140 = vector.shape_cast %139 : vector<1x1x4xf32> to vector<4xf32>
    %141 = vector.shape_cast %140 : vector<4xf32> to vector<1x1x4xf32>
    %142 = vector.broadcast %141 : vector<1x1x4xf32> to vector<16x16x4xf32>
    %143 = arith.mulf %138, %142 : vector<16x16x4xf32>
    %144 = arith.addf %137, %143 : vector<16x16x4xf32>
    %c2_105 = arith.constant 2 : index
    %c8_106 = arith.constant 8 : index
    %c0_107 = arith.constant 0 : index
    %145 = vector.load %arg10[%c2_105, %c8_106, %c0_107] : memref<20x26x4xf32, #tpu.memory_space<vmem>>, vector<16x16x4xf32>
    %c2_108 = arith.constant 2 : index
    %c2_109 = arith.constant 2 : index
    %c0_110 = arith.constant 0 : index
    %146 = vector.load %arg7[%c2_108, %c2_109, %c0_110] : memref<5x5x4xf32, #tpu.memory_space<vmem>>, vector<1x1x4xf32>
    %147 = vector.shape_cast %146 : vector<1x1x4xf32> to vector<4xf32>
    %148 = vector.shape_cast %147 : vector<4xf32> to vector<1x1x4xf32>
    %149 = vector.broadcast %148 : vector<1x1x4xf32> to vector<16x16x4xf32>
    %150 = arith.mulf %145, %149 : vector<16x16x4xf32>
    %151 = arith.addf %144, %150 : vector<16x16x4xf32>
    %c2_111 = arith.constant 2 : index
    %c9_112 = arith.constant 9 : index
    %c0_113 = arith.constant 0 : index
    %152 = vector.load %arg10[%c2_111, %c9_112, %c0_113] : memref<20x26x4xf32, #tpu.memory_space<vmem>>, vector<16x16x4xf32>
    %c2_114 = arith.constant 2 : index
    %c3_115 = arith.constant 3 : index
    %c0_116 = arith.constant 0 : index
    %153 = vector.load %arg7[%c2_114, %c3_115, %c0_116] : memref<5x5x4xf32, #tpu.memory_space<vmem>>, vector<1x1x4xf32>
    %154 = vector.shape_cast %153 : vector<1x1x4xf32> to vector<4xf32>
    %155 = vector.shape_cast %154 : vector<4xf32> to vector<1x1x4xf32>
    %156 = vector.broadcast %155 : vector<1x1x4xf32> to vector<16x16x4xf32>
    %157 = arith.mulf %152, %156 : vector<16x16x4xf32>
    %158 = arith.addf %151, %157 : vector<16x16x4xf32>
    %c2_117 = arith.constant 2 : index
    %c10_118 = arith.constant 10 : index
    %c0_119 = arith.constant 0 : index
    %159 = vector.load %arg10[%c2_117, %c10_118, %c0_119] : memref<20x26x4xf32, #tpu.memory_space<vmem>>, vector<16x16x4xf32>
    %c2_120 = arith.constant 2 : index
    %c4_121 = arith.constant 4 : index
    %c0_122 = arith.constant 0 : index
    %160 = vector.load %arg7[%c2_120, %c4_121, %c0_122] : memref<5x5x4xf32, #tpu.memory_space<vmem>>, vector<1x1x4xf32>
    %161 = vector.shape_cast %160 : vector<1x1x4xf32> to vector<4xf32>
    %162 = vector.shape_cast %161 : vector<4xf32> to vector<1x1x4xf32>
    %163 = vector.broadcast %162 : vector<1x1x4xf32> to vector<16x16x4xf32>
    %164 = arith.mulf %159, %163 : vector<16x16x4xf32>
    %165 = arith.addf %158, %164 : vector<16x16x4xf32>
    %c3_123 = arith.constant 3 : index
    %c6_124 = arith.constant 6 : index
    %c0_125 = arith.constant 0 : index
    %166 = vector.load %arg10[%c3_123, %c6_124, %c0_125] : memref<20x26x4xf32, #tpu.memory_space<vmem>>, vector<16x16x4xf32>
    %c3_126 = arith.constant 3 : index
    %c0_127 = arith.constant 0 : index
    %c0_128 = arith.constant 0 : index
    %167 = vector.load %arg7[%c3_126, %c0_127, %c0_128] : memref<5x5x4xf32, #tpu.memory_space<vmem>>, vector<1x1x4xf32>
    %168 = vector.shape_cast %167 : vector<1x1x4xf32> to vector<4xf32>
    %169 = vector.shape_cast %168 : vector<4xf32> to vector<1x1x4xf32>
    %170 = vector.broadcast %169 : vector<1x1x4xf32> to vector<16x16x4xf32>
    %171 = arith.mulf %166, %170 : vector<16x16x4xf32>
    %172 = arith.addf %165, %171 : vector<16x16x4xf32>
    %c3_129 = arith.constant 3 : index
    %c7_130 = arith.constant 7 : index
    %c0_131 = arith.constant 0 : index
    %173 = vector.load %arg10[%c3_129, %c7_130, %c0_131] : memref<20x26x4xf32, #tpu.memory_space<vmem>>, vector<16x16x4xf32>
    %c3_132 = arith.constant 3 : index
    %c1_133 = arith.constant 1 : index
    %c0_134 = arith.constant 0 : index
    %174 = vector.load %arg7[%c3_132, %c1_133, %c0_134] : memref<5x5x4xf32, #tpu.memory_space<vmem>>, vector<1x1x4xf32>
    %175 = vector.shape_cast %174 : vector<1x1x4xf32> to vector<4xf32>
    %176 = vector.shape_cast %175 : vector<4xf32> to vector<1x1x4xf32>
    %177 = vector.broadcast %176 : vector<1x1x4xf32> to vector<16x16x4xf32>
    %178 = arith.mulf %173, %177 : vector<16x16x4xf32>
    %179 = arith.addf %172, %178 : vector<16x16x4xf32>
    %c3_135 = arith.constant 3 : index
    %c8_136 = arith.constant 8 : index
    %c0_137 = arith.constant 0 : index
    %180 = vector.load %arg10[%c3_135, %c8_136, %c0_137] : memref<20x26x4xf32, #tpu.memory_space<vmem>>, vector<16x16x4xf32>
    %c3_138 = arith.constant 3 : index
    %c2_139 = arith.constant 2 : index
    %c0_140 = arith.constant 0 : index
    %181 = vector.load %arg7[%c3_138, %c2_139, %c0_140] : memref<5x5x4xf32, #tpu.memory_space<vmem>>, vector<1x1x4xf32>
    %182 = vector.shape_cast %181 : vector<1x1x4xf32> to vector<4xf32>
    %183 = vector.shape_cast %182 : vector<4xf32> to vector<1x1x4xf32>
    %184 = vector.broadcast %183 : vector<1x1x4xf32> to vector<16x16x4xf32>
    %185 = arith.mulf %180, %184 : vector<16x16x4xf32>
    %186 = arith.addf %179, %185 : vector<16x16x4xf32>
    %c3_141 = arith.constant 3 : index
    %c9_142 = arith.constant 9 : index
    %c0_143 = arith.constant 0 : index
    %187 = vector.load %arg10[%c3_141, %c9_142, %c0_143] : memref<20x26x4xf32, #tpu.memory_space<vmem>>, vector<16x16x4xf32>
    %c3_144 = arith.constant 3 : index
    %c3_145 = arith.constant 3 : index
    %c0_146 = arith.constant 0 : index
    %188 = vector.load %arg7[%c3_144, %c3_145, %c0_146] : memref<5x5x4xf32, #tpu.memory_space<vmem>>, vector<1x1x4xf32>
    %189 = vector.shape_cast %188 : vector<1x1x4xf32> to vector<4xf32>
    %190 = vector.shape_cast %189 : vector<4xf32> to vector<1x1x4xf32>
    %191 = vector.broadcast %190 : vector<1x1x4xf32> to vector<16x16x4xf32>
    %192 = arith.mulf %187, %191 : vector<16x16x4xf32>
    %193 = arith.addf %186, %192 : vector<16x16x4xf32>
    %c3_147 = arith.constant 3 : index
    %c10_148 = arith.constant 10 : index
    %c0_149 = arith.constant 0 : index
    %194 = vector.load %arg10[%c3_147, %c10_148, %c0_149] : memref<20x26x4xf32, #tpu.memory_space<vmem>>, vector<16x16x4xf32>
    %c3_150 = arith.constant 3 : index
    %c4_151 = arith.constant 4 : index
    %c0_152 = arith.constant 0 : index
    %195 = vector.load %arg7[%c3_150, %c4_151, %c0_152] : memref<5x5x4xf32, #tpu.memory_space<vmem>>, vector<1x1x4xf32>
    %196 = vector.shape_cast %195 : vector<1x1x4xf32> to vector<4xf32>
    %197 = vector.shape_cast %196 : vector<4xf32> to vector<1x1x4xf32>
    %198 = vector.broadcast %197 : vector<1x1x4xf32> to vector<16x16x4xf32>
    %199 = arith.mulf %194, %198 : vector<16x16x4xf32>
    %200 = arith.addf %193, %199 : vector<16x16x4xf32>
    %c4_153 = arith.constant 4 : index
    %c6_154 = arith.constant 6 : index
    %c0_155 = arith.constant 0 : index
    %201 = vector.load %arg10[%c4_153, %c6_154, %c0_155] : memref<20x26x4xf32, #tpu.memory_space<vmem>>, vector<16x16x4xf32>
    %c4_156 = arith.constant 4 : index
    %c0_157 = arith.constant 0 : index
    %c0_158 = arith.constant 0 : index
    %202 = vector.load %arg7[%c4_156, %c0_157, %c0_158] : memref<5x5x4xf32, #tpu.memory_space<vmem>>, vector<1x1x4xf32>
    %203 = vector.shape_cast %202 : vector<1x1x4xf32> to vector<4xf32>
    %204 = vector.shape_cast %203 : vector<4xf32> to vector<1x1x4xf32>
    %205 = vector.broadcast %204 : vector<1x1x4xf32> to vector<16x16x4xf32>
    %206 = arith.mulf %201, %205 : vector<16x16x4xf32>
    %207 = arith.addf %200, %206 : vector<16x16x4xf32>
    %c4_159 = arith.constant 4 : index
    %c7_160 = arith.constant 7 : index
    %c0_161 = arith.constant 0 : index
    %208 = vector.load %arg10[%c4_159, %c7_160, %c0_161] : memref<20x26x4xf32, #tpu.memory_space<vmem>>, vector<16x16x4xf32>
    %c4_162 = arith.constant 4 : index
    %c1_163 = arith.constant 1 : index
    %c0_164 = arith.constant 0 : index
    %209 = vector.load %arg7[%c4_162, %c1_163, %c0_164] : memref<5x5x4xf32, #tpu.memory_space<vmem>>, vector<1x1x4xf32>
    %210 = vector.shape_cast %209 : vector<1x1x4xf32> to vector<4xf32>
    %211 = vector.shape_cast %210 : vector<4xf32> to vector<1x1x4xf32>
    %212 = vector.broadcast %211 : vector<1x1x4xf32> to vector<16x16x4xf32>
    %213 = arith.mulf %208, %212 : vector<16x16x4xf32>
    %214 = arith.addf %207, %213 : vector<16x16x4xf32>
    %c4_165 = arith.constant 4 : index
    %c8_166 = arith.constant 8 : index
    %c0_167 = arith.constant 0 : index
    %215 = vector.load %arg10[%c4_165, %c8_166, %c0_167] : memref<20x26x4xf32, #tpu.memory_space<vmem>>, vector<16x16x4xf32>
    %c4_168 = arith.constant 4 : index
    %c2_169 = arith.constant 2 : index
    %c0_170 = arith.constant 0 : index
    %216 = vector.load %arg7[%c4_168, %c2_169, %c0_170] : memref<5x5x4xf32, #tpu.memory_space<vmem>>, vector<1x1x4xf32>
    %217 = vector.shape_cast %216 : vector<1x1x4xf32> to vector<4xf32>
    %218 = vector.shape_cast %217 : vector<4xf32> to vector<1x1x4xf32>
    %219 = vector.broadcast %218 : vector<1x1x4xf32> to vector<16x16x4xf32>
    %220 = arith.mulf %215, %219 : vector<16x16x4xf32>
    %221 = arith.addf %214, %220 : vector<16x16x4xf32>
    %c4_171 = arith.constant 4 : index
    %c9_172 = arith.constant 9 : index
    %c0_173 = arith.constant 0 : index
    %222 = vector.load %arg10[%c4_171, %c9_172, %c0_173] : memref<20x26x4xf32, #tpu.memory_space<vmem>>, vector<16x16x4xf32>
    %c4_174 = arith.constant 4 : index
    %c3_175 = arith.constant 3 : index
    %c0_176 = arith.constant 0 : index
    %223 = vector.load %arg7[%c4_174, %c3_175, %c0_176] : memref<5x5x4xf32, #tpu.memory_space<vmem>>, vector<1x1x4xf32>
    %224 = vector.shape_cast %223 : vector<1x1x4xf32> to vector<4xf32>
    %225 = vector.shape_cast %224 : vector<4xf32> to vector<1x1x4xf32>
    %226 = vector.broadcast %225 : vector<1x1x4xf32> to vector<16x16x4xf32>
    %227 = arith.mulf %222, %226 : vector<16x16x4xf32>
    %228 = arith.addf %221, %227 : vector<16x16x4xf32>
    %c4_177 = arith.constant 4 : index
    %c10_178 = arith.constant 10 : index
    %c0_179 = arith.constant 0 : index
    %229 = vector.load %arg10[%c4_177, %c10_178, %c0_179] : memref<20x26x4xf32, #tpu.memory_space<vmem>>, vector<16x16x4xf32>
    %c4_180 = arith.constant 4 : index
    %c4_181 = arith.constant 4 : index
    %c0_182 = arith.constant 0 : index
    %230 = vector.load %arg7[%c4_180, %c4_181, %c0_182] : memref<5x5x4xf32, #tpu.memory_space<vmem>>, vector<1x1x4xf32>
    %231 = vector.shape_cast %230 : vector<1x1x4xf32> to vector<4xf32>
    %232 = vector.shape_cast %231 : vector<4xf32> to vector<1x1x4xf32>
    %233 = vector.broadcast %232 : vector<1x1x4xf32> to vector<16x16x4xf32>
    %234 = arith.mulf %229, %233 : vector<16x16x4xf32>
    %235 = arith.addf %228, %234 : vector<16x16x4xf32>
    %c0_183 = arith.constant 0 : index
    %c0_184 = arith.constant 0 : index
    %236 = vector.load %arg8[%c0_183, %c0_184] : memref<1x4xf32, #tpu.memory_space<vmem>>, vector<1x4xf32>
    %237 = vector.shape_cast %236 : vector<1x4xf32> to vector<1x1x4xf32>
    %238 = vector.broadcast %237 : vector<1x1x4xf32> to vector<16x16x4xf32>
    %239 = arith.addf %235, %238 : vector<16x16x4xf32>
    %240 = arith.negf %239 : vector<16x16x4xf32>
    %241 = math.exp %240 : vector<16x16x4xf32>
    %cst_185 = arith.constant 1.000000e+00 : f32
    %242 = vector.broadcast %cst_185 : f32 to vector<16x16x4xf32>
    %243 = arith.addf %242, %241 : vector<16x16x4xf32>
    %244 = arith.divf %242, %243 : vector<16x16x4xf32>
    %245 = arith.mulf %239, %244 : vector<16x16x4xf32>
    %c0_186 = arith.constant 0 : index
    %c0_187 = arith.constant 0 : index
    %c0_188 = arith.constant 0 : index
    %c0_189 = arith.constant 0 : index
    %c0_190 = arith.constant 0 : index
    %246 = vector.load %arg9[%c0_186, %c0_187, %c0_188, %c0_189, %c0_190] : memref<1x2x16x16x4xf32, #tpu.memory_space<vmem>>, vector<1x1x16x16x4xf32>
    %247 = vector.shape_cast %246 : vector<1x1x16x16x4xf32> to vector<16x16x4xf32>
    %248 = vector.shape_cast %14 : vector<16x16x4xf32> to vector<1x1x16x16x4xf32>
    tpu.vector_store %arg9[%c0_186, %c0_187, %c0_188, %c0_189, %c0_190], %248 {strides = array<i32>} : memref<1x2x16x16x4xf32, #tpu.memory_space<vmem>>, vector<1x1x16x16x4xf32>,
    %c0_191 = arith.constant 0 : index
    %c1_192 = arith.constant 1 : index
    %c0_193 = arith.constant 0 : index
    %c0_194 = arith.constant 0 : index
    %c0_195 = arith.constant 0 : index
    %249 = vector.load %arg9[%c0_191, %c1_192, %c0_193, %c0_194, %c0_195] : memref<1x2x16x16x4xf32, #tpu.memory_space<vmem>>, vector<1x1x16x16x4xf32>
    %250 = vector.shape_cast %249 : vector<1x1x16x16x4xf32> to vector<16x16x4xf32>
    %251 = vector.shape_cast %245 : vector<16x16x4xf32> to vector<1x1x16x16x4xf32>
    tpu.vector_store %arg9[%c0_191, %c1_192, %c0_193, %c0_194, %c0_195], %251 {strides = array<i32>} : memref<1x2x16x16x4xf32, #tpu.memory_space<vmem>>, vector<1x1x16x16x4xf32>,
    return
  }
  func.func @transform_0(%arg0: i32, %arg1: i32) -> (i32, i32, i32, i32) {
    %c8_i32 = arith.constant 8 : i32
    %0 = arith.muli %arg1, %c8_i32 : i32
    %c1_i32 = arith.constant 1 : i32
    %1 = arith.subi %0, %c1_i32 : i32
    %c0_i32 = arith.constant 0 : i32
    %2 = arith.maxsi %1, %c0_i32 : i32
    %c0_i32_0 = arith.constant 0 : i32
    %c0_i32_1 = arith.constant 0 : i32
    %c0_i32_2 = arith.constant 0 : i32
    return %arg0, %2, %c0_i32_0, %c0_i32_1 : i32, i32, i32, i32
  }
  func.func @transform_1(%arg0: i32, %arg1: i32) -> (i32, i32, i32, i32) {
    %c0_i32 = arith.constant 0 : i32
    %c0_i32_0 = arith.constant 0 : i32
    %c0_i32_1 = arith.constant 0 : i32
    return %arg0, %arg1, %c0_i32, %c0_i32_0 : i32, i32, i32, i32
  }
  func.func @transform_2(%arg0: i32, %arg1: i32) -> (i32, i32, i32, i32) {
    %c1_i32 = arith.constant 1 : i32
    %0 = arith.addi %arg1, %c1_i32 : i32
    %c8_i32 = arith.constant 8 : i32
    %1 = arith.muli %0, %c8_i32 : i32
    %c7_i32 = arith.constant 7 : i32
    %2 = arith.minsi %1, %c7_i32 : i32
    %c0_i32 = arith.constant 0 : i32
    %c0_i32_0 = arith.constant 0 : i32
    %c0_i32_1 = arith.constant 0 : i32
    return %arg0, %2, %c0_i32, %c0_i32_0 : i32, i32, i32, i32
  }
  func.func @transform_3(%arg0: i32, %arg1: i32) -> (i32, i32) {
    %c0_i32 = arith.constant 0 : i32
    %c0_i32_0 = arith.constant 0 : i32
    %c0_i32_1 = arith.constant 0 : i32
    return %c0_i32, %c0_i32_0 : i32, i32
  }
  func.func @transform_4(%arg0: i32, %arg1: i32) -> (i32, i32) {
    %c0_i32 = arith.constant 0 : i32
    %c0_i32_0 = arith.constant 0 : i32
    %c0_i32_1 = arith.constant 0 : i32
    return %c0_i32, %c0_i32_0 : i32, i32
  }
  func.func @transform_5(%arg0: i32, %arg1: i32) -> (i32, i32, i32) {
    %c0_i32 = arith.constant 0 : i32
    %c0_i32_0 = arith.constant 0 : i32
    %c0_i32_1 = arith.constant 0 : i32
    %c0_i32_2 = arith.constant 0 : i32
    return %c0_i32, %c0_i32_0, %c0_i32_1 : i32, i32, i32
  }
  func.func @transform_6(%arg0: i32, %arg1: i32) -> (i32, i32) {
    %c0_i32 = arith.constant 0 : i32
    %c0_i32_0 = arith.constant 0 : i32
    %c0_i32_1 = arith.constant 0 : i32
    return %c0_i32, %c0_i32_0 : i32, i32
  }
  func.func @transform_7(%arg0: i32, %arg1: i32) -> (i32, i32, i32, i32, i32) {
    %c0_i32 = arith.constant 0 : i32
    %c0_i32_0 = arith.constant 0 : i32
    %c0_i32_1 = arith.constant 0 : i32
    %c0_i32_2 = arith.constant 0 : i32
    return %arg0, %c0_i32, %arg1, %c0_i32_0, %c0_i32_1 : i32, i32, i32, i32, i32
  }
}

</mosaic_0001>

<bundles_post_ra>
// kernel: tpu_custom_call.1
= control target key start
LH: loop header
LB: loop body
LE: loop exit
PB: predicated region body
PF: predicated region fallthrough
CT: control target
= control target key end

     0   :  { %s5298_s24 = smov 0   ;;  %s5300_s25 = smov 0   ;;  %s9601_s0 = inlined_call_operand.vmem [shape: f32[2,16,16,4], index: 0, kind: input, shape index: {}]   ;;  %s9602_s1 = inlined_call_operand.vmem [shape: f32[2,16,16,4], index: 1, kind: input, shape index: {}]   ;;  %s9603_s2 = inlined_call_operand.vmem [shape: f32[2,16,16,4], index: 2, kind: input, shape index: {}]   ;;  %s9604_s3 = inlined_call_operand.vmem [shape: f32[4,4], index: 3, kind: input, shape index: {}]   ;;  %s9605_s4 = inlined_call_operand.vmem [shape: f32[1,4], index: 4, kind: input, shape index: {}]   ;;  %s9606_s5 = inlined_call_operand.vmem [shape: f32[5,5,4], index: 5, kind: input, shape index: {}]   ;;  %s9607_s6 = inlined_call_operand.vmem [shape: f32[1,4], index: 6, kind: input, shape index: {}]   ;;  %s9608_s7 = inlined_call_operand.vmem [shape: f32[2,2,16,16,4], index: 7, kind: output, shape index: {}]  }
   0x1   :  { %s5302_s26 = smov 0  }
   0x2 LB: > { %s29_s27 = sadd.s32 1, %s5251_s25  ;;  %p4468_p0 = scmp.ge.s32.totalorder %s5255_s26, 1  ;;  %s5255_s26 = sphi %s5302_s26, %s17_s26   ;;  %s5251_s25 = sphi %s5300_s25, %s10402_s25   ;;  %s5247_s24 = sphi %s5298_s24, %s10401_s24  }
   0x3   : > { %p31_p1 = scmp.ge.s32.totalorder %s29_s27, 2  ;;  %p327_p2 = scmp.lt.s32.totalorder %s5255_s26, 3 }
   0x5   : > { %s10404_s27 = smov (%p31_p1, %s29_s27), 0  ;;  %p328_p3 = pnand %p4468_p0, %p327_p2 }
   0x7   : > { %331 = sbr.rel (%p328_p3) target bundleno = 826 (0x33a), region = 48 }
   0xc   : > { %v489_v0 = vld [vmem:[%s9604_s3] sm:$0xf]  ;;  %vm594_vm0 = vcmask 1043456   ;;  %p402_p4 = scmp.lt.s32.totalorder %s5247_s24, 1  ;;  %vm497_vm1 = vcmask 31744   ;;  %vm1050_vm2 = vcmask 25600  }
   0xd   : > { %4724 = vmatprep.subr.msk.mxu0 %vm594_vm0, %v489_v0  ;;  %4790 = vmatprep.subr.msk.mxu1 %vm594_vm0, %v489_v0  ;;  %v1171_v1 = vld [vmem:[%s9604_s3] sm:$0xf]  ;;  %v5257_v43 = vmov 0.0  }
   0xe   : > { %4725 = vmatpush3.msk.msra.mxu0 %vm594_vm0, %v489_v0  ;;  %4791 = vmatpush3.msk.msra.mxu1 %vm594_vm0, %v489_v0  ;;  %s10406_s24 = smov (!%p402_p4, %s5247_s24), 1  ;;  %v1320_v8 = vld [vmem:[%s9604_s3] sm:$0xf]  ;;  %1058 = vst.msk [vmem:[#allocation2 + $0x50] sm:$0xff] %vm497_vm1, %v5257_v43  ;;  %1047 = vst.msk [vmem:[#allocation2] sm:$0xff] %vm497_vm1, %v5257_v43 }
   0xf   : > { %4774 = vmatprep.subr.msk.mxu1 %vm594_vm0, %v1171_v1  ;;  %s5330_s9 = sshll.u32 %s10406_s24, 8  ;;  %1059 = vst.msk [vmem:[#allocation2 + $0x58] sm:$0x3] %vm1050_vm2, %v5257_v43  ;;  %1051 = vst.msk [vmem:[#allocation2 + $0x18] sm:$0x3] %vm1050_vm2, %v5257_v43  ;;  %s4679_s28 = sshll.u32 %s10406_s24, 9 }
  0x10   : > { %s5336_s12 = scalar_lea.vmem %s9602_s1, %s5330_s9  ;;  %s410_s17 = scalar_lea.vmem %s9601_s0, %s5330_s9  ;;  %1048 = vst.msk [vmem:[#allocation2 + $0x8] sm:$0xff] %vm497_vm1, %v5257_v43  ;;  %1049 = vst.msk [vmem:[#allocation2 + $0x10] sm:$0xff] %vm497_vm1, %v5257_v43  ;;  %v5587_v44 = vld [vmem:[%s9605_s4] ss:$0 sm:$0xff] }
  0x11   : > { %v457_v2 = vld [vmem:[%s5336_s12] sm:$0xff]  ;;  %v458_v4 = vld [vmem:[%s5336_s12 + $0x8] sm:$0xff]  ;;  %v459_v6 = vld [vmem:[%s5336_s12 + $0x10] sm:$0xff]  ;;  %s4678_s18 = sadd.s32 224, %s5330_s9  ;;  %1052 = vst.msk [vmem:[#allocation2 + $0x20] sm:$0xff] %vm497_vm1, %v5257_v43  ;;  %s5633_s8 = scalar_lea.vmem %s9608_s7, %s4679_s28 }
  0x12   : > { %v477_v3 = vld [vmem:[%s5336_s12 + $0xa0] sm:$0xff]  ;;  %4726 = vmatprep.mubr.msk.f32.mxu0 %vm497_vm1, %v457_v2  ;;  %v478_v5 = vld [vmem:[%s5336_s12 + $0xa8] sm:$0xff]  ;;  %v479_v7 = vld [vmem:[%s5336_s12 + $0xb0] sm:$0xff]  ;;  %s440_s21 = scalar_lea.vmem %s9603_s2, %s4678_s18  ;;  %1053 = vst.msk [vmem:[#allocation2 + $0x28] sm:$0xff] %vm497_vm1, %v5257_v43 }
  0x13   : > { %4756 = vmatprep.mubr.msk.f32.mxu1 %vm497_vm1, %v477_v3  ;;  %4727 = vmatmul.mubr.msk.f32.vlgmr.msra.gmra.mxu0 %vm497_vm1, %v458_v4  ;;  %v460_v9 = vld [vmem:[%s5336_s12 + $0x18] sm:$0xff]  ;;  %v461_v11 = vld [vmem:[%s5336_s12 + $0x20] sm:$0xff]  ;;  %v462_v13 = vld [vmem:[%s5336_s12 + $0x28] sm:$0xff]  ;;  %1054 = vst.msk [vmem:[#allocation2 + $0x30] sm:$0xff] %vm497_vm1, %v5257_v43 }
  0x14   : > { %4757 = vmatmul.mubr.msk.f32.vlgmr.msra.gmra.mxu1 %vm497_vm1, %v478_v5  ;;  %4729 = vmatprep.mubr.msk.f32.mxu0 %vm497_vm1, %v459_v6  ;;  %v480_v10 = vld [vmem:[%s5336_s12 + $0xb8] sm:$0xff]  ;;  %v481_v12 = vld [vmem:[%s5336_s12 + $0xc0] sm:$0xff]  ;;  %v482_v14 = vld [vmem:[%s5336_s12 + $0xc8] sm:$0xff]  ;;  %1055 = vst.msk [vmem:[#allocation2 + $0x38] sm:$0x3] %vm1050_vm2, %v5257_v43 }
  0x15   : > { %4759 = vmatprep.mubr.msk.f32.mxu1 %vm497_vm1, %v479_v7  ;;  %4775 = vmatpush3.msk.msra.mxu1 %vm594_vm0, %v1171_v1  ;;  %v463_v15 = vld [vmem:[%s5336_s12 + $0x30] sm:$0xff]  ;;  %v464_v17 = vld [vmem:[%s5336_s12 + $0x38] sm:$0xff]  ;;  %v465_v19 = vld [vmem:[%s5336_s12 + $0x40] sm:$0xff]  ;;  %1056 = vst.msk [vmem:[#allocation2 + $0x40] sm:$0xff] %vm497_vm1, %v5257_v43 }
  0x16   : > { %4782 = vmatprep.subr.msk.mxu1 %vm594_vm0, %v1320_v8  ;;  %v483_v16 = vld [vmem:[%s5336_s12 + $0xd0] sm:$0xff]  ;;  %v484_v18 = vld [vmem:[%s5336_s12 + $0xd8] sm:$0xff]  ;;  %v485_v20 = vld [vmem:[%s5336_s12 + $0xe0] sm:$0xff]  ;;  %1057 = vst.msk [vmem:[#allocation2 + $0x48] sm:$0xff] %vm497_vm1, %v5257_v43 }
  0x17   : > { %4730 = vmatmul.mubr.msk.f32.gmra.mxu0 %vm497_vm1, %v460_v9  ;;  %v466_v21 = vld [vmem:[%s5336_s12 + $0x48] sm:$0xff]  ;;  %v467_v23 = vld [vmem:[%s5336_s12 + $0x50] sm:$0xff]  ;;  %v468_v25 = vld [vmem:[%s5336_s12 + $0x58] sm:$0xff]  ;;  %1060 = vst.msk [vmem:[#allocation2 + $0x60] sm:$0xff] %vm497_vm1, %v5257_v43 }
  0x18   : > { %4760 = vmatmul.mubr.msk.f32.gmra.mxu1 %vm497_vm1, %v480_v10  ;;  %4732 = vmatprep.mubr.msk.f32.mxu0 %vm497_vm1, %v461_v11  ;;  %v486_v22 = vld [vmem:[%s5336_s12 + $0xe8] sm:$0xff]  ;;  %v487_v24 = vld [vmem:[%s5336_s12 + $0xf0] sm:$0xff]  ;;  %v488_v26 = vld [vmem:[%s5336_s12 + $0xf8] sm:$0xff]  ;;  %1061 = vst.msk [vmem:[#allocation2 + $0x68] sm:$0xff] %vm497_vm1, %v5257_v43 }
  0x19   : > { %4762 = vmatprep.mubr.msk.f32.mxu1 %vm497_vm1, %v481_v12  ;;  %v469_v27 = vld [vmem:[%s5336_s12 + $0x60] sm:$0xff]  ;;  %v470_v29 = vld [vmem:[%s5336_s12 + $0x68] sm:$0xff]  ;;  %v471_v31 = vld [vmem:[%s5336_s12 + $0x70] sm:$0xff]  ;;  %1062 = vst.msk [vmem:[#allocation2 + $0x70] sm:$0xff] %vm497_vm1, %v5257_v43 }
  0x1a   : > { %v1167_v28 = vld [vmem:[%s410_s17] sm:$0xff]  ;;  %v1168_v30 = vld [vmem:[%s410_s17 + $0x8] sm:$0xff]  ;;  %v1169_v32 = vld [vmem:[%s410_s17 + $0x10] sm:$0xff]  ;;  %1063 = vst.msk [vmem:[#allocation2 + $0x78] sm:$0x3] %vm1050_vm2, %v5257_v43 }
  0x1b   : > { %4733 = vmatmul.mubr.msk.f32.gmra.mxu0 %vm497_vm1, %v462_v13  ;;  %v472_v33 = vld [vmem:[%s5336_s12 + $0x78] sm:$0xff]  ;;  %v473_v35 = vld [vmem:[%s5336_s12 + $0x80] sm:$0xff]  ;;  %v474_v37 = vld [vmem:[%s5336_s12 + $0x88] sm:$0xff]  ;;  %1064 = vst.msk [vmem:[#allocation2 + $0x80] sm:$0xff] %vm497_vm1, %v5257_v43 }
  0x1c   : > { %4763 = vmatmul.mubr.msk.f32.gmra.mxu1 %vm497_vm1, %v482_v14  ;;  %4735 = vmatprep.mubr.msk.f32.mxu0 %vm497_vm1, %v463_v15  ;;  %v1170_v34 = vld [vmem:[%s410_s17 + $0x18] sm:$0xff]  ;;  %v1316_v36 = vld [vmem:[%s440_s21] sm:$0xff]  ;;  %v1317_v38 = vld [vmem:[%s440_s21 + $0x8] sm:$0xff]  ;;  %1065 = vst.msk [vmem:[#allocation2 + $0x88] sm:$0xff] %vm497_vm1, %v5257_v43 }
  0x1d   : > { %4765 = vmatprep.mubr.msk.f32.mxu1 %vm497_vm1, %v483_v16  ;;  %v475_v39 = vld [vmem:[%s5336_s12 + $0x90] sm:$0xff]  ;;  %v476_v41 = vld [vmem:[%s5336_s12 + $0x98] sm:$0xff]  ;;  %1066 = vst.msk [vmem:[#allocation2 + $0x90] sm:$0xff] %vm497_vm1, %v5257_v43  ;;  %1068 = vst.msk [vmem:[#allocation2 + $0xa0] sm:$0xff] %vm497_vm1, %v5257_v43 }
  0x1e   : > { %v1318_v40 = vld [vmem:[%s440_s21 + $0x10] sm:$0xff]  ;;  %v1319_v42 = vld [vmem:[%s440_s21 + $0x18] sm:$0xff]  ;;  %1067 = vst.msk [vmem:[#allocation2 + $0x98] sm:$0x3] %vm1050_vm2, %v5257_v43  ;;  %1071 = vst.msk [vmem:[#allocation2 + $0xb8] sm:$0x3] %vm1050_vm2, %v5257_v43 }
  0x1f   : > { %4736 = vmatmul.mubr.msk.f32.gmra.mxu0 %vm497_vm1, %v464_v17  ;;  %1069 = vst.msk [vmem:[#allocation2 + $0xa8] sm:$0xff] %vm497_vm1, %v5257_v43  ;;  %1070 = vst.msk [vmem:[#allocation2 + $0xb0] sm:$0xff] %vm497_vm1, %v5257_v43 }
  0x20   : > { %4766 = vmatmul.mubr.msk.f32.gmra.mxu1 %vm497_vm1, %v484_v18  ;;  %4738 = vmatprep.mubr.msk.f32.mxu0 %vm497_vm1, %v465_v19  ;;  %1072 = vst.msk [vmem:[#allocation2 + $0xc0] sm:$0xff] %vm497_vm1, %v5257_v43  ;;  %1073 = vst.msk [vmem:[#allocation2 + $0xc8] sm:$0xff] %vm497_vm1, %v5257_v43 }
  0x21   : > { %4768 = vmatprep.mubr.msk.f32.mxu1 %vm497_vm1, %v485_v20  ;;  %1074 = vst.msk [vmem:[#allocation2 + $0xd0] sm:$0xff] %vm497_vm1, %v5257_v43  ;;  %1076 = vst.msk [vmem:[#allocation2 + $0xe0] sm:$0xff] %vm497_vm1, %v5257_v43 }
  0x22   : > { %1075 = vst.msk [vmem:[#allocation2 + $0xd8] sm:$0x3] %vm1050_vm2, %v5257_v43  ;;  %1079 = vst.msk [vmem:[#allocation2 + $0xf8] sm:$0x3] %vm1050_vm2, %v5257_v43 }
  0x23   : > { %4739 = vmatmul.mubr.msk.f32.gmra.mxu0 %vm497_vm1, %v466_v21  ;;  %1077 = vst.msk [vmem:[#allocation2 + $0xe8] sm:$0xff] %vm497_vm1, %v5257_v43  ;;  %1078 = vst.msk [vmem:[#allocation2 + $0xf0] sm:$0xff] %vm497_vm1, %v5257_v43 }
  0x24   : > { %4769 = vmatmul.mubr.msk.f32.gmra.mxu1 %vm497_vm1, %v486_v22  ;;  %4741 = vmatprep.mubr.msk.f32.mxu0 %vm497_vm1, %v467_v23  ;;  %1080 = vst.msk [vmem:[#allocation2 + $0x100] sm:$0xff] %vm497_vm1, %v5257_v43  ;;  %1081 = vst.msk [vmem:[#allocation2 + $0x108] sm:$0xff] %vm497_vm1, %v5257_v43 }
  0x25   : > { %4771 = vmatprep.mubr.msk.f32.mxu1 %vm497_vm1, %v487_v24  ;;  %1082 = vst.msk [vmem:[#allocation2 + $0x110] sm:$0xff] %vm497_vm1, %v5257_v43  ;;  %1084 = vst.msk [vmem:[#allocation2 + $0x120] sm:$0xff] %vm497_vm1, %v5257_v43 }
  0x26   : > { %1083 = vst.msk [vmem:[#allocation2 + $0x118] sm:$0x3] %vm1050_vm2, %v5257_v43  ;;  %1087 = vst.msk [vmem:[#allocation2 + $0x138] sm:$0x3] %vm1050_vm2, %v5257_v43 }
  0x27   : > { %4742 = vmatmul.mubr.msk.f32.gmra.mxu0 %vm497_vm1, %v468_v25  ;;  %1085 = vst.msk [vmem:[#allocation2 + $0x128] sm:$0xff] %vm497_vm1, %v5257_v43  ;;  %1086 = vst.msk [vmem:[#allocation2 + $0x130] sm:$0xff] %vm497_vm1, %v5257_v43 }
  0x28   : > { %4772 = vmatmul.mubr.msk.f32.gmra.mxu1 %vm497_vm1, %v488_v26  ;;  %4744 = vmatprep.mubr.msk.f32.mxu0 %vm497_vm1, %v469_v27  ;;  %1088 = vst.msk [vmem:[#allocation2 + $0x140] sm:$0xff] %vm497_vm1, %v5257_v43  ;;  %1089 = vst.msk [vmem:[#allocation2 + $0x148] sm:$0xff] %vm497_vm1, %v5257_v43 }
  0x29   : > { %4776 = vmatprep.mubr.msk.f32.mxu1 %vm497_vm1, %v1167_v28  ;;  %1090 = vst.msk [vmem:[#allocation2 + $0x150] sm:$0xff] %vm497_vm1, %v5257_v43  ;;  %1092 = vst.msk [vmem:[#allocation2 + $0x160] sm:$0xff] %vm497_vm1, %v5257_v43 }
  0x2a   : > { %1091 = vst.msk [vmem:[#allocation2 + $0x158] sm:$0x3] %vm1050_vm2, %v5257_v43  ;;  %1095 = vst.msk [vmem:[#allocation2 + $0x178] sm:$0x3] %vm1050_vm2, %v5257_v43 }
  0x2b   : > { %4745 = vmatmul.mubr.msk.f32.gmra.mxu0 %vm497_vm1, %v470_v29  ;;  %1093 = vst.msk [vmem:[#allocation2 + $0x168] sm:$0xff] %vm497_vm1, %v5257_v43  ;;  %1094 = vst.msk [vmem:[#allocation2 + $0x170] sm:$0xff] %vm497_vm1, %v5257_v43 }
  0x2c   : > { %4777 = vmatmul.mubr.msk.f32.vlgmr.msra.gmra.mxu1 %vm497_vm1, %v1168_v30  ;;  %4747 = vmatprep.mubr.msk.f32.mxu0 %vm497_vm1, %v471_v31  ;;  %1096 = vst.msk [vmem:[#allocation2 + $0x180] sm:$0xff] %vm497_vm1, %v5257_v43  ;;  %1097 = vst.msk [vmem:[#allocation2 + $0x188] sm:$0xff] %vm497_vm1, %v5257_v43 }
  0x2d   : > { %4779 = vmatprep.mubr.msk.f32.mxu1 %vm497_vm1, %v1169_v32  ;;  %4783 = vmatpush3.msk.msra.mxu1 %vm594_vm0, %v1320_v8  ;;  %1098 = vst.msk [vmem:[#allocation2 + $0x190] sm:$0xff] %vm497_vm1, %v5257_v43  ;;  %1100 = vst.msk [vmem:[#allocation2 + $0x1a0] sm:$0xff] %vm497_vm1, %v5257_v43 }
  0x2e   : > { %1099 = vst.msk [vmem:[#allocation2 + $0x198] sm:$0x3] %vm1050_vm2, %v5257_v43  ;;  %1103 = vst.msk [vmem:[#allocation2 + $0x1b8] sm:$0x3] %vm1050_vm2, %v5257_v43 }
  0x2f   : > { %4748 = vmatmul.mubr.msk.f32.gmra.mxu0 %vm497_vm1, %v472_v33  ;;  %1101 = vst.msk [vmem:[#allocation2 + $0x1a8] sm:$0xff] %vm497_vm1, %v5257_v43  ;;  %1102 = vst.msk [vmem:[#allocation2 + $0x1b0] sm:$0xff] %vm497_vm1, %v5257_v43 }
  0x30   : > { %4780 = vmatmul.mubr.msk.f32.gmra.mxu1 %vm497_vm1, %v1170_v34  ;;  %4750 = vmatprep.mubr.msk.f32.mxu0 %vm497_vm1, %v473_v35  ;;  %1104 = vst.msk [vmem:[#allocation2 + $0x1c0] sm:$0xff] %vm497_vm1, %v5257_v43  ;;  %1105 = vst.msk [vmem:[#allocation2 + $0x1c8] sm:$0xff] %vm497_vm1, %v5257_v43 }
  0x31   : > { %4784 = vmatprep.mubr.msk.f32.mxu1 %vm497_vm1, %v1316_v36  ;;  %1106 = vst.msk [vmem:[#allocation2 + $0x1d0] sm:$0xff] %vm497_vm1, %v5257_v43  ;;  %1108 = vst.msk [vmem:[#allocation2 + $0x1e0] sm:$0xff] %vm497_vm1, %v5257_v43 }
  0x32   : > { %1107 = vst.msk [vmem:[#allocation2 + $0x1d8] sm:$0x3] %vm1050_vm2, %v5257_v43  ;;  %1111 = vst.msk [vmem:[#allocation2 + $0x1f8] sm:$0x3] %vm1050_vm2, %v5257_v43 }
  0x33   : > { %4751 = vmatmul.mubr.msk.f32.gmra.mxu0 %vm497_vm1, %v474_v37  ;;  %1109 = vst.msk [vmem:[#allocation2 + $0x1e8] sm:$0xff] %vm497_vm1, %v5257_v43  ;;  %1110 = vst.msk [vmem:[#allocation2 + $0x1f0] sm:$0xff] %vm497_vm1, %v5257_v43 }
  0x34   : > { %4785 = vmatmul.mubr.msk.f32.vlgmr.msra.gmra.mxu1 %vm497_vm1, %v1317_v38  ;;  %4753 = vmatprep.mubr.msk.f32.mxu0 %vm497_vm1, %v475_v39  ;;  %1112 = vst.msk [vmem:[#allocation2 + $0x200] sm:$0xff] %vm497_vm1, %v5257_v43  ;;  %1113 = vst.msk [vmem:[#allocation2 + $0x208] sm:$0xff] %vm497_vm1, %v5257_v43 }
  0x35   : > { %4787 = vmatprep.mubr.msk.f32.mxu1 %vm497_vm1, %v1318_v40  ;;  %1114 = vst.msk [vmem:[#allocation2 + $0x210] sm:$0xff] %vm497_vm1, %v5257_v43  ;;  %1116 = vst.msk [vmem:[#allocation2 + $0x220] sm:$0xff] %vm497_vm1, %v5257_v43 }
  0x36   : > { %1115 = vst.msk [vmem:[#allocation2 + $0x218] sm:$0x3] %vm1050_vm2, %v5257_v43  ;;  %1119 = vst.msk [vmem:[#allocation2 + $0x238] sm:$0x3] %vm1050_vm2, %v5257_v43 }
  0x37   : > { %4754 = vmatmul.mubr.msk.f32.gmra.mxu0 %vm497_vm1, %v476_v41  ;;  %1117 = vst.msk [vmem:[#allocation2 + $0x228] sm:$0xff] %vm497_vm1, %v5257_v43  ;;  %1118 = vst.msk [vmem:[#allocation2 + $0x230] sm:$0xff] %vm497_vm1, %v5257_v43 }
  0x38   : > { %4788 = vmatmul.mubr.msk.f32.gmra.mxu1 %vm497_vm1, %v1319_v42  ;;  %1120 = vst.msk [vmem:[#allocation2 + $0x240] sm:$0xff] %vm497_vm1, %v5257_v43  ;;  %1121 = vst.msk [vmem:[#allocation2 + $0x248] sm:$0xff] %vm497_vm1, %v5257_v43 }
  0x39   : > { %1122 = vst.msk [vmem:[#allocation2 + $0x250] sm:$0xff] %vm497_vm1, %v5257_v43  ;;  %1124 = vst.msk [vmem:[#allocation2 + $0x260] sm:$0xff] %vm497_vm1, %v5257_v43 }
  0x3a   : > { %1123 = vst.msk [vmem:[#allocation2 + $0x258] sm:$0x3] %vm1050_vm2, %v5257_v43  ;;  %1127 = vst.msk [vmem:[#allocation2 + $0x278] sm:$0x3] %vm1050_vm2, %v5257_v43 }
  0x3b   : > { %1125 = vst.msk [vmem:[#allocation2 + $0x268] sm:$0xff] %vm497_vm1, %v5257_v43  ;;  %1126 = vst.msk [vmem:[#allocation2 + $0x270] sm:$0xff] %vm497_vm1, %v5257_v43 }
  0xd3   : > { %v4728_v45 = vpop.f32.mrf.mxu0 }
  0xd4   : > { %v4758_v46 = vpop.f32.mrf.mxu1  ;;  %v5590_v47 = vadd.f32 %v4728_v45, %v5587_v44 }
  0xd5   : > { %v5593_v48 = vadd.f32 %v4758_v46, %v5587_v44  ;;  %v664_v49 = vpop.f32.mrf.mxu0 }
  0xd6   : > { %v764_v50 = vpop.f32.mrf.mxu1  ;;  %v4512_v51 = vmul.f32 -1.442695, %v5590_v47  ;;  %v5598_v53 = vadd.f32 %v5587_v44, %v664_v49 }
  0xd7   : > { %v4532_v52 = vmul.f32 -1.442695, %v5593_v48  ;;  %v5601_v54 = vadd.f32 %v5587_v44, %v764_v50  ;;  %v4731_v55 = vpop.f32.mrf.mxu0 }
  0xd8   : > { %v4761_v56 = vpop.f32.mrf.mxu1  ;;  %4817 = vpow2.f32 %v4512_v51  ;;  %v4511_v57 = vmul.f32 -1.442695, %v5598_v53  ;;  %v5606_v59 = vadd.f32 %v4731_v55, %v5587_v44 }
  0xd9   : > { %v4531_v58 = vmul.f32 -1.442695, %v5601_v54  ;;  %4819 = vpow2.f32 %v4532_v52  ;;  %v5609_v60 = vadd.f32 %v4761_v56, %v5587_v44  ;;  %v674_v61 = vpop.f32.mrf.mxu0 }
  0xda   : > { %v774_v62 = vpop.f32.mrf.mxu1  ;;  %4821 = vpow2.f32 %v4511_v57  ;;  %v4514_v63 = vmul.f32 -1.442695, %v5606_v59  ;;  %v5613_v0 = vadd.f32 %v5587_v44, %v674_v61 }
  0xdb   : > { %v5616_v1 = vadd.f32 %v5587_v44, %v774_v62  ;;  %4823 = vpow2.f32 %v4531_v58  ;;  %v4534_v2 = vmul.f32 -1.442695, %v5609_v60  ;;  %v4734_v3 = vpop.f32.mrf.mxu0 }
  0xdc   : > { %v4764_v4 = vpop.f32.mrf.mxu1  ;;  %4825 = vpow2.f32 %v4514_v63  ;;  %v4513_v5 = vmul.f32 -1.442695, %v5613_v0  ;;  %v5622_v7 = vadd.f32 %v4734_v3, %v5587_v44 }
  0xdd   : > { %v4533_v6 = vmul.f32 -1.442695, %v5616_v1  ;;  %4827 = vpow2.f32 %v4534_v2  ;;  %v5625_v8 = vadd.f32 %v4764_v4, %v5587_v44  ;;  %v684_v31 = vpop.f32.mrf.mxu0 }
  0xde   : > { %4829 = vpow2.f32 %v4513_v5  ;;  %v4516_v9 = vmul.f32 -1.442695, %v5622_v7  ;;  %v784_v32 = vpop.f32.mrf.mxu1  ;;  %v5642_v42 = vadd.f32 %v5587_v44, %v684_v31 }
  0xdf   : > { %4831 = vpow2.f32 %v4533_v6  ;;  %v4536_v10 = vmul.f32 -1.442695, %v5625_v8  ;;  %v4737_v34 = vpop.f32.mrf.mxu0  ;;  %v5649_v46 = vadd.f32 %v5587_v44, %v784_v32  ;;  %v5738_v32 = vld [vmem:[%s9606_s5 + $0x4] ss:$0 sm:$0xff] }
  0xe0   : > { %4833 = vpow2.f32 %v4516_v9  ;;  %v4767_v37 = vpop.f32.mrf.mxu1  ;;  %v5656_v50 = vadd.f32 %v4737_v34, %v5587_v44  ;;  %v4515_v57 = vmul.f32 -1.442695, %v5642_v42  ;;  %v5748_v34 = vld [vmem:[%s9606_s5 + $0xb] ss:$0 sm:$0xff] }
  0xe1   : > { %4835 = vpow2.f32 %v4536_v10  ;;  %v4535_v61 = vmul.f32 -1.442695, %v5649_v46 }
  0xe2   : > { %v794_v51 = vpop.f32.mrf.mxu1  ;;  %v4518_v2 = vmul.f32 -1.442695, %v5656_v50 }
  0xe3   : > { %v5679_v62 = vadd.f32 %v5587_v44, %v794_v51 }
  0xe5   : > { %v4818_v11 = vpop.eup %4817  ;;  %v4537_v5 = vmul.f32 -1.442695, %v5679_v62 }
  0xe6   : > { %v4820_v12 = vpop.eup %4819  ;;  %v920_v13 = vadd.f32 1.0, %v4818_v11 }
  0xe7   : > { %v4822_v14 = vpop.eup %4821  ;;  %v940_v15 = vadd.f32 1.0, %v4820_v12  ;;  %v4770_v12 = vpop.f32.mrf.mxu1 }
  0xe8   : > { %v4824_v16 = vpop.eup %4823  ;;  %4837 = vrcp.f32 %v920_v13  ;;  %v919_v17 = vadd.f32 1.0, %v4822_v14 }
  0xe9   : > { %v4826_v18 = vpop.eup %4825  ;;  %4839 = vrcp.f32 %v940_v15  ;;  %v939_v19 = vadd.f32 1.0, %v4824_v16 }
  0xea   : > { %v4828_v20 = vpop.eup %4827  ;;  %4841 = vrcp.f32 %v919_v17  ;;  %v922_v21 = vadd.f32 1.0, %v4826_v18 }
  0xeb   : > { %v4830_v22 = vpop.eup %4829  ;;  %4843 = vrcp.f32 %v939_v19  ;;  %v942_v23 = vadd.f32 1.0, %v4828_v20  ;;  %v5703_v20 = vadd.f32 %v4770_v12, %v5587_v44 }
  0xec   : > { %v4832_v24 = vpop.eup %4831  ;;  %4845 = vrcp.f32 %v922_v21  ;;  %v921_v25 = vadd.f32 1.0, %v4830_v22 }
  0xed   : > { %v4834_v26 = vpop.eup %4833  ;;  %4847 = vrcp.f32 %v942_v23  ;;  %v941_v27 = vadd.f32 1.0, %v4832_v24  ;;  %9749 = vst [vmem:[#allocation4_spill] sm:$0xff] %v5703_v20 }
  0xee   : > { %v4836_v28 = vpop.eup %4835  ;;  %4849 = vrcp.f32 %v921_v25  ;;  %v924_v29 = vadd.f32 1.0, %v4834_v26  ;;  %v5712_v25 = vld [vmem:[%s9606_s5] ss:$0 sm:$0xff]  ;;  %v4540_v26 = vmul.f32 -1.442695, %v5703_v20 }
  0xef   : > { %4851 = vrcp.f32 %v941_v27  ;;  %v944_v30 = vadd.f32 1.0, %v4836_v28  ;;  %v5718_v27 = vld [vmem:[%s9606_s5 + $0x2] ss:$0 sm:$0xff] }
  0xf0   : > { %4853 = vrcp.f32 %v924_v29 }
  0xf1   : > { %4855 = vrcp.f32 %v944_v30  ;;  %v5732_v30 = vld [vmem:[%s9606_s5 + $0x1] ss:$0 sm:$0xff] }
  0xf2   : > { %4857 = vpow2.f32 %v4515_v57 }
  0xf3   : > { %4859 = vpow2.f32 %v4535_v61 }
  0xf4   : > { %4861 = vpow2.f32 %v4518_v2 }
  0xf5   : > { %v4838_v33 = vpop.eup %4837 }
  0xf6   : > { %v4840_v35 = vpop.eup %4839  ;;  %v1016_v36 = vmul.f32 %v4838_v33, %v5590_v47  ;;  %v694_v47 = vpop.f32.mrf.mxu0  ;;  %v5743_v33 = vld [vmem:[%s9606_s5 + $0xa] ss:$0 sm:$0xff] }
  0xf7   : > { %v4842_v38 = vpop.eup %4841  ;;  %v1036_v39 = vmul.f32 %v4840_v35, %v5593_v48  ;;  %v5671_v58 = vadd.f32 %v5587_v44, %v694_v47 }
  0xf8   : > { %v4844_v40 = vpop.eup %4843  ;;  %1130 = vst.msk [vmem:[#allocation2 + $0x50] sm:$0xff] %vm497_vm1, %v1016_v36  ;;  %4262 = vst.msk [vmem:[%s5633_s8 + $0x8] sm:$0xff] %vm497_vm1, %v1016_v36  ;;  %v1015_v41 = vmul.f32 %v4842_v38, %v5598_v53  ;;  %v5753_v38 = vld [vmem:[%s9606_s5 + $0xc] ss:$0 sm:$0xff] }
  0xf9   : > { %v4846_v43 = vpop.eup %4845  ;;  %1150 = vst.msk [vmem:[#allocation2 + $0x190] sm:$0xff] %vm497_vm1, %v1036_v39  ;;  %4282 = vst.msk [vmem:[%s5633_s8 + $0xa8] sm:$0xff] %vm497_vm1, %v1036_v39  ;;  %v1035_v45 = vmul.f32 %v4844_v40, %v5601_v54  ;;  %v5663_v54 = vadd.f32 %v4767_v37, %v5587_v44  ;;  %v4517_v4 = vmul.f32 -1.442695, %v5671_v58  ;;  %v5758_v39 = vld [vmem:[%s9606_s5 + $0x12] ss:$0 sm:$0xff] }
  0xfa   : > { %v4848_v48 = vpop.eup %4847  ;;  %1129 = vst.msk [vmem:[#allocation2 + $0x48] sm:$0xff] %vm497_vm1, %v1015_v41  ;;  %4261 = vst.msk [vmem:[%s5633_s8] sm:$0xff] %vm497_vm1, %v1015_v41  ;;  %v1018_v49 = vmul.f32 %v4846_v43, %v5606_v59  ;;  %v5763_v40 = vld [vmem:[%s9606_s5 + $0x13] ss:$0 sm:$0xff] }
  0xfb   : > { %v4850_v52 = vpop.eup %4849  ;;  %1149 = vst.msk [vmem:[#allocation2 + $0x188] sm:$0xff] %vm497_vm1, %v1035_v45  ;;  %4281 = vst.msk [vmem:[%s5633_s8 + $0xa0] sm:$0xff] %vm497_vm1, %v1035_v45  ;;  %v1038_v53 = vmul.f32 %v4848_v48, %v5609_v60  ;;  %v4538_v3 = vmul.f32 -1.442695, %v5663_v54  ;;  %v5772_v45 = vld [vmem:[%s9606_s5 + $0x14] ss:$0 sm:$0xff] }
  0xfc   : > { %v4852_v55 = vpop.eup %4851  ;;  %1132 = vst.msk [vmem:[#allocation2 + $0x70] sm:$0xff] %vm497_vm1, %v1018_v49  ;;  %4264 = vst.msk [vmem:[%s5633_s8 + $0x18] sm:$0xff] %vm497_vm1, %v1018_v49  ;;  %v1017_v56 = vmul.f32 %v4850_v52, %v5613_v0 }
  0xfd   : > { %v4854_v59 = vpop.eup %4853  ;;  %1152 = vst.msk [vmem:[#allocation2 + $0x1b0] sm:$0xff] %vm497_vm1, %v1038_v53  ;;  %4284 = vst.msk [vmem:[%s5633_s8 + $0xb8] sm:$0xff] %vm497_vm1, %v1038_v53  ;;  %v1037_v60 = vmul.f32 %v4852_v55, %v5616_v1  ;;  %4863 = vpow2.f32 %v4538_v3 }
  0xfe   : > { %v4856_v63 = vpop.eup %4855  ;;  %1131 = vst.msk [vmem:[#allocation2 + $0x68] sm:$0xff] %vm497_vm1, %v1017_v56  ;;  %4263 = vst.msk [vmem:[%s5633_s8 + $0x10] sm:$0xff] %vm497_vm1, %v1017_v56  ;;  %v1020_v0 = vmul.f32 %v4854_v59, %v5622_v7  ;;  %4865 = vpow2.f32 %v4517_v4  ;;  %v4740_v7 = vpop.f32.mrf.mxu0 }
  0xff   : > { %1151 = vst.msk [vmem:[#allocation2 + $0x1a8] sm:$0xff] %vm497_vm1, %v1037_v60  ;;  %4283 = vst.msk [vmem:[%s5633_s8 + $0xb0] sm:$0xff] %vm497_vm1, %v1037_v60  ;;  %v1040_v1 = vmul.f32 %v4856_v63, %v5625_v8  ;;  %4867 = vpow2.f32 %v4537_v5  ;;  %v4858_v6 = vpop.eup %4857  ;;  %v5700_v18 = vadd.f32 %v4740_v7, %v5587_v44  ;;  %v1673_v35 = vld [vmem:[#allocation2 + $0x50] sm:$0xff] }
 0x100   : > { %1134 = vst.msk [vmem:[#allocation2 + $0x90] sm:$0xff] %vm497_vm1, %v1020_v0  ;;  %4266 = vst.msk [vmem:[%s5633_s8 + $0x28] sm:$0xff] %vm497_vm1, %v1020_v0  ;;  %v4860_v8 = vpop.eup %4859  ;;  %v923_v11 = vadd.f32 1.0, %v4858_v6  ;;  %v704_v15 = vpop.f32.mrf.mxu0  ;;  %v1774_v36 = vld [vmem:[#allocation2 + $0x51] sm:$0xff]  ;;  %v5775_v49 = vmul.f32 %v5718_v27, %v1673_v35  ;;  %v5784_v53 = vmul.f32 %v5743_v33, %v1673_v35  ;;  %v5797_v61 = vmul.f32 %v5758_v39, %v1673_v35 }
 0x101   : > { %1154 = vst.msk [vmem:[#allocation2 + $0x1d0] sm:$0xff] %vm497_vm1, %v1040_v1  ;;  %4286 = vst.msk [vmem:[%s5633_s8 + $0xc8] sm:$0xff] %vm497_vm1, %v1040_v1  ;;  %v4862_v9 = vpop.eup %4861  ;;  %v943_v14 = vadd.f32 1.0, %v4860_v8  ;;  %v5706_v22 = vadd.f32 %v5587_v44, %v704_v15  ;;  %v4520_v24 = vmul.f32 -1.442695, %v5700_v18  ;;  %v5725_v28 = vld [vmem:[#allocation2 + $0x46] sm:$0xff]  ;;  %v5791_v59 = vmul.f32 %v5748_v34, %v1774_v36 }
 0x102   : > { %v926_v17 = vadd.f32 1.0, %v4862_v9  ;;  %9748 = vst [vmem:[#allocation3_spill] sm:$0xff] %v5700_v18  ;;  %4869 = vrcp.f32 %v923_v11  ;;  %v5723_v44 = vld [vmem:[%s9606_s5 + $0x3] ss:$0 sm:$0xff]  ;;  %v5727_v29 = vld [vmem:[#allocation2 + $0x47] sm:$0xff]  ;;  %v1875_v37 = vld [vmem:[#allocation2 + $0x52] sm:$0xff]  ;;  %v1507_v41 = vmul.f32 %v5712_v25, %v5725_v28  ;;  %v5800_v63 = vmul.f32 %v5763_v40, %v1774_v36 }
 0x103   : > { %9750 = vst [vmem:[#allocation5_spill] sm:$0xff] %v5706_v22  ;;  %4871 = vrcp.f32 %v943_v14  ;;  %v4519_v31 = vmul.f32 -1.442695, %v5706_v22  ;;  %v1608_v43 = vmul.f32 %v5732_v30, %v5727_v29  ;;  %v1693_v47 = vld [vmem:[#allocation2 + $0x190] sm:$0xff]  ;;  %v5778_v51 = vmul.f32 %v5723_v44, %v1774_v36  ;;  %9751 = vst [vmem:[#allocation6_spill] sm:$0xff] %v5784_v53  ;;  %v5802_v0 = vld [vmem:[#allocation2 + $0x48] sm:$0xff] }
 0x104   : > { %4873 = vrcp.f32 %v926_v17  ;;  %v1794_v48 = vld [vmem:[#allocation2 + $0x191] sm:$0xff]  ;;  %v5781_v52 = vmul.f32 %v5738_v32, %v1875_v37  ;;  %9752 = vst [vmem:[#allocation7_spill] sm:$0xff] %v5791_v59  ;;  %v5794_v60 = vmul.f32 %v5753_v38, %v1875_v37  ;;  %9754 = vst [vmem:[#allocation9_spill] sm:$0xff] %v5797_v61  ;;  %v5804_v2 = vld [vmem:[#allocation2 + $0x186] sm:$0xff]  ;;  %v5809_v3 = vmul.f32 %v5772_v45, %v1875_v37 }
 0x105   : > { %v1895_v55 = vld [vmem:[#allocation2 + $0x192] sm:$0xff]  ;;  %9755 = vst [vmem:[#allocation10_spill] sm:$0xff] %v5800_v63  ;;  %v5806_v1 = vld [vmem:[#allocation2 + $0x187] sm:$0xff]  ;;  %v5812_v4 = vmul.f32 %v5718_v27, %v1693_v47  ;;  %v5815_v5 = vmul.f32 %v5723_v44, %v1794_v48  ;;  %v1640_v6 = vadd.f32 %v1608_v43, %v1507_v41  ;;  %v5821_v8 = vmul.f32 %v5743_v33, %v1693_v47  ;;  %v5826_v9 = vld [vmem:[%s9606_s5 + $0x1a] ss:$0 sm:$0xff] }
 0x106   : > { %v5786_v56 = vld [vmem:[#allocation2 + $0x4e] sm:$0xff]  ;;  %9753 = vst [vmem:[#allocation8_spill] sm:$0xff] %v5794_v60  ;;  %9756 = vst [vmem:[#allocation11_spill] sm:$0xff] %v5809_v3  ;;  %v5818_v7 = vmul.f32 %v5738_v32, %v1895_v55  ;;  %v5836_v11 = vld [vmem:[%s9606_s5 + $0x1c] ss:$0 sm:$0xff]  ;;  %v5845_v15 = vmul.f32 %v5748_v34, %v1794_v48  ;;  %v5874_v35 = vmul.f32 %v5758_v39, %v1693_v47 }
 0x107   : > { %v5788_v57 = vld [vmem:[#allocation2 + $0x4f] sm:$0xff]  ;;  %9757 = vst [vmem:[#allocation12_spill] sm:$0xff] %v5815_v5  ;;  %9759 = vst [vmem:[#allocation14_spill] sm:$0xff] %v5821_v8  ;;  %v1508_v12 = vmul.f32 %v5712_v25, %v5786_v56  ;;  %v5855_v17 = vld [vmem:[%s9606_s5 + $0x23] ss:$0 sm:$0xff]  ;;  %v5877_v36 = vmul.f32 %v5763_v40, %v1794_v48  ;;  %v5880_v37 = vmul.f32 %v5772_v45, %v1895_v55 }
 0x108   : > { %9758 = vst [vmem:[#allocation13_spill] sm:$0xff] %v5818_v7  ;;  %9760 = vst [vmem:[#allocation15_spill] sm:$0xff] %v5826_v9  ;;  %v1773_v41 = vld [vmem:[#allocation2 + $0x49] sm:$0xff] }
 0x109   : > { %9762 = vst [vmem:[#allocation17_spill] sm:$0xff] %v5836_v11  ;;  %9763 = vst [vmem:[#allocation18_spill] sm:$0xff] %v5845_v15  ;;  %v1874_v43 = vld [vmem:[#allocation2 + $0x4a] sm:$0xff]  ;;  %v5885_v15 = vld [vmem:[%s9606_s5 + $0x8] ss:$0 sm:$0xff]  ;;  %v1810_v53 = vmul.f32 %v5723_v44, %v1773_v41  ;;  %v5970_v5 = vmul.f32 %v5748_v34, %v1773_v41 }
 0x10a   : > { %v4864_v10 = vpop.eup %4863  ;;  %9765 = vst [vmem:[#allocation20_spill] sm:$0xff] %v5874_v35  ;;  %9766 = vst [vmem:[#allocation21_spill] sm:$0xff] %v5877_v36  ;;  %v5896_v36 = vmul.f32 %v5836_v11, %v1895_v55  ;;  %v5903_v63 = vld [vmem:[#allocation2 + $0x18e] sm:$0xff]  ;;  %v1911_v22 = vmul.f32 %v5738_v32, %v1874_v43  ;;  %v5926_v20 = vmul.f32 %v5885_v15, %v5725_v28 }
 0x10b   : > { %v4866_v13 = vpop.eup %4865  ;;  %v946_v19 = vadd.f32 1.0, %v4864_v10  ;;  %v5831_v10 = vld [vmem:[%s9606_s5 + $0x1b] ss:$0 sm:$0xff]  ;;  %9767 = vst [vmem:[#allocation22_spill] sm:$0xff] %v5880_v37  ;;  %v5901_v37 = vld [vmem:[%s9606_s5 + $0x9] ss:$0 sm:$0xff] }
 0x10c   : > { %v4868_v16 = vpop.eup %4867  ;;  %v925_v21 = vadd.f32 1.0, %v4866_v13  ;;  %9761 = vst [vmem:[#allocation16_spill] sm:$0xff] %v5831_v10  ;;  %v1609_v13 = vmul.f32 %v5732_v30, %v5788_v57  ;;  %v5893_v35 = vmul.f32 %v5831_v10, %v1794_v48  ;;  %9770 = vst [vmem:[#allocation25_spill] sm:$0xff] %v5896_v36  ;;  %v5905_v61 = vld [vmem:[#allocation2 + $0x18f] sm:$0xff] }
 0x10d   : > { %v945_v23 = vadd.f32 1.0, %v4868_v16  ;;  %4875 = vrcp.f32 %v946_v19  ;;  %v5850_v16 = vld [vmem:[%s9606_s5 + $0x22] ss:$0 sm:$0xff]  ;;  %v5860_v19 = vld [vmem:[%s9606_s5 + $0x24] ss:$0 sm:$0xff]  ;;  %9774 = vst [vmem:[#allocation29_spill] sm:$0xff] %v5926_v20 }
 0x10e   : > { %4877 = vrcp.f32 %v925_v21  ;;  %v1709_v21 = vmul.f32 %v5718_v27, %v5802_v0  ;;  %9769 = vst [vmem:[#allocation24_spill] sm:$0xff] %v5893_v35  ;;  %v5913_v35 = vmul.f32 %v5855_v17, %v1794_v48  ;;  %v5916_v36 = vmul.f32 %v5860_v19, %v1895_v55  ;;  %9781 = vst [vmem:[#allocation36_spill] sm:$0xff] %v5970_v5 }
 0x10f   : > { %4879 = vrcp.f32 %v945_v23  ;;  %v5842_v14 = vpop.eup %4869  ;;  %v1527_v23 = vmul.f32 %v5712_v25, %v5804_v2  ;;  %v5998_v5 = vmul.f32 %v5763_v40, %v1773_v41 }
 0x110   : > { %4881 = vpow2.f32 %v4520_v24  ;;  %v1628_v24 = vmul.f32 %v5732_v30, %v5806_v1  ;;  %v1741_v3 = vadd.f32 %v1709_v21, %v1640_v6  ;;  %9772 = vst [vmem:[#allocation27_spill] sm:$0xff] %v5913_v35  ;;  %9773 = vst [vmem:[#allocation28_spill] sm:$0xff] %v5916_v36  ;;  %v1641_v6 = vadd.f32 %v1609_v13, %v1508_v12  ;;  %v5918_v21 = vld [vmem:[#allocation2 + $0x188] sm:$0xff]  ;;  %v5946_v36 = vld [vmem:[%s9606_s5 + $0x11] ss:$0 sm:$0xff] }
 0x111   : > { %4883 = vpow2.f32 %v4540_v26  ;;  %v5868_v26 = vpop.eup %4871  ;;  %v5937_v12 = vmul.f32 %v5885_v15, %v5786_v56  ;;  %v5941_v13 = vmul.f32 %v5901_v37, %v5727_v29  ;;  %v1528_v35 = vmul.f32 %v5712_v25, %v5903_v63  ;;  %9789 = vst [vmem:[#allocation44_spill] sm:$0xff] %v5998_v5 }
 0x112   : > { %4885 = vpow2.f32 %v4519_v31  ;;  %v5871_v31 = vmul.f32 %v5753_v38, %v1895_v55  ;;  %v5887_v8 = vpop.eup %4873  ;;  %v1660_v48 = vadd.f32 %v1628_v24, %v1527_v23  ;;  %v1629_v23 = vmul.f32 %v5732_v30, %v5905_v61 }
 0x113   : > { %9775 = vst [vmem:[#allocation30_spill] sm:$0xff] %v5937_v12  ;;  %9776 = vst [vmem:[#allocation31_spill] sm:$0xff] %v5941_v13  ;;  %v5956_v12 = vmul.f32 %v5901_v37, %v5788_v57  ;;  %v5960_v13 = vmul.f32 %v5743_v33, %v5802_v0  ;;  %v1729_v20 = vmul.f32 %v5718_v27, %v5918_v21 }
 0x114   : > { %9764 = vst [vmem:[#allocation19_spill] sm:$0xff] %v5871_v31  ;;  %v5890_v31 = vmul.f32 %v5826_v9, %v1693_v47  ;;  %v5967_v7 = vadd.f32 %v5775_v49, %v1641_v6  ;;  %v5987_v49 = vmul.f32 %v5946_v36, %v5727_v29  ;;  %v5991_v6 = vmul.f32 %v5946_v36, %v5788_v57 }
 0x115   : > { %9778 = vst [vmem:[#allocation33_spill] sm:$0xff] %v5956_v12  ;;  %9779 = vst [vmem:[#allocation34_spill] sm:$0xff] %v5960_v13  ;;  %v1793_v12 = vld [vmem:[#allocation2 + $0x189] sm:$0xff]  ;;  %v6013_v57 = vmul.f32 %v5885_v15, %v5903_v63 }
 0x116   : > { %9768 = vst [vmem:[#allocation23_spill] sm:$0xff] %v5890_v31  ;;  %v5910_v31 = vmul.f32 %v5850_v16, %v1693_v47  ;;  %v5931_v47 = vld [vmem:[%s9606_s5 + $0x10] ss:$0 sm:$0xff]  ;;  %9786 = vst [vmem:[#allocation41_spill] sm:$0xff] %v5987_v49  ;;  %v1830_v29 = vmul.f32 %v5723_v44, %v1793_v12 }
 0x117   : > { %v1894_v13 = vld [vmem:[#allocation2 + $0x18a] sm:$0xff]  ;;  %9787 = vst [vmem:[#allocation42_spill] sm:$0xff] %v5991_v6  ;;  %9792 = vst [vmem:[#allocation47_spill] sm:$0xff] %v6013_v57 }
 0x118   : > { %9771 = vst [vmem:[#allocation26_spill] sm:$0xff] %v5910_v31  ;;  %v1842_v31 = vadd.f32 %v1810_v53, %v1741_v3  ;;  %v5973_v53 = vmul.f32 %v5753_v38, %v1874_v43  ;;  %v5977_v3 = vmul.f32 %v5931_v47, %v5725_v28  ;;  %v5995_v28 = vmul.f32 %v5758_v39, %v5802_v0 }
 0x119   : > { %v1931_v49 = vmul.f32 %v5738_v32, %v1894_v13  ;;  %v6017_v0 = vmul.f32 %v5901_v37, %v5806_v1 }
 0x11a   : > { %v5907_v60 = vpop.eup %4875  ;;  %9782 = vst [vmem:[#allocation37_spill] sm:$0xff] %v5973_v53  ;;  %9783 = vst [vmem:[#allocation38_spill] sm:$0xff] %v5977_v3  ;;  %v1761_v53 = vadd.f32 %v1729_v20, %v1660_v48  ;;  %v6001_v3 = vmul.f32 %v5772_v45, %v1874_v43  ;;  %v6009_v20 = vmul.f32 %v5885_v15, %v5804_v2 }
 0x11b   : > { %v5920_v59 = vpop.eup %4877  ;;  %9788 = vst [vmem:[#allocation43_spill] sm:$0xff] %v5995_v28  ;;  %9793 = vst [vmem:[#allocation48_spill] sm:$0xff] %v6017_v0  ;;  %v6033_v43 = vmul.f32 %v5748_v34, %v1793_v12  ;;  %v6036_v48 = vmul.f32 %v5753_v38, %v1894_v13  ;;  %v1776_v0 = vld [vmem:[#allocation2 + $0x71] sm:$0xff] }
 0x11c   : > { %v5933_v55 = vpop.eup %4879  ;;  %9790 = vst [vmem:[#allocation45_spill] sm:$0xff] %v6001_v3  ;;  %9791 = vst [vmem:[#allocation46_spill] sm:$0xff] %v6009_v20  ;;  %v1862_v41 = vadd.f32 %v1830_v29, %v1761_v53  ;;  %v6052_v53 = vmul.f32 %v5931_v47, %v5903_v63  ;;  %v6056_v29 = vmul.f32 %v5946_v36, %v5806_v1  ;;  %v1877_v3 = vld [vmem:[#allocation2 + $0x72] sm:$0xff] }
 0x11d   : > { %v5952_v24 = vpop.eup %4881  ;;  %9797 = vst [vmem:[#allocation52_spill] sm:$0xff] %v6033_v43  ;;  %9798 = vst [vmem:[#allocation53_spill] sm:$0xff] %v6036_v48  ;;  %v6060_v48 = vmul.f32 %v5946_v36, %v5905_v61  ;;  %v4599_v43 = vld [vmem:[%s9606_s5 + $0x20] ss:$0 sm:$0xff]  ;;  %v6101_v20 = vmul.f32 %v5831_v10, %v1793_v12  ;;  %v6165_v28 = vmul.f32 %v5772_v45, %v1877_v3 }
 0x11e   : > { %9777 = vst [vmem:[#allocation32_spill] sm:$0xff] %v5952_v24  ;;  %v5964_v18 = vpop.eup %4883  ;;  %9801 = vst [vmem:[#allocation56_spill] sm:$0xff] %v6052_v53  ;;  %v6073_v53 = vmul.f32 %v5772_v45, %v1894_v13  ;;  %v6098_v57 = vadd.f32 %v1931_v49, %v1862_v41  ;;  %v6120_v49 = vmul.f32 %v5850_v16, %v5918_v21  ;;  %v6122_v41 = vld [vmem:[#allocation2 + $0x66] sm:$0xff] }
 0x11f   : > { %9780 = vst [vmem:[#allocation35_spill] sm:$0xff] %v5964_v18  ;;  %v5979_v24 = vpop.eup %4885  ;;  %v5983_v18 = vmul.f32 %v5931_v47, %v5786_v56  ;;  %v1661_v56 = vadd.f32 %v1629_v23, %v1528_v35  ;;  %v6030_v35 = vld [vmem:[%s9606_s5 + $0x18] ss:$0 sm:$0xff]  ;;  %v6040_v23 = vmul.f32 %v5931_v47, %v5804_v2  ;;  %9802 = vst [vmem:[#allocation57_spill] sm:$0xff] %v6056_v29 }
 0x120   : > { %9784 = vst [vmem:[#allocation39_spill] sm:$0xff] %v5979_v24  ;;  %9796 = vst [vmem:[#allocation51_spill] sm:$0xff] %v6030_v35  ;;  %v6077_v29 = vmul.f32 %v6030_v35, %v5804_v2  ;;  %v6176_v24 = vmul.f32 %v5836_v11, %v1877_v3 }
 0x121   : > { %9785 = vst [vmem:[#allocation40_spill] sm:$0xff] %v5983_v18  ;;  %v6003_v18 = vadd.f32 %v1911_v22, %v1842_v31  ;;  %v6021_v22 = vmul.f32 %v5901_v37, %v5905_v61  ;;  %v6025_v31 = vmul.f32 %v5743_v33, %v5918_v21  ;;  %9799 = vst [vmem:[#allocation54_spill] sm:$0xff] %v6040_v23 }
 0x122   : > { %9803 = vst [vmem:[#allocation58_spill] sm:$0xff] %v6060_v48  ;;  %9806 = vst [vmem:[#allocation61_spill] sm:$0xff] %v6073_v53  ;;  %v4601_v48 = vld [vmem:[%s9606_s5 + $0x21] ss:$0 sm:$0xff]  ;;  %v6084_v23 = vmul.f32 %v6030_v35, %v5903_v63  ;;  %v6096_v53 = vmul.f32 %v5826_v9, %v5918_v21 }
 0x123   : > { %9794 = vst [vmem:[#allocation49_spill] sm:$0xff] %v6021_v22  ;;  %9795 = vst [vmem:[#allocation50_spill] sm:$0xff] %v6025_v31  ;;  %v6045_v31 = vld [vmem:[%s9606_s5 + $0x19] ss:$0 sm:$0xff]  ;;  %v6048_v22 = vadd.f32 %v5812_v4, %v1661_v56  ;;  %v6067_v4 = vmul.f32 %v5758_v39, %v5918_v21  ;;  %v6070_v56 = vmul.f32 %v5763_v40, %v1793_v12 }
 0x124   : > { %9800 = vst [vmem:[#allocation55_spill] sm:$0xff] %v6045_v31  ;;  %9807 = vst [vmem:[#allocation62_spill] sm:$0xff] %v6077_v29  ;;  %v1675_v29 = vld [vmem:[#allocation2 + $0x70] sm:$0xff]  ;;  %v6113_v5 = vmul.f32 %v4601_v48, %v5806_v1 }
 0x125   : > { %9804 = vst [vmem:[#allocation59_spill] sm:$0xff] %v6067_v4  ;;  %9805 = vst [vmem:[#allocation60_spill] sm:$0xff] %v6070_v56  ;;  %v6088_v4 = vmul.f32 %v6045_v31, %v5806_v1  ;;  %v6092_v56 = vmul.f32 %v6045_v31, %v5905_v61  ;;  %v6133_v1 = vmul.f32 %v5718_v27, %v1675_v29 }
 0x126   : > { %9808 = vst [vmem:[#allocation63_spill] sm:$0xff] %v6084_v23  ;;  %9811 = vst [vmem:[#allocation66_spill] sm:$0xff] %v6096_v53  ;;  %v6104_v23 = vmul.f32 %v5836_v11, %v1894_v13  ;;  %v6116_v53 = vmul.f32 %v4601_v48, %v5905_v61  ;;  %v6136_v61 = vmul.f32 %v5723_v44, %v1776_v0 }
 0x127   : > { %9809 = vst [vmem:[#allocation64_spill] sm:$0xff] %v6088_v4  ;;  %9810 = vst [vmem:[#allocation65_spill] sm:$0xff] %v6092_v56  ;;  %v6107_v4 = vmul.f32 %v4599_v43, %v5804_v2  ;;  %v6110_v56 = vmul.f32 %v4599_v43, %v5903_v63  ;;  %v6127_v2 = vmul.f32 %v5855_v17, %v1793_v12 }
 0x128   : > { %9812 = vst [vmem:[#allocation67_spill] sm:$0xff] %v6101_v20  ;;  %9813 = vst [vmem:[#allocation68_spill] sm:$0xff] %v6104_v23  ;;  %v6124_v23 = vld [vmem:[#allocation2 + $0x67] sm:$0xff]  ;;  %v6130_v63 = vmul.f32 %v5860_v19, %v1894_v13  ;;  %v6139_v43 = vmul.f32 %v5738_v32, %v1877_v3  ;;  %v6142_v21 = vmul.f32 %v5743_v33, %v1675_v29  ;;  %v1695_v13 = vld [vmem:[#allocation2 + $0x1b0] sm:$0xff] }
 0x129   : > { %9814 = vst [vmem:[#allocation69_spill] sm:$0xff] %v6107_v4  ;;  %9815 = vst [vmem:[#allocation70_spill] sm:$0xff] %v6110_v56  ;;  %v6145_v48 = vmul.f32 %v5748_v34, %v1776_v0  ;;  %v6148_v12 = vmul.f32 %v5753_v38, %v1877_v3  ;;  %v1509_v4 = vmul.f32 %v5712_v25, %v6122_v41  ;;  %v6160_v56 = vld [vmem:[#allocation2 + $0x6f] sm:$0xff] }
 0x12a   : > { %9816 = vst [vmem:[#allocation71_spill] sm:$0xff] %v6113_v5  ;;  %9817 = vst [vmem:[#allocation72_spill] sm:$0xff] %v6116_v53  ;;  %v6154_v53 = vmul.f32 %v5763_v40, %v1776_v0  ;;  %v6156_v5 = vld [vmem:[#allocation2 + $0x6e] sm:$0xff]  ;;  %v1610_v20 = vmul.f32 %v5732_v30, %v6124_v23  ;;  %v6168_v6 = vmul.f32 %v5826_v9, %v1675_v29 }
 0x12b   : > { %9818 = vst [vmem:[#allocation73_spill] sm:$0xff] %v6120_v49  ;;  %9819 = vst [vmem:[#allocation74_spill] sm:$0xff] %v6127_v2  ;;  %v1897_v2 = vld [vmem:[#allocation2 + $0x1b2] sm:$0xff]  ;;  %v6151_v49 = vmul.f32 %v5758_v39, %v1675_v29  ;;  %v6188_v29 = vmul.f32 %v5743_v33, %v1695_v13  ;;  %v6197_v3 = vld [vmem:[#allocation2 + $0x68] sm:$0xff] }
 0x12c   : > { %9820 = vst [vmem:[#allocation75_spill] sm:$0xff] %v6130_v63  ;;  %9821 = vst [vmem:[#allocation76_spill] sm:$0xff] %v6136_v61  ;;  %v1796_v63 = vld [vmem:[#allocation2 + $0x1b1] sm:$0xff]  ;;  %v2014_v61 = vmul.f32 %v5885_v15, %v6122_v41 }
 0x12d   : > { %9822 = vst [vmem:[#allocation77_spill] sm:$0xff] %v6139_v43  ;;  %9823 = vst [vmem:[#allocation78_spill] sm:$0xff] %v6145_v48  ;;  %v6182_v43 = vmul.f32 %v5723_v44, %v1796_v63 }
 0x12e   : > { %9824 = vst [vmem:[#allocation79_spill] sm:$0xff] %v6148_v12  ;;  %9825 = vst [vmem:[#allocation80_spill] sm:$0xff] %v6151_v49  ;;  %v6171_v49 = vmul.f32 %v5831_v10, %v1776_v0  ;;  %v6179_v12 = vmul.f32 %v5718_v27, %v1695_v13  ;;  %v6191_v0 = vmul.f32 %v5748_v34, %v1796_v63 }
 0x12f   : > { %9826 = vst [vmem:[#allocation81_spill] sm:$0xff] %v6154_v53  ;;  %9827 = vst [vmem:[#allocation82_spill] sm:$0xff] %v6165_v28  ;;  %v1843_v53 = vadd.f32 %v5778_v51, %v5967_v7  ;;  %v6185_v28 = vmul.f32 %v5738_v32, %v1897_v2  ;;  %v1510_v51 = vmul.f32 %v5712_v25, %v6156_v5 }
 0x130   : > { %9828 = vst [vmem:[#allocation83_spill] sm:$0xff] %v6168_v6  ;;  %9829 = vst [vmem:[#allocation84_spill] sm:$0xff] %v6171_v49  ;;  %v1611_v7 = vmul.f32 %v5732_v30, %v6160_v56  ;;  %v6203_v49 = vmul.f32 %v5758_v39, %v1695_v13  ;;  %v6206_v6 = vmul.f32 %v5763_v40, %v1796_v63 }
 0x131   : > { %9830 = vst [vmem:[#allocation85_spill] sm:$0xff] %v6176_v24  ;;  %9831 = vst [vmem:[#allocation86_spill] sm:$0xff] %v6182_v43  ;;  %v6200_v24 = vmul.f32 %v5753_v38, %v1897_v2  ;;  %v6212_v43 = vmul.f32 %v5826_v9, %v1695_v13  ;;  %v1944_v48 = vadd.f32 %v5781_v52, %v1843_v53  ;;  %v6231_v52 = vld [vmem:[#allocation2 + $0x69] sm:$0xff] }
 0x132   : > { %9832 = vst [vmem:[#allocation87_spill] sm:$0xff] %v6185_v28  ;;  %9833 = vst [vmem:[#allocation88_spill] sm:$0xff] %v6191_v0  ;;  %v1642_v28 = vadd.f32 %v1610_v20, %v1509_v4  ;;  %v6209_v0 = vmul.f32 %v5772_v45, %v1897_v2  ;;  %v1711_v20 = vmul.f32 %v5718_v27, %v6197_v3  ;;  %v6233_v53 = vld [vmem:[#allocation2 + $0x6a] sm:$0xff] }
 0x133   : > { %9834 = vst [vmem:[#allocation89_spill] sm:$0xff] %v6200_v24  ;;  %9835 = vst [vmem:[#allocation90_spill] sm:$0xff] %v6203_v49  ;;  %v6218_v24 = vmul.f32 %v5831_v10, %v1796_v63  ;;  %v6221_v49 = vmul.f32 %v5836_v11, %v1897_v2  ;;  %v6229_v4 = vmul.f32 %v5855_v17, %v1796_v63 }
 0x134   : > { %9836 = vst [vmem:[#allocation91_spill] sm:$0xff] %v6206_v6  ;;  %9837 = vst [vmem:[#allocation92_spill] sm:$0xff] %v6209_v0  ;;  %v6224_v6 = vmul.f32 %v5850_v16, %v1695_v13  ;;  %v6239_v16 = vmul.f32 %v5860_v19, %v1897_v2  ;;  %v1743_v13 = vadd.f32 %v1711_v20, %v1642_v28  ;;  %v6318_v20 = vld [vmem:[#allocation2 + $0x1ae] sm:$0xff] }
 0x135   : > { %9838 = vst [vmem:[#allocation93_spill] sm:$0xff] %v6212_v43  ;;  %9839 = vst [vmem:[#allocation94_spill] sm:$0xff] %v6218_v24  ;;  %v1643_v43 = vadd.f32 %v1611_v7, %v1510_v51  ;;  %v2015_v24 = vmul.f32 %v5885_v15, %v6156_v5  ;;  %v1019_v17 = vmul.f32 %v5842_v14, %v5642_v42  ;;  %v6255_v14 = vld [vmem:[#allocation2 + $0x1a6] sm:$0xff] }
 0x136   : > { %9840 = vst [vmem:[#allocation95_spill] sm:$0xff] %v6221_v49  ;;  %9841 = vst [vmem:[#allocation96_spill] sm:$0xff] %v6224_v6  ;;  %v2046_v49 = vadd.f32 %v2014_v61, %v6003_v18  ;;  %v1039_v63 = vmul.f32 %v5868_v26, %v5649_v46  ;;  %v2115_v7 = vmul.f32 %v5901_v37, %v6124_v23  ;;  %v6257_v46 = vld [vmem:[#allocation2 + $0x1a7] sm:$0xff]  ;;  %v6363_v6 = vld [vmem:[#allocation2 + $0x90] sm:$0xff] }
 0x137   : > { %9842 = vst [vmem:[#allocation97_spill] sm:$0xff] %v6229_v4  ;;  %9843 = vst [vmem:[#allocation98_spill] sm:$0xff] %v6239_v16  ;;  %v2047_v51 = vadd.f32 %v2015_v24, %v1944_v48  ;;  %v1022_v4 = vmul.f32 %v5887_v8, %v5656_v50  ;;  %v1042_v18 = vmul.f32 %v5907_v60, %v5663_v54 }
 0x138   : > { %v1812_v19 = vmul.f32 %v5723_v44, %v6231_v52  ;;  %v1913_v42 = vmul.f32 %v5738_v32, %v6233_v53  ;;  %1133 = vst.msk [vmem:[#allocation2 + $0x88] sm:$0xff] %vm497_vm1, %v1019_v17  ;;  %4265 = vst.msk [vmem:[%s5633_s8 + $0x20] sm:$0xff] %vm497_vm1, %v1019_v17  ;;  %v1021_v50 = vmul.f32 %v5920_v59, %v5671_v58 }
 0x139   : > { %1153 = vst.msk [vmem:[#allocation2 + $0x1c8] sm:$0xff] %vm497_vm1, %v1039_v63  ;;  %4285 = vst.msk [vmem:[%s5633_s8 + $0xc0] sm:$0xff] %vm497_vm1, %v1039_v63  ;;  %v1041_v54 = vmul.f32 %v5933_v55, %v5679_v62  ;;  %v6270_v60 = vadd.f32 %v6133_v1, %v1643_v43  ;;  %v2116_v8 = vmul.f32 %v5901_v37, %v6160_v56 }
 0x13a   : > { %v2147_v26 = vadd.f32 %v2115_v7, %v2046_v49  ;;  %v2216_v24 = vmul.f32 %v5743_v33, %v6197_v3  ;;  %1136 = vst.msk [vmem:[#allocation2 + $0xb0] sm:$0xff] %vm497_vm1, %v1022_v4  ;;  %4268 = vst.msk [vmem:[%s5633_s8 + $0x38] sm:$0xff] %vm497_vm1, %v1022_v4  ;;  %v1844_v58 = vadd.f32 %v1812_v19, %v1743_v13  ;;  %v9849_v4 = vld [vmem:[#allocation12_spill] sm:$0xff] }
 0x13b   : > { %1156 = vst.msk [vmem:[#allocation2 + $0x1f0] sm:$0xff] %vm497_vm1, %v1042_v18  ;;  %4288 = vst.msk [vmem:[%s5633_s8 + $0xd8] sm:$0xff] %vm497_vm1, %v1042_v18  ;;  %v2317_v62 = vmul.f32 %v5748_v34, %v6231_v52  ;;  %v6286_v59 = vmul.f32 %v5753_v38, %v6233_v53  ;;  %v6290_v55 = vmul.f32 %v5931_v47, %v6122_v41 }
 0x13c   : > { %1135 = vst.msk [vmem:[#allocation2 + $0xa8] sm:$0xff] %vm497_vm1, %v1021_v50  ;;  %4267 = vst.msk [vmem:[%s5633_s8 + $0x30] sm:$0xff] %vm497_vm1, %v1021_v50  ;;  %v2148_v28 = vadd.f32 %v2116_v8, %v2047_v51  ;;  %v6300_v49 = vmul.f32 %v5931_v47, %v6156_v5  ;;  %v1529_v2 = vmul.f32 %v5712_v25, %v6255_v14  ;;  %v6348_v8 = vld [vmem:[#allocation2 + $0x1a8] sm:$0xff] }
 0x13d   : > { %9844 = vst [vmem:[#allocation99_spill] sm:$0xff] %v6290_v55  ;;  %1155 = vst.msk [vmem:[#allocation2 + $0x1e8] sm:$0xff] %vm497_vm1, %v1041_v54  ;;  %v1630_v1 = vmul.f32 %v5732_v30, %v6257_v46  ;;  %v6308_v61 = vmul.f32 %v5946_v36, %v6124_v23  ;;  %v6312_v43 = vmul.f32 %v5946_v36, %v6160_v56 }
 0x13e   : > { %4287 = vst.msk [vmem:[%s5633_s8 + $0xd0] sm:$0xff] %vm497_vm1, %v1041_v54  ;;  %9845 = vst [vmem:[#allocation100_spill] sm:$0xff] %v6300_v49  ;;  %v6316_v48 = vmul.f32 %v5758_v39, %v6197_v3  ;;  %v1863_v13 = vadd.f32 %v9849_v4, %v6048_v22  ;;  %v2248_v17 = vadd.f32 %v2216_v24, %v2147_v26  ;;  %v6346_v54 = vld [vmem:[#allocation2 + $0x1af] sm:$0xff] }
 0x13f   : > { %9846 = vst [vmem:[#allocation101_spill] sm:$0xff] %v6308_v61  ;;  %9847 = vst [vmem:[#allocation102_spill] sm:$0xff] %v6312_v43  ;;  %v6324_v63 = vmul.f32 %v5763_v40, %v6231_v52  ;;  %v6328_v51 = vmul.f32 %v5772_v45, %v6233_v53  ;;  %v2034_v7 = vmul.f32 %v5885_v15, %v6255_v14  ;;  %v6360_v4 = vld [vmem:[#allocation2 + $0x87] sm:$0xff]  ;;  %v6369_v0 = vld [vmem:[#allocation2 + $0x8f] sm:$0xff] }
 0x140   : > { %9848 = vst [vmem:[#allocation103_spill] sm:$0xff] %v6316_v48  ;;  %v6332_v18 = vadd.f32 %v1913_v42, %v1844_v58  ;;  %v6336_v19 = vmul.f32 %v6030_v35, %v6122_v41  ;;  %v6340_v22 = vmul.f32 %v6030_v35, %v6156_v5  ;;  %v6344_v50 = vmul.f32 %v6045_v31, %v6124_v23  ;;  %v6356_v58 = vld [vmem:[#allocation2 + $0x86] sm:$0xff]  ;;  %v6358_v5 = vld [vmem:[#allocation2 + $0x8e] sm:$0xff] }
 0x141   : > { %9850 = vst [vmem:[#allocation12_spill] sm:$0xff] %v6324_v63  ;;  %9851 = vst [vmem:[#allocation104_spill] sm:$0xff] %v6328_v51  ;;  %v6351_v26 = vadd.f32 %v6142_v21, %v2148_v28  ;;  %v1530_v42 = vmul.f32 %v5712_v25, %v6318_v20  ;;  %v1662_v41 = vadd.f32 %v1630_v1, %v1529_v2  ;;  %v9856_v23 = vld [vmem:[#allocation13_spill] sm:$0xff]  ;;  %v6373_v2 = vld [vmem:[#allocation2 + $0x88] sm:$0xff] }
 0x142   : > { %9852 = vst [vmem:[#allocation105_spill] sm:$0xff] %v6336_v19  ;;  %9853 = vst [vmem:[#allocation106_spill] sm:$0xff] %v6340_v22  ;;  %v2066_v24 = vadd.f32 %v2034_v7, %v6098_v57  ;;  %v1964_v16 = vadd.f32 %v9856_v23, %v1863_v13  ;;  %v1511_v21 = vmul.f32 %v5712_v25, %v6356_v58  ;;  %v6383_v51 = vld [vmem:[#allocation2 + $0x89] sm:$0xff] }
 0x143   : > { %9854 = vst [vmem:[#allocation107_spill] sm:$0xff] %v6344_v50  ;;  %9855 = vst [vmem:[#allocation108_spill] sm:$0xff] %v6358_v5  ;;  %v1512_v28 = vmul.f32 %v5712_v25, %v6358_v5  ;;  %v1612_v57 = vmul.f32 %v5732_v30, %v6360_v4  ;;  %v1631_v1 = vmul.f32 %v5732_v30, %v6346_v54  ;;  %v1795_v63 = vld [vmem:[#allocation2 + $0x1a9] sm:$0xff] }
 0x144   : > { %9857 = vst [vmem:[#allocation13_spill] sm:$0xff] %v6369_v0  ;;  %9858 = vst [vmem:[#allocation109_spill] sm:$0xff] %v6373_v2  ;;  %v1731_v13 = vmul.f32 %v5718_v27, %v6348_v8  ;;  %v2135_v7 = vmul.f32 %v5901_v37, %v6257_v46  ;;  %v1613_v23 = vmul.f32 %v5732_v30, %v6369_v0  ;;  %v6391_v5 = vld [vmem:[#allocation2 + $0x8a] sm:$0xff] }
 0x145   : > { %v2349_v50 = vadd.f32 %v2317_v62, %v2248_v17  ;;  %v2035_v22 = vmul.f32 %v5885_v15, %v6318_v20  ;;  %v1644_v19 = vadd.f32 %v1612_v57, %v1511_v21  ;;  %v1713_v48 = vmul.f32 %v5718_v27, %v6373_v2 }
 0x146   : > { %v1763_v43 = vadd.f32 %v1731_v13, %v1662_v41  ;;  %v2167_v61 = vadd.f32 %v2135_v7, %v2066_v24  ;;  %v1714_v49 = vmul.f32 %v5718_v27, %v6363_v6  ;;  %v1645_v55 = vadd.f32 %v1613_v23, %v1512_v28  ;;  %v1896_v41 = vld [vmem:[#allocation2 + $0x1aa] sm:$0xff] }
 0x147   : > { %v6395_v0 = vmul.f32 %v6045_v31, %v6160_v56  ;;  %v2067_v62 = vadd.f32 %v2035_v22, %v1964_v16  ;;  %v1745_v17 = vadd.f32 %v1713_v48, %v1644_v19  ;;  %v1814_v21 = vmul.f32 %v5723_v44, %v6383_v51 }
 0x148   : > { %v1663_v57 = vadd.f32 %v1631_v1, %v1530_v42  ;;  %v1832_v2 = vmul.f32 %v5723_v44, %v1795_v63  ;;  %v2236_v24 = vmul.f32 %v5743_v33, %v6348_v8  ;;  %v6402_v13 = vadd.f32 %v1714_v49, %v1645_v55 }
 0x149   : > { %9859 = vst [vmem:[#allocation110_spill] sm:$0xff] %v6395_v0  ;;  %v6406_v28 = vmul.f32 %v5826_v9, %v6197_v3  ;;  %v2136_v56 = vmul.f32 %v5901_v37, %v6346_v54  ;;  %v1846_v16 = vadd.f32 %v1814_v21, %v1745_v17  ;;  %v1915_v48 = vmul.f32 %v5738_v32, %v6391_v5 }
 0x14a   : > { %v6414_v19 = vmul.f32 %v5831_v10, %v6231_v52  ;;  %v6418_v22 = vmul.f32 %v5836_v11, %v6233_v53  ;;  %v1864_v55 = vadd.f32 %v1832_v2, %v1763_v43  ;;  %v2268_v49 = vadd.f32 %v2236_v24, %v2167_v61  ;;  %v6459_v24 = vld [vmem:[#allocation2 + $0x1ce] sm:$0xff] }
 0x14b   : > { %9860 = vst [vmem:[#allocation111_spill] sm:$0xff] %v6406_v28  ;;  %v6421_v3 = vadd.f32 %v6286_v59, %v2349_v50  ;;  %v1933_v42 = vmul.f32 %v5738_v32, %v1896_v41  ;;  %v2168_v1 = vadd.f32 %v2136_v56, %v2067_v62  ;;  %v6424_v7 = vadd.f32 %v1915_v48, %v1846_v16  ;;  %v6449_v50 = vld [vmem:[#allocation2 + $0x1c6] sm:$0xff]  ;;  %v6463_v16 = vld [vmem:[#allocation2 + $0x1cf] sm:$0xff] }
 0x14c   : > { %9861 = vst [vmem:[#allocation112_spill] sm:$0xff] %v6414_v19  ;;  %9862 = vst [vmem:[#allocation113_spill] sm:$0xff] %v6418_v22  ;;  %v1764_v23 = vadd.f32 %v6179_v12, %v1663_v57  ;;  %v2337_v17 = vmul.f32 %v5748_v34, %v1795_v63  ;;  %v2438_v52 = vmul.f32 %v5753_v38, %v1896_v41  ;;  %v6461_v56 = vld [vmem:[#allocation2 + $0x1c7] sm:$0xff] }
 0x14d   : > { %v6431_v53 = vmul.f32 %v5931_v47, %v6255_v14  ;;  %v6435_v61 = vmul.f32 %v5931_v47, %v6318_v20  ;;  %v6439_v59 = vmul.f32 %v5946_v36, %v6257_v46  ;;  %v6443_v43 = vmul.f32 %v5946_v36, %v6346_v54  ;;  %v6532_v22 = vld [vmem:[#allocation2 + $0x1ca] sm:$0xff] }
 0x14e   : > { %v6447_v12 = vmul.f32 %v5758_v39, %v6348_v8  ;;  %v6451_v2 = vadd.f32 %v1933_v42, %v1864_v55  ;;  %v2369_v62 = vadd.f32 %v2337_v17, %v2268_v49  ;;  %v6454_v21 = vmul.f32 %v5763_v40, %v1795_v63  ;;  %v1778_v42 = vld [vmem:[#allocation2 + $0x91] sm:$0xff] }
 0x14f   : > { %9863 = vst [vmem:[#allocation114_spill] sm:$0xff] %v6431_v53  ;;  %9864 = vst [vmem:[#allocation115_spill] sm:$0xff] %v6435_v61  ;;  %v6457_v57 = vmul.f32 %v5772_v45, %v1896_v41  ;;  %v2269_v48 = vadd.f32 %v6188_v29, %v2168_v1  ;;  %v6472_v55 = vmul.f32 %v6030_v35, %v6318_v20  ;;  %v1879_v17 = vld [vmem:[#allocation2 + $0x92] sm:$0xff] }
 0x150   : > { %9865 = vst [vmem:[#allocation116_spill] sm:$0xff] %v6439_v59  ;;  %9866 = vst [vmem:[#allocation117_spill] sm:$0xff] %v6443_v43  ;;  %v6476_v49 = vmul.f32 %v6045_v31, %v6257_v46  ;;  %v6484_v29 = vmul.f32 %v5826_v9, %v6348_v8  ;;  %v6490_v20 = vmul.f32 %v5836_v11, %v1896_v41  ;;  %v1697_v1 = vld [vmem:[#allocation2 + $0x1d0] sm:$0xff] }
 0x151   : > { %9867 = vst [vmem:[#allocation118_spill] sm:$0xff] %v6447_v12  ;;  %9868 = vst [vmem:[#allocation119_spill] sm:$0xff] %v6454_v21  ;;  %v6468_v12 = vmul.f32 %v6030_v35, %v6255_v14  ;;  %v6487_v14 = vmul.f32 %v5831_v10, %v1795_v63  ;;  %v6492_v21 = vld [vmem:[#allocation2 + $0x1c8] sm:$0xff]  ;;  %v1531_v46 = vmul.f32 %v5712_v25, %v6449_v50  ;;  %v9884_v35 = vld [vmem:[#allocation78_spill] sm:$0xff] }
 0x152   : > { %9869 = vst [vmem:[#allocation120_spill] sm:$0xff] %v6457_v57  ;;  %9871 = vst [vmem:[#allocation122_spill] sm:$0xff] %v6472_v55  ;;  %v6480_v57 = vmul.f32 %v6045_v31, %v6346_v54  ;;  %v1532_v54 = vmul.f32 %v5712_v25, %v6459_v24  ;;  %v1633_v8 = vmul.f32 %v5732_v30, %v6463_v16  ;;  %v1798_v55 = vld [vmem:[#allocation2 + $0x1d1] sm:$0xff] }
 0x153   : > { %9870 = vst [vmem:[#allocation121_spill] sm:$0xff] %v6468_v12  ;;  %9872 = vst [vmem:[#allocation123_spill] sm:$0xff] %v6476_v49  ;;  %v6502_v63 = vadd.f32 %v2438_v52, %v2369_v62  ;;  %v6505_v41 = vmul.f32 %v5723_v44, %v1778_v42  ;;  %v1734_v49 = vmul.f32 %v5718_v27, %v1697_v1 }
 0x154   : > { %9873 = vst [vmem:[#allocation124_spill] sm:$0xff] %v6480_v57  ;;  %9874 = vst [vmem:[#allocation125_spill] sm:$0xff] %v6484_v29  ;;  %v1632_v57 = vmul.f32 %v5732_v30, %v6461_v56  ;;  %v6514_v29 = vld [vmem:[#allocation2 + $0x1c9] sm:$0xff]  ;;  %v1665_v43 = vadd.f32 %v1633_v8, %v1532_v54  ;;  %v1733_v52 = vmul.f32 %v5718_v27, %v6492_v21 }
 0x155   : > { %9875 = vst [vmem:[#allocation126_spill] sm:$0xff] %v6487_v14  ;;  %9876 = vst [vmem:[#allocation127_spill] sm:$0xff] %v6490_v20  ;;  %v6508_v20 = vmul.f32 %v5738_v32, %v1879_v17  ;;  %v6512_v14 = vmul.f32 %v5743_v33, %v6363_v6  ;;  %v6520_v62 = vmul.f32 %v5748_v34, %v1778_v42 }
 0x156   : > { %v1664_v12 = vadd.f32 %v1632_v57, %v1531_v46  ;;  %v6523_v59 = vmul.f32 %v5753_v38, %v1879_v17  ;;  %v6527_v61 = vmul.f32 %v5758_v39, %v6363_v6  ;;  %v6530_v53 = vmul.f32 %v5763_v40, %v1778_v42  ;;  %v804_v57 = vpop.f32.mrf.mxu1  ;;  %v1899_v46 = vld [vmem:[#allocation2 + $0x1d2] sm:$0xff]  ;;  %v9883_v42 = vld [vmem:[#allocation76_spill] sm:$0xff] }
 0x157   : > { %9877 = vst [vmem:[#allocation128_spill] sm:$0xff] %v6520_v62  ;;  %v2016_v54 = vmul.f32 %v5885_v15, %v6356_v58  ;;  %v6536_v19 = vadd.f32 %v1734_v49, %v1665_v43  ;;  %v1834_v28 = vmul.f32 %v5723_v44, %v6514_v29  ;;  %v6541_v0 = vmul.f32 %v5772_v45, %v1879_v17  ;;  %v9896_v62 = vld [vmem:[#allocation87_spill] sm:$0xff] }
 0x158   : > { %9878 = vst [vmem:[#allocation129_spill] sm:$0xff] %v6523_v59  ;;  %9879 = vst [vmem:[#allocation130_spill] sm:$0xff] %v6530_v53  ;;  %v1765_v8 = vadd.f32 %v1733_v52, %v1664_v12  ;;  %v6544_v6 = vmul.f32 %v5723_v44, %v1798_v55  ;;  %v1845_v31 = vadd.f32 %v9883_v42, %v6270_v60  ;;  %v9885_v12 = vld [vmem:[#allocation86_spill] sm:$0xff]  ;;  %v4743_v53 = vpop.f32.mrf.mxu0  ;;  %v9888_v42 = vld [vmem:[#allocation88_spill] sm:$0xff] }
 0x159   : > { %9880 = vst [vmem:[#allocation131_spill] sm:$0xff] %v6536_v19  ;;  %9881 = vst [vmem:[#allocation132_spill] sm:$0xff] %v6541_v0  ;;  %v2350_v59 = vadd.f32 %v9884_v35, %v6351_v26  ;;  %v2048_v11 = vadd.f32 %v2016_v54, %v6332_v18  ;;  %v1865_v43 = vadd.f32 %v9885_v12, %v1764_v23  ;;  %v4773_v26 = vpop.f32.mrf.mxu1 }
 0x15a   : > { %9882 = vst [vmem:[#allocation133_spill] sm:$0xff] %v6544_v6  ;;  %v1866_v49 = vadd.f32 %v1834_v28, %v1765_v8  ;;  %v1935_v52 = vmul.f32 %v5738_v32, %v6532_v22  ;;  %v6555_v17 = vmul.f32 %v5738_v32, %v1899_v46  ;;  %v6558_v0 = vmul.f32 %v5743_v33, %v1697_v1 }
 0x15b   : > { %v6561_v60 = vmul.f32 %v5748_v34, %v1798_v55  ;;  %v2370_v35 = vadd.f32 %v9888_v42, %v2269_v48  ;;  %v6565_v18 = vmul.f32 %v5753_v38, %v1899_v46  ;;  %v6568_v28 = vmul.f32 %v5758_v39, %v1697_v1  ;;  %v9894_v42 = vld [vmem:[#allocation32_spill] sm:$0xff] }
 0x15c   : > { %9886 = vst [vmem:[#allocation76_spill] sm:$0xff] %v6555_v17  ;;  %v2117_v23 = vmul.f32 %v5901_v37, %v6360_v4  ;;  %v6572_v54 = vadd.f32 %v1935_v52, %v1866_v49  ;;  %v6575_v8 = vmul.f32 %v5763_v40, %v1798_v55  ;;  %v6578_v12 = vmul.f32 %v5772_v45, %v1899_v46  ;;  %v714_v49 = vpop.f32.mrf.mxu0  ;;  %v9897_v52 = vld [vmem:[#allocation89_spill] sm:$0xff]  ;;  %v9898_v55 = vld [vmem:[#allocation35_spill] sm:$0xff] }
 0x15d   : > { %9887 = vst [vmem:[#allocation78_spill] sm:$0xff] %v6561_v60  ;;  %9889 = vst [vmem:[#allocation86_spill] sm:$0xff] %v6565_v18  ;;  %v9893_v60 = vld [vmem:[#allocation77_spill] sm:$0xff]  ;;  %v928_v17 = vadd.f32 1.0, %v9894_v42  ;;  %v9895_v18 = vld [vmem:[#allocation79_spill] sm:$0xff]  ;;  %v2520_v1 = vmul.f32 %v5931_v47, %v6356_v58  ;;  %v1966_v10 = vadd.f32 %v9896_v62, %v1865_v43 }
 0x15e   : > { %9890 = vst [vmem:[#allocation88_spill] sm:$0xff] %v6572_v54  ;;  %9891 = vst [vmem:[#allocation134_spill] sm:$0xff] %v6575_v8  ;;  %v1946_v48 = vadd.f32 %v9893_v60, %v1845_v31  ;;  %v2149_v6 = vadd.f32 %v2117_v23, %v2048_v11  ;;  %v2451_v19 = vadd.f32 %v9895_v18, %v2350_v59  ;;  %v948_v8 = vadd.f32 1.0, %v9898_v55  ;;  %v6591_v46 = vld [vmem:[%s9605_s4] ss:$0 sm:$0xff]  ;;  %v814_v59 = vpop.f32.mrf.mxu1  ;;  %v9902_v58 = vld [vmem:[#allocation108_spill] sm:$0xff] }
 0x15f   : > { %9892 = vst [vmem:[#allocation135_spill] sm:$0xff] %v6578_v12  ;;  %v2471_v54 = vadd.f32 %v9897_v52, %v2370_v35  ;;  %9899 = vst [vmem:[#allocation77_spill] sm:$0xff] %v6591_v46  ;;  %v6594_v31 = vadd.f32 %v6591_v46, %v804_v57  ;;  %v6597_v11 = vadd.f32 %v6591_v46, %v4743_v53  ;;  %v9903_v43 = vld [vmem:[#allocation109_spill] sm:$0xff]  ;;  %4887 = vrcp.f32 %v928_v17  ;;  %v9905_v57 = vld [vmem:[#allocation39_spill] sm:$0xff] }
 0x160   : > { %v2017_v62 = vmul.f32 %v5885_v15, %v9902_v58  ;;  %v2218_v60 = vmul.f32 %v5743_v33, %v9903_v43  ;;  %v2552_v35 = vadd.f32 %v2520_v1, %v6421_v3  ;;  %v6605_v18 = vadd.f32 %v6591_v46, %v4773_v26  ;;  %v9908_v1 = vld [vmem:[#allocation13_spill] sm:$0xff] }
 0x161   : > { %9900 = vst [vmem:[#allocation32_spill] sm:$0xff] %v6594_v31  ;;  %9901 = vst [vmem:[#allocation79_spill] sm:$0xff] %v6597_v11  ;;  %v2521_v23 = vmul.f32 %v5931_v47, %v9902_v58  ;;  %v927_v42 = vadd.f32 1.0, %v9905_v57  ;;  %v6611_v53 = vadd.f32 %v6591_v46, %v714_v49  ;;  %v2621_v12 = vmul.f32 %v5946_v36, %v6360_v4 }
 0x162   : > { %9904 = vst [vmem:[#allocation87_spill] sm:$0xff] %v6605_v18  ;;  %v2049_v52 = vadd.f32 %v2017_v62, %v1946_v48  ;;  %v2250_v55 = vadd.f32 %v2218_v60, %v2149_v6  ;;  %v6616_v9 = vadd.f32 %v6591_v46, %v814_v59  ;;  %4889 = vrcp.f32 %v948_v8 }
 0x163   : > { %9906 = vst [vmem:[#allocation89_spill] sm:$0xff] %v6611_v53  ;;  %v2553_v3 = vadd.f32 %v2521_v23, %v2451_v19  ;;  %v6619_v26 = vmul.f32 -1.442695, %v6594_v31  ;;  %v6622_v17 = vmul.f32 -1.442695, %v6597_v11  ;;  %v2118_v49 = vmul.f32 %v5901_v37, %v9908_v1 }
 0x164   : > { %9907 = vst [vmem:[#allocation35_spill] sm:$0xff] %v6616_v9  ;;  %v2319_v6 = vmul.f32 %v5748_v34, %v6383_v51  ;;  %v2653_v48 = vadd.f32 %v2621_v12, %v2552_v35  ;;  %v6629_v4 = vmul.f32 -1.442695, %v6605_v18  ;;  %v2622_v19 = vmul.f32 %v5946_v36, %v9908_v1  ;;  %v6646_v35 = vld [vmem:[#allocation2 + $0xa6] sm:$0xff] }
 0x165   : > { %v2036_v8 = vmul.f32 %v5885_v15, %v6449_v50  ;;  %4891 = vrcp.f32 %v927_v42  ;;  %v6636_v59 = vmul.f32 -1.442695, %v6611_v53  ;;  %v6638_v58 = vadd.f32 %v2118_v49, %v2049_v52  ;;  %v6657_v1 = vld [vmem:[#allocation2 + $0xa7] sm:$0xff] }
 0x166   : > { %9909 = vst [vmem:[#allocation108_spill] sm:$0xff] %v6629_v4  ;;  %v6640_v62 = vadd.f32 %v2319_v6, %v2250_v55  ;;  %v2722_v12 = vmul.f32 %v5758_v39, %v9903_v43  ;;  %v2823_v60 = vmul.f32 %v5763_v40, %v6383_v51  ;;  %v6648_v23 = vadd.f32 %v2622_v19, %v2553_v3  ;;  %v6655_v55 = vld [vmem:[#allocation2 + $0xae] sm:$0xff] }
 0x167   : > { %9910 = vst [vmem:[#allocation109_spill] sm:$0xff] %v6636_v59  ;;  %v2037_v57 = vmul.f32 %v5885_v15, %v6459_v24  ;;  %v2068_v42 = vadd.f32 %v2036_v8, %v6451_v2  ;;  %v2540_v52 = vmul.f32 %v5931_v47, %v6449_v50  ;;  %v6659_v43 = vld [vmem:[#allocation2 + $0xaf] sm:$0xff]  ;;  %v2137_v51 = vmul.f32 %v5901_v37, %v6461_v56 }
 0x168   : > { %v2754_v49 = vadd.f32 %v2722_v12, %v2653_v48  ;;  %v2138_v3 = vmul.f32 %v5901_v37, %v6463_v16  ;;  %v2238_v6 = vmul.f32 %v5743_v33, %v6492_v21  ;;  %v6667_v2 = vld [vmem:[#allocation2 + $0xb0] sm:$0xff]  ;;  %v2541_v50 = vmul.f32 %v5931_v47, %v6459_v24  ;;  %v6674_v12 = vld [vmem:[#allocation2 + $0xa8] sm:$0xff] }
 0x169   : > { %v2069_v19 = vadd.f32 %v2037_v57, %v1966_v10  ;;  %v2572_v8 = vadd.f32 %v2540_v52, %v6502_v63  ;;  %v2641_v48 = vmul.f32 %v5946_v36, %v6461_v56  ;;  %v1513_v53 = vmul.f32 %v5712_v25, %v6646_v35  ;;  %v6684_v24 = vld [vmem:[#allocation2 + $0xa9] sm:$0xff] }
 0x16a   : > { %v1514_v18 = vmul.f32 %v5712_v25, %v6655_v55  ;;  %v1614_v11 = vmul.f32 %v5732_v30, %v6657_v1  ;;  %v1615_v10 = vmul.f32 %v5732_v30, %v6659_v43  ;;  %v2169_v63 = vadd.f32 %v2137_v51, %v2068_v42  ;;  %v6696_v42 = vld [vmem:[#allocation2 + $0xaa] sm:$0xff] }
 0x16b   : > { %v2573_v57 = vadd.f32 %v2541_v50, %v2471_v54  ;;  %v1716_v56 = vmul.f32 %v5718_v27, %v6667_v2  ;;  %v1847_v52 = vadd.f32 %v6505_v41, %v6402_v13  ;;  %v1715_v25 = vmul.f32 %v5718_v27, %v6674_v12 }
 0x16c   : > { %v1646_v31 = vadd.f32 %v1614_v11, %v1513_v53  ;;  %v1647_v46 = vadd.f32 %v1615_v10, %v1514_v18  ;;  %v2018_v59 = vmul.f32 %v5885_v15, %v6646_v35  ;;  %v2673_v4 = vadd.f32 %v2641_v48, %v2572_v8  ;;  %v6701_v13 = vpop.eup %4887 }
 0x16d   : > { %v1816_v30 = vmul.f32 %v5723_v44, %v6684_v24  ;;  %v1948_v54 = vadd.f32 %v6508_v20, %v1847_v52  ;;  %v2019_v51 = vmul.f32 %v5885_v15, %v6655_v55  ;;  %v2119_v18 = vmul.f32 %v5901_v37, %v6657_v1 }
 0x16e   : > { %v1747_v41 = vadd.f32 %v1715_v25, %v1646_v31  ;;  %v6703_v11 = vadd.f32 %v1716_v56, %v1647_v46  ;;  %v2050_v27 = vadd.f32 %v2018_v59, %v6424_v7  ;;  %v2270_v53 = vadd.f32 %v2238_v6, %v2169_v63 }
 0x16f   : > { %v2742_v50 = vmul.f32 %v5758_v39, %v6492_v21  ;;  %v2051_v8 = vadd.f32 %v2019_v51, %v1948_v54  ;;  %v2120_v20 = vmul.f32 %v5901_v37, %v6659_v43  ;;  %v6712_v48 = vpop.eup %4889  ;;  %v1917_v46 = vmul.f32 %v5738_v32, %v6696_v42 }
 0x170   : > { %v1848_v10 = vadd.f32 %v1816_v30, %v1747_v41  ;;  %v2151_v31 = vadd.f32 %v2119_v18, %v2050_v27  ;;  %v2220_v7 = vmul.f32 %v5743_v33, %v6674_v12  ;;  %v2339_v59 = vmul.f32 %v5748_v34, %v6514_v29 }
 0x171   : > { %v2774_v6 = vadd.f32 %v2742_v50, %v2673_v4  ;;  %v2221_v21 = vmul.f32 %v5743_v33, %v6667_v2  ;;  %v2152_v63 = vadd.f32 %v2120_v20, %v2051_v8  ;;  %v2642_v52 = vmul.f32 %v5946_v36, %v6463_v16 }
 0x172   : > { %v6722_v56 = vpop.eup %4891  ;;  %v6726_v25 = vadd.f32 %v1917_v46, %v1848_v10  ;;  %v2252_v30 = vadd.f32 %v2220_v7, %v2151_v31  ;;  %v2321_v54 = vmul.f32 %v5748_v34, %v6684_v24  ;;  %v2855_v51 = vadd.f32 %v2823_v60, %v2754_v49 }
 0x173   : > { %v2170_v41 = vadd.f32 %v2138_v3, %v2069_v19  ;;  %v2843_v4 = vmul.f32 %v5763_v40, %v6514_v29  ;;  %v6732_v27 = vadd.f32 %v2221_v21, %v2152_v63  ;;  %v2371_v33 = vadd.f32 %v2339_v59, %v2270_v53  ;;  %v1780_v3 = vld [vmem:[#allocation2 + $0xb1] sm:$0xff]  ;;  %v6802_v63 = vld [vmem:[#allocation2 + $0x1e8] sm:$0xff] }
 0x174   : > { %9911 = vst [vmem:[#allocation39_spill] sm:$0xff] %v6726_v25  ;;  %v2674_v18 = vadd.f32 %v2642_v52, %v2573_v57  ;;  %v2353_v50 = vadd.f32 %v2321_v54, %v2252_v30  ;;  %v2422_v8 = vmul.f32 %v5753_v38, %v6696_v42  ;;  %v2420_v16 = vmul.f32 %v5753_v38, %v6391_v5  ;;  %v1881_v19 = vld [vmem:[#allocation2 + $0xb2] sm:$0xff]  ;;  %v6824_v30 = vld [vmem:[#allocation2 + $0x1e9] sm:$0xff] }
 0x175   : > { %v2875_v20 = vadd.f32 %v2843_v4, %v2774_v6  ;;  %4893 = vpow2.f32 %v6619_v26  ;;  %v6740_v60 = vmul.f32 -1.442695, %v6616_v9  ;;  %v2924_v29 = vmul.f32 %v5772_v45, %v6391_v5  ;;  %v6785_v59 = vld [vmem:[#allocation2 + $0x1f0] sm:$0xff]  ;;  %v9917_v54 = vld [vmem:[#allocation16_spill] sm:$0xff] }
 0x176   : > { %v2440_v49 = vmul.f32 %v5753_v38, %v6532_v22  ;;  %v6746_v57 = vadd.f32 %v2422_v8, %v2353_v50  ;;  %4895 = vpow2.f32 %v6622_v17  ;;  %v2251_v53 = vadd.f32 %v6512_v14, %v6638_v58  ;;  %v6768_v14 = vld [vmem:[#allocation2 + $0x1e6] sm:$0xff]  ;;  %v6770_v58 = vld [vmem:[#allocation2 + $0x1ee] sm:$0xff] }
 0x177   : > { %9912 = vst [vmem:[#allocation13_spill] sm:$0xff] %v6740_v60  ;;  %v6752_v26 = vadd.f32 %v2420_v16, %v6640_v62  ;;  %v2755_v10 = vadd.f32 %v6527_v61, %v6648_v23  ;;  %v2944_v5 = vmul.f32 %v5772_v45, %v6532_v22  ;;  %v6758_v46 = vadd.f32 %v2924_v29, %v2855_v51  ;;  %v6772_v62 = vld [vmem:[#allocation2 + $0x1e7] sm:$0xff]  ;;  %v9921_v29 = vld [vmem:[#allocation133_spill] sm:$0xff] }
 0x178   : > { %9913 = vst [vmem:[#allocation136_spill] sm:$0xff] %v6746_v57  ;;  %v6761_v31 = vadd.f32 %v6558_v0, %v2170_v41  ;;  %v6763_v7 = vadd.f32 %v2440_v49, %v2371_v33  ;;  %v6766_v17 = vadd.f32 %v6568_v28, %v2674_v18  ;;  %v6777_v22 = vmul.f32 %v5723_v44, %v1780_v3  ;;  %v6787_v28 = vld [vmem:[#allocation2 + $0x1ef] sm:$0xff]  ;;  %v6832_v41 = vld [vmem:[%s9606_s5 + $0x2] ss:$0 sm:$0xff] }
 0x179   : > { %v6774_v61 = vadd.f32 %v2944_v5, %v2875_v20  ;;  %v6780_v23 = vmul.f32 %v5738_v32, %v1881_v19  ;;  %v6783_v0 = vmul.f32 %v5748_v34, %v1780_v3  ;;  %v6790_v6 = vmul.f32 %v5753_v38, %v1881_v19  ;;  %v9914_v34 = vld [vmem:[#allocation15_spill] sm:$0xff]  ;;  %9918 = vst [vmem:[#allocation16_spill] sm:$0xff] %v6832_v41  ;;  %v9919_v33 = vld [vmem:[#allocation128_spill] sm:$0xff] }
 0x17a   : > { %v6794_v21 = vmul.f32 %v5758_v39, %v6667_v2  ;;  %v6797_v44 = vmul.f32 %v5763_v40, %v1780_v3  ;;  %v6800_v32 = vmul.f32 %v5772_v45, %v1881_v19  ;;  %v6806_v52 = vmul.f32 %v9914_v34, %v6667_v2  ;;  %v6811_v38 = vld [vmem:[%s9606_s5] ss:$0 sm:$0xff]  ;;  %v6820_v45 = vld [vmem:[%s9606_s5 + $0x1] ss:$0 sm:$0xff]  ;;  %v9922_v34 = vld [vmem:[#allocation130_spill] sm:$0xff] }
 0x17b   : > { %9915 = vst [vmem:[#allocation15_spill] sm:$0xff] %v6811_v38  ;;  %v1533_v39 = vmul.f32 %v6811_v38, %v6768_v14  ;;  %v1534_v40 = vmul.f32 %v6811_v38, %v6770_v58  ;;  %9916 = vst [vmem:[#allocation137_spill] sm:$0xff] %v6820_v45  ;;  %v1634_v2 = vmul.f32 %v6820_v45, %v6772_v62  ;;  %v9920_v20 = vld [vmem:[#allocation131_spill] sm:$0xff]  ;;  %v9925_v57 = vld [vmem:[#allocation88_spill] sm:$0xff] }
 0x17c   : > { %v6827_v51 = vmul.f32 %v9917_v54, %v1780_v3  ;;  %v1736_v4 = vmul.f32 %v6832_v41, %v6785_v59  ;;  %v2352_v18 = vadd.f32 %v9919_v33, %v2251_v53  ;;  %v1635_v50 = vmul.f32 %v6820_v45, %v6787_v28  ;;  %v6843_v3 = vld [vmem:[#allocation2 + $0x1ea] sm:$0xff]  ;;  %v6851_v53 = vld [vmem:[%s9606_s5 + $0x3] ss:$0 sm:$0xff] }
 0x17d   : > { %v1666_v8 = vadd.f32 %v1634_v2, %v1533_v39  ;;  %v1735_v16 = vmul.f32 %v6832_v41, %v6802_v63  ;;  %v1867_v49 = vadd.f32 %v9921_v29, %v9920_v20  ;;  %v2038_v5 = vmul.f32 %v5885_v15, %v6768_v14  ;;  %9923 = vst [vmem:[#allocation128_spill] sm:$0xff] %v6851_v53  ;;  %v6857_v33 = vld [vmem:[#allocation2 + $0x1f1] sm:$0xff]  ;;  %v9924_v29 = vld [vmem:[#allocation76_spill] sm:$0xff]  ;;  %v6871_v41 = vld [vmem:[%s9606_s5 + $0x4] ss:$0 sm:$0xff] }
 0x17e   : > { %v2856_v54 = vadd.f32 %v9922_v34, %v2755_v10  ;;  %v1667_v9 = vadd.f32 %v1635_v50, %v1534_v40  ;;  %v1836_v39 = vmul.f32 %v6851_v53, %v6824_v30  ;;  %v2039_v2 = vmul.f32 %v5885_v15, %v6770_v58  ;;  %v9926_v40 = vld [vmem:[#allocation17_spill] sm:$0xff]  ;;  %9928 = vst [vmem:[#allocation133_spill] sm:$0xff] %v6871_v41  ;;  %v6903_v38 = vld [vmem:[%s9606_s5 + $0xb] ss:$0 sm:$0xff] }
 0x17f   : > { %v1767_v20 = vadd.f32 %v1735_v16, %v1666_v8  ;;  %v1968_v60 = vadd.f32 %v9924_v29, %v1867_v49  ;;  %v2070_v25 = vadd.f32 %v2038_v5, %v9925_v57  ;;  %v2139_v10 = vmul.f32 %v5901_v37, %v6772_v62  ;;  %v6877_v57 = vld [vmem:[#allocation2 + $0x1f2] sm:$0xff]  ;;  %9933 = vst [vmem:[#allocation88_spill] sm:$0xff] %v6903_v38 }
 0x180   : > { %v6864_v50 = vmul.f32 %v9926_v40, %v1881_v19  ;;  %v6866_v34 = vadd.f32 %v1736_v4, %v1667_v9  ;;  %v1937_v15 = vmul.f32 %v6871_v41, %v6843_v3  ;;  %v2140_v8 = vmul.f32 %v5901_v37, %v6787_v28  ;;  %v6882_v9 = vld [vmem:[%s9606_s5 + $0xa] ss:$0 sm:$0xff] }
 0x181   : > { %v1868_v16 = vadd.f32 %v1836_v39, %v1767_v20  ;;  %v2071_v49 = vadd.f32 %v2039_v2, %v1968_v60  ;;  %v2171_v5 = vadd.f32 %v2139_v10, %v2070_v25  ;;  %9929 = vst [vmem:[#allocation130_spill] sm:$0xff] %v6882_v9  ;;  %v2240_v19 = vmul.f32 %v6882_v9, %v6802_v63  ;;  %v9930_v39 = vld [vmem:[#allocation129_spill] sm:$0xff]  ;;  %v9931_v25 = vld [vmem:[#allocation132_spill] sm:$0xff] }
 0x182   : > { %9927 = vst [vmem:[#allocation131_spill] sm:$0xff] %v6864_v50  ;;  %v6886_v4 = vpop.eup %4893  ;;  %v6890_v29 = vmul.f32 %v6851_v53, %v6857_v33  ;;  %v2241_v37 = vmul.f32 %v6882_v9, %v6785_v59  ;;  %v2453_v60 = vadd.f32 %v9930_v39, %v2352_v18  ;;  %v2957_v2 = vadd.f32 %v9931_v25, %v2856_v54  ;;  %v9936_v50 = vld [vmem:[#allocation78_spill] sm:$0xff] }
 0x183   : > { %v6896_v20 = vpop.eup %4895  ;;  %v6898_v10 = vadd.f32 %v1937_v15, %v1868_v16  ;;  %v2172_v40 = vadd.f32 %v2140_v8, %v2071_v49  ;;  %v2272_v45 = vadd.f32 %v2240_v19, %v2171_v5  ;;  %v2341_v53 = vmul.f32 %v6903_v38, %v6824_v30  ;;  %v9934_v15 = vld [vmem:[#allocation51_spill] sm:$0xff]  ;;  %v6922_v19 = vld [vmem:[%s9606_s5 + $0xc] ss:$0 sm:$0xff] }
 0x184   : > { %v6909_v9 = vmul.f32 %v6871_v41, %v6877_v57  ;;  %v2522_v18 = vmul.f32 %v5931_v47, %v6646_v35  ;;  %v2523_v54 = vmul.f32 %v5931_v47, %v6655_v55  ;;  %v3027_v8 = vmul.f32 %v9934_v15, %v6646_v35  ;;  %9935 = vst [vmem:[#allocation17_spill] sm:$0xff] %v6922_v19 }
 0x185   : > { %9932 = vst [vmem:[#allocation76_spill] sm:$0xff] %v6898_v10  ;;  %v3028_v16 = vmul.f32 %v9934_v15, %v6655_v55  ;;  %v2273_v49 = vadd.f32 %v2241_v37, %v2172_v40  ;;  %v2373_v5 = vadd.f32 %v2341_v53, %v2272_v45  ;;  %v2442_v39 = vmul.f32 %v6922_v19, %v6843_v3 }
 0x186   : > { %v2342_v25 = vmul.f32 %v6903_v38, %v6857_v33  ;;  %v2443_v10 = vmul.f32 %v6922_v19, %v6877_v57  ;;  %v2554_v35 = vadd.f32 %v2522_v18, %v6752_v26  ;;  %v2555_v41 = vadd.f32 %v2523_v54, %v2453_v60  ;;  %v9937_v26 = vld [vmem:[#allocation134_spill] sm:$0xff]  ;;  %v6947_v18 = vld [vmem:[%s9606_s5 + $0x12] ss:$0 sm:$0xff] }
 0x187   : > { %v2623_v55 = vmul.f32 %v5946_v36, %v6657_v1  ;;  %v3059_v45 = vadd.f32 %v3027_v8, %v6758_v46  ;;  %v3060_v53 = vadd.f32 %v3028_v16, %v2957_v2  ;;  %v6934_v37 = vadd.f32 %v2442_v39, %v2373_v5  ;;  %v9938_v2 = vld [vmem:[#allocation55_spill] sm:$0xff] }
 0x188   : > { %v2624_v40 = vmul.f32 %v5946_v36, %v6659_v43  ;;  %v2372_v38 = vadd.f32 %v9936_v50, %v6761_v31  ;;  %v2542_v19 = vmul.f32 %v5931_v47, %v6768_v14  ;;  %v2876_v60 = vadd.f32 %v9937_v26, %v6766_v17  ;;  %v6965_v26 = vld [vmem:[%s9606_s5 + $0x1a] ss:$0 sm:$0xff] }
 0x189   : > { %v6951_v46 = vmul.f32 %v6947_v18, %v6785_v59  ;;  %v3128_v54 = vmul.f32 %v9938_v2, %v6657_v1  ;;  %v3129_v31 = vmul.f32 %v9938_v2, %v6659_v43  ;;  %v3047_v47 = vmul.f32 %v9934_v15, %v6768_v14  ;;  %v9939_v14 = vld [vmem:[#allocation86_spill] sm:$0xff] }
 0x18a   : > { %v2655_v50 = vadd.f32 %v2623_v55, %v2554_v35  ;;  %v2656_v17 = vadd.f32 %v2624_v40, %v2555_v41  ;;  %v2724_v8 = vmul.f32 %v6947_v18, %v6674_v12  ;;  %v2574_v16 = vadd.f32 %v2542_v19, %v6763_v7  ;;  %v9940_v55 = vld [vmem:[#allocation135_spill] sm:$0xff]  ;;  %v9942_v40 = vld [vmem:[#allocation4_spill] sm:$0xff] }
 0x18b   : > { %v3160_v5 = vadd.f32 %v3128_v54, %v3059_v45  ;;  %v3161_v39 = vadd.f32 %v3129_v31, %v3060_v53  ;;  %v3229_v1 = vmul.f32 %v6965_v26, %v6674_v12  ;;  %v3079_v43 = vadd.f32 %v3047_v47, %v6774_v61  ;;  %v9941_v19 = vld [vmem:[#allocation3_spill] sm:$0xff]  ;;  %v9943_v54 = vld [vmem:[#allocation5_spill] sm:$0xff] }
 0x18c   : > { %v2473_v41 = vadd.f32 %v9939_v14, %v2372_v38  ;;  %v2643_v35 = vmul.f32 %v5946_v36, %v6772_v62  ;;  %v2977_v7 = vadd.f32 %v9940_v55, %v2876_v60  ;;  %v1024_v45 = vmul.f32 %v6701_v13, %v9941_v19  ;;  %v6987_v36 = vld [vmem:[%s9606_s5 + $0x10] ss:$0 sm:$0xff] }
 0x18d   : > { %v3148_v53 = vmul.f32 %v9938_v2, %v6772_v62  ;;  %v1044_v12 = vmul.f32 %v6712_v48, %v9942_v40  ;;  %v1023_v61 = vmul.f32 %v6722_v56, %v9943_v54  ;;  %v1849_v38 = vadd.f32 %v6777_v22, %v6703_v11  ;;  %9944 = vst [vmem:[#allocation129_spill] sm:$0xff] %v6987_v36 }
 0x18e   : > { %v2543_v13 = vmul.f32 %v6987_v36, %v6770_v58  ;;  %v2675_v60 = vadd.f32 %v2643_v35, %v2574_v16  ;;  %v3048_v62 = vmul.f32 %v9934_v15, %v6770_v58  ;;  %1138 = vst.msk [vmem:[#allocation2 + $0xd0] sm:$0xff] %vm497_vm1, %v1024_v45  ;;  %4270 = vst.msk [vmem:[%s5633_s8 + $0x48] sm:$0xff] %vm497_vm1, %v1024_v45 }
 0x18f   : > { %v2354_v48 = vadd.f32 %v6783_v0, %v6732_v27  ;;  %v3180_v11 = vadd.f32 %v3148_v53, %v3079_v43  ;;  %1158 = vst.msk [vmem:[#allocation2 + $0x210] sm:$0xff] %vm497_vm1, %v1044_v12  ;;  %4290 = vst.msk [vmem:[%s5633_s8 + $0xe8] sm:$0xff] %vm497_vm1, %v1044_v12  ;;  %v7003_v56 = vadd.f32 %v6780_v23, %v1849_v38 }
 0x190   : > { %1137 = vst.msk [vmem:[#allocation2 + $0xc8] sm:$0xff] %vm497_vm1, %v1023_v61  ;;  %4269 = vst.msk [vmem:[%s5633_s8 + $0x40] sm:$0xff] %vm497_vm1, %v1023_v61  ;;  %v1869_v58 = vadd.f32 %v6890_v29, %v6866_v34  ;;  %v2374_v22 = vadd.f32 %v2342_v25, %v2273_v49  ;;  %v2575_v15 = vadd.f32 %v2543_v13, %v2473_v41  ;;  %v7024_v34 = vld [vmem:[%s9606_s5 + $0x11] ss:$0 sm:$0xff] }
 0x191   : > { %v2744_v27 = vmul.f32 %v6947_v18, %v6802_v63  ;;  %v3080_v0 = vadd.f32 %v3048_v62, %v2977_v7  ;;  %v7012_v31 = vadd.f32 %v6790_v6, %v2354_v48  ;;  %v2756_v47 = vadd.f32 %v2724_v8, %v2655_v50  ;;  %9945 = vst [vmem:[#allocation132_spill] sm:$0xff] %v7024_v34  ;;  %v7042_v8 = vld [vmem:[%s9606_s5 + $0x1b] ss:$0 sm:$0xff] }
 0x192   : > { %v3249_v16 = vmul.f32 %v6965_v26, %v6802_v63  ;;  %v7017_v23 = vadd.f32 %v6909_v9, %v1869_v58  ;;  %v7019_v43 = vadd.f32 %v2443_v10, %v2374_v22  ;;  %v3261_v14 = vadd.f32 %v3229_v1, %v3160_v5  ;;  %v7034_v9 = vld [vmem:[%s9606_s5 + $0x13] ss:$0 sm:$0xff]  ;;  %v9948_v22 = vld [vmem:[#allocation108_spill] sm:$0xff] }
 0x193   : > { %v2644_v29 = vmul.f32 %v7024_v34, %v6787_v28  ;;  %v2776_v6 = vadd.f32 %v2744_v27, %v2675_v60  ;;  %v3149_v49 = vmul.f32 %v9938_v2, %v6787_v28  ;;  %v2757_v63 = vadd.f32 %v6794_v21, %v2656_v17 }
 0x194   : > { %v2825_v10 = vmul.f32 %v7034_v9, %v6684_v24  ;;  %v3262_v25 = vadd.f32 %v6806_v52, %v3161_v39  ;;  %v3281_v50 = vadd.f32 %v3249_v16, %v3180_v11  ;;  %v3330_v28 = vmul.f32 %v7042_v8, %v6684_v24  ;;  %v7053_v52 = vld [vmem:[%s9606_s5 + $0x14] ss:$0 sm:$0xff] }
 0x195   : > { %v2676_v21 = vadd.f32 %v2644_v29, %v2575_v15  ;;  %v2845_v2 = vmul.f32 %v7034_v9, %v6824_v30  ;;  %v3181_v17 = vadd.f32 %v3149_v49, %v3080_v0  ;;  %v2846_v5 = vmul.f32 %v7034_v9, %v6857_v33  ;;  %v9949_v15 = vld [vmem:[#allocation15_spill] sm:$0xff]  ;;  %v9950_v29 = vld [vmem:[#allocation109_spill] sm:$0xff] }
 0x196   : > { %v7057_v39 = vmul.f32 %v7053_v52, %v6877_v57  ;;  %v3250_v24 = vmul.f32 %v6965_v26, %v6785_v59  ;;  %v3350_v1 = vmul.f32 %v7042_v8, %v6824_v30  ;;  %v2857_v41 = vadd.f32 %v2825_v10, %v2756_v47  ;;  %v7071_v59 = vld [vmem:[%s9606_s5 + $0x1c] ss:$0 sm:$0xff]  ;;  %v9952_v10 = vld [vmem:[#allocation16_spill] sm:$0xff] }
 0x197   : > { %v3362_v35 = vadd.f32 %v3330_v28, %v3261_v14  ;;  %v2877_v55 = vadd.f32 %v2845_v2, %v2776_v6  ;;  %v947_v7 = vadd.f32 1.0, %v6886_v4  ;;  %v2926_v19 = vmul.f32 %v7053_v52, %v6696_v42  ;;  %9946 = vst [vmem:[#allocation51_spill] sm:$0xff] %v7071_v59  ;;  %v7086_v38 = vld [vmem:[#allocation2 + $0xc6] sm:$0xff]  ;;  %v7095_v62 = vld [vmem:[#allocation2 + $0xce] sm:$0xff] }
 0x198   : > { %v3382_v45 = vadd.f32 %v3350_v1, %v3281_v50  ;;  %v2858_v53 = vadd.f32 %v6797_v44, %v2757_v63  ;;  %v3363_v40 = vadd.f32 %v6827_v51, %v3262_v25  ;;  %v3431_v30 = vmul.f32 %v7071_v59, %v6696_v42  ;;  %v7099_v48 = vld [vmem:[#allocation2 + $0xcf] sm:$0xff]  ;;  %v9953_v50 = vld [vmem:[#allocation130_spill] sm:$0xff]  ;;  %v7136_v2 = vld [vmem:[%s9606_s5 + $0x8] ss:$0 sm:$0xff] }
 0x199   : > { %v2777_v12 = vadd.f32 %v6951_v46, %v2676_v21  ;;  %v2946_v4 = vmul.f32 %v7053_v52, %v6843_v3  ;;  %v3282_v54 = vadd.f32 %v3250_v24, %v3181_v17  ;;  %v3351_v61 = vmul.f32 %v7042_v8, %v6857_v33  ;;  %v7097_v33 = vld [vmem:[#allocation2 + $0xc7] sm:$0xff]  ;;  %v9951_v6 = vld [vmem:[#allocation137_spill] sm:$0xff]  ;;  %9955 = vst [vmem:[#allocation134_spill] sm:$0xff] %v7136_v2 }
 0x19a   : > { %v7082_v44 = vmul.f32 %v7071_v59, %v6877_v57  ;;  %v3451_v51 = vmul.f32 %v7071_v59, %v6843_v3  ;;  %v930_v42 = vadd.f32 1.0, %v6896_v20  ;;  %v7089_v13 = vadd.f32 %v2926_v19, %v2857_v41  ;;  %v7103_v3 = vld [vmem:[#allocation2 + $0xd0] sm:$0xff]  ;;  %v9947_v20 = vld [vmem:[#allocation131_spill] sm:$0xff]  ;;  %v7114_v0 = vld [vmem:[#allocation2 + $0xc8] sm:$0xff] }
 0x19b   : > { %v7091_v46 = vadd.f32 %v3431_v30, %v3362_v35  ;;  %v7093_v60 = vadd.f32 %v2946_v4, %v2877_v55  ;;  %4897 = vrcp.f32 %v947_v7  ;;  %v7106_v11 = vadd.f32 %v6800_v32, %v2858_v53  ;;  %v7116_v47 = vld [vmem:[#allocation2 + $0xc9] sm:$0xff]  ;;  %v9957_v7 = vld [vmem:[#allocation39_spill] sm:$0xff] }
 0x19c   : > { %v7101_v57 = vadd.f32 %v3451_v51, %v3382_v45  ;;  %v7109_v58 = vadd.f32 %v9947_v20, %v3363_v40  ;;  %4899 = vpow2.f32 %v9948_v22  ;;  %v1515_v27 = vmul.f32 %v9949_v15, %v7086_v38  ;;  %v7131_v21 = vld [vmem:[#allocation2 + $0xca] sm:$0xff]  ;;  %v7151_v53 = vld [vmem:[%s9606_s5 + $0x9] ss:$0 sm:$0xff]  ;;  %v4746_v51 = vpop.f32.mrf.mxu0 }
 0x19d   : > { %v2878_v16 = vadd.f32 %v2846_v5, %v2777_v12  ;;  %v7118_v14 = vadd.f32 %v3351_v61, %v3282_v54  ;;  %4901 = vpow2.f32 %v9950_v29  ;;  %v1516_v32 = vmul.f32 %v9949_v15, %v7095_v62  ;;  %9954 = vst [vmem:[#allocation78_spill] sm:$0xff] %v7131_v21  ;;  %v9956_v35 = vld [vmem:[#allocation128_spill] sm:$0xff]  ;;  %9958 = vst [vmem:[#allocation55_spill] sm:$0xff] %v7151_v53  ;;  %v9959_v54 = vld [vmem:[#allocation133_spill] sm:$0xff] }
 0x19e   : > { %v1616_v49 = vmul.f32 %v9951_v6, %v7097_v33  ;;  %v1617_v63 = vmul.f32 %v9951_v6, %v7099_v48  ;;  %4903 = vrcp.f32 %v930_v42  ;;  %v1718_v25 = vmul.f32 %v9952_v10, %v7103_v3 }
 0x19f   : > { %v2223_v28 = vmul.f32 %v9953_v50, %v7103_v3  ;;  %v2020_v17 = vmul.f32 %v7136_v2, %v7086_v38  ;;  %v2021_v5 = vmul.f32 %v7136_v2, %v7095_v62  ;;  %v1717_v41 = vmul.f32 %v9952_v10, %v7114_v0 }
 0x1a0   : > { %v1648_v24 = vadd.f32 %v1616_v49, %v1515_v27  ;;  %v1649_v1 = vadd.f32 %v1617_v63, %v1516_v32  ;;  %v1818_v55 = vmul.f32 %v9956_v35, %v7116_v47  ;;  %v2121_v40 = vmul.f32 %v7151_v53, %v7097_v33  ;;  %v9960_v32 = vld [vmem:[#allocation88_spill] sm:$0xff] }
 0x1a1   : > { %v2052_v19 = vadd.f32 %v2020_v17, %v9957_v7  ;;  %v2053_v45 = vadd.f32 %v2021_v5, %v7003_v56  ;;  %v2122_v30 = vmul.f32 %v7151_v53, %v7099_v48  ;;  %v1919_v61 = vmul.f32 %v9959_v54, %v7131_v21  ;;  %v9961_v63 = vld [vmem:[#allocation136_spill] sm:$0xff] }
 0x1a2   : > { %v1749_v12 = vadd.f32 %v1717_v41, %v1648_v24  ;;  %v7157_v4 = vadd.f32 %v1718_v25, %v1649_v1  ;;  %v2524_v56 = vmul.f32 %v6987_v36, %v7086_v38  ;;  %v2222_v22 = vmul.f32 %v9953_v50, %v7114_v0 }
 0x1a3   : > { %v2153_v42 = vadd.f32 %v2121_v40, %v2052_v19  ;;  %v2154_v20 = vadd.f32 %v2122_v30, %v2053_v45  ;;  %v2525_v27 = vmul.f32 %v6987_v36, %v7095_v62  ;;  %v2323_v49 = vmul.f32 %v9960_v32, %v7116_v47  ;;  %v9963_v45 = vld [vmem:[#allocation77_spill] sm:$0xff]  ;;  %v4778_v30 = vpop.f32.mrf.mxu1 }
 0x1a4   : > { %v1850_v29 = vadd.f32 %v1818_v55, %v1749_v12  ;;  %v2556_v25 = vadd.f32 %v2524_v56, %v9961_v63  ;;  %v2625_v17 = vmul.f32 %v7024_v34, %v7097_v33  ;;  %v2626_v41 = vmul.f32 %v7024_v34, %v7099_v48  ;;  %v724_v12 = vpop.f32.mrf.mxu0 }
 0x1a5   : > { %v2254_v5 = vadd.f32 %v2222_v22, %v2153_v42  ;;  %v7172_v24 = vadd.f32 %v2223_v28, %v2154_v20  ;;  %v2557_v1 = vadd.f32 %v2525_v27, %v7012_v31  ;;  %v2726_v55 = vmul.f32 %v6947_v18, %v7114_v0  ;;  %v7187_v28 = vld [vmem:[%s9605_s4] ss:$0 sm:$0xff]  ;;  %v7193_v27 = vld [vmem:[#allocation2 + $0xd1] sm:$0xff]  ;;  %v1260_v10 = vpop.f32.mrf.mxu1 }
 0x1a6   : > { %v7177_v7 = vadd.f32 %v1919_v61, %v1850_v29  ;;  %v2657_v19 = vadd.f32 %v2625_v17, %v2556_v25  ;;  %v7182_v40 = vadd.f32 %v9963_v45, %v4746_v51  ;;  %9965 = vst [vmem:[#allocation3_spill] sm:$0xff] %v7187_v28  ;;  %v2727_v31 = vmul.f32 %v6947_v18, %v7103_v3  ;;  %v9966_v61 = vld [vmem:[#allocation17_spill] sm:$0xff] }
 0x1a7   : > { %v2355_v56 = vadd.f32 %v2323_v49, %v2254_v5  ;;  %v2424_v42 = vmul.f32 %v9966_v61, %v7131_v21  ;;  %v2658_v20 = vadd.f32 %v2626_v41, %v2557_v1  ;;  %v7195_v51 = vld [vmem:[#allocation2 + $0xd2] sm:$0xff]  ;;  %v2827_v63 = vmul.f32 %v7034_v9, %v7116_v47 }
 0x1a8   : > { %9962 = vst [vmem:[#allocation86_spill] sm:$0xff] %v7177_v7  ;;  %9964 = vst [vmem:[#allocation135_spill] sm:$0xff] %v7182_v40  ;;  %v4898_v22 = vpop.eup %4897  ;;  %v2758_v29 = vadd.f32 %v2726_v55, %v2657_v19  ;;  %v7200_v25 = vadd.f32 %v7057_v39, %v2878_v16  ;;  %v9969_v17 = vld [vmem:[#allocation13_spill] sm:$0xff]  ;;  %v7206_v1 = vadd.f32 %v4778_v30, %v7187_v28  ;;  %v7218_v39 = vld [vmem:[%s9606_s5 + $0x20] ss:$0 sm:$0xff] }
 0x1a9   : > { %9967 = vst [vmem:[#allocation4_spill] sm:$0xff] %v7195_v51  ;;  %4905 = vpow2.f32 %v9969_v17  ;;  %v4900_v7 = vpop.eup %4899  ;;  %v7203_v49 = vadd.f32 %v2424_v42, %v2355_v56  ;;  %v2759_v5 = vadd.f32 %v2727_v31, %v2658_v20  ;;  %v7209_v41 = vadd.f32 %v9963_v45, %v724_v12 }
 0x1aa   : > { %9968 = vst [vmem:[#allocation5_spill] sm:$0xff] %v7200_v25  ;;  %9971 = vst [vmem:[#allocation108_spill] sm:$0xff] %v7206_v1  ;;  %v7211_v6 = vpop.eup %4901  ;;  %v2859_v19 = vadd.f32 %v2827_v63, %v2758_v29  ;;  %v2928_v55 = vmul.f32 %v7053_v52, %v7131_v21  ;;  %v3534_v16 = vmul.f32 %v7218_v39, %v7086_v38  ;;  %v7233_v42 = vmul.f32 -1.442695, %v7182_v40  ;;  %v7271_v25 = vld [vmem:[%s9606_s5 + $0x23] ss:$0 sm:$0xff] }
 0x1ab   : > { %9970 = vst [vmem:[#allocation131_spill] sm:$0xff] %v7203_v49  ;;  %9972 = vst [vmem:[#allocation109_spill] sm:$0xff] %v7209_v41  ;;  %v7224_v30 = vadd.f32 %v7082_v44, %v7118_v14  ;;  %v4904_v45 = vpop.eup %4903  ;;  %v1819_v12 = vmul.f32 %v9956_v35, %v7193_v27  ;;  %v1920_v31 = vmul.f32 %v9959_v54, %v7195_v51  ;;  %v7243_v14 = vld [vmem:[%s9606_s5 + $0x21] ss:$0 sm:$0xff] }
 0x1ac   : > { %v3535_v56 = vmul.f32 %v7218_v39, %v7095_v62  ;;  %v2324_v20 = vmul.f32 %v9960_v32, %v7193_v27  ;;  %v7237_v29 = vadd.f32 %v2928_v55, %v2859_v19  ;;  %v3566_v44 = vadd.f32 %v3534_v16, %v7091_v46  ;;  %v7257_v55 = vld [vmem:[%s9606_s5 + $0x22] ss:$0 sm:$0xff] }
 0x1ad   : > { %v3635_v63 = vmul.f32 %v7243_v14, %v7097_v33  ;;  %v2425_v17 = vmul.f32 %v9966_v61, %v7195_v51  ;;  %v2828_v40 = vmul.f32 %v7034_v9, %v7193_v27  ;;  %v3636_v46 = vmul.f32 %v7243_v14, %v7099_v48  ;;  %v9975_v54 = vld [vmem:[#allocation79_spill] sm:$0xff] }
 0x1ae   : > { %9973 = vst [vmem:[#allocation130_spill] sm:$0xff] %v7237_v29  ;;  %v3567_v49 = vadd.f32 %v3535_v56, %v7109_v58  ;;  %v3736_v16 = vmul.f32 %v7257_v55, %v7114_v0  ;;  %v9974_v29 = vld [vmem:[#allocation32_spill] sm:$0xff]  ;;  %v1026_v35 = vmul.f32 %v4904_v45, %v9975_v54  ;;  %v2929_v58 = vmul.f32 %v7053_v52, %v7195_v51  ;;  %v7284_v45 = vld [vmem:[#allocation2 + $0x210] sm:$0xff] }
 0x1af   : > { %v3667_v19 = vadd.f32 %v3635_v63, %v3566_v44  ;;  %v1043_v15 = vmul.f32 %v4898_v22, %v9974_v29  ;;  %v3737_v56 = vmul.f32 %v7257_v55, %v7103_v3  ;;  %v1851_v63 = vadd.f32 %v1819_v12, %v7157_v4  ;;  %9976 = vst [vmem:[#allocation39_spill] sm:$0xff] %v7284_v45 }
 0x1b0   : > { %v3668_v44 = vadd.f32 %v3636_v46, %v3567_v49  ;;  %v3837_v22 = vmul.f32 %v7271_v25, %v7116_v47  ;;  %1140 = vst.msk [vmem:[#allocation2 + $0xf0] sm:$0xff] %vm497_vm1, %v1026_v35  ;;  %4272 = vst.msk [vmem:[%s5633_s8 + $0x58] sm:$0xff] %vm497_vm1, %v1026_v35  ;;  %v2356_v54 = vadd.f32 %v2324_v20, %v7172_v24  ;;  %v7298_v35 = vld [vmem:[%s9606_s5 + $0x24] ss:$0 sm:$0xff]  ;;  %v950_v20 = vadd.f32 1.0, %v4900_v7 }
 0x1b1   : > { %v3768_v59 = vadd.f32 %v3736_v16, %v3667_v19  ;;  %1157 = vst.msk [vmem:[#allocation2 + $0x208] sm:$0xff] %vm497_vm1, %v1043_v15  ;;  %4289 = vst.msk [vmem:[%s5633_s8 + $0xe0] sm:$0xff] %vm497_vm1, %v1043_v15  ;;  %v2860_v4 = vadd.f32 %v2828_v40, %v2759_v5  ;;  %v3838_v49 = vmul.f32 %v7271_v25, %v7193_v27  ;;  %v7291_v19 = vld [vmem:[#allocation2 + $0x211] sm:$0xff] }
 0x1b2   : > { %v3769_v12 = vadd.f32 %v3737_v56, %v3668_v44  ;;  %v7286_v29 = vadd.f32 %v1920_v31, %v1851_v63  ;;  %v7289_v46 = vadd.f32 %v7187_v28, %v1260_v10  ;;  %9979 = vst [vmem:[#allocation77_spill] sm:$0xff] %v7291_v19  ;;  %v7293_v15 = vld [vmem:[#allocation2 + $0x212] sm:$0xff]  ;;  %v3938_v24 = vmul.f32 %v7298_v35, %v7131_v21 }
 0x1b3   : > { %9980 = vst [vmem:[#allocation17_spill] sm:$0xff] %v7293_v15  ;;  %v3869_v16 = vadd.f32 %v3837_v22, %v3768_v59  ;;  %v7302_v40 = vadd.f32 %v2425_v17, %v2356_v54  ;;  %v7304_v5 = vadd.f32 %v2929_v58, %v2860_v4  ;;  %v3939_v10 = vmul.f32 %v7298_v35, %v7195_v51  ;;  %v7311_v59 = vld [vmem:[%s9607_s6] ss:$0 sm:$0xff] }
 0x1b4   : > { %9977 = vst [vmem:[#allocation88_spill] sm:$0xff] %v7286_v29  ;;  %9978 = vst [vmem:[#allocation136_spill] sm:$0xff] %v7289_v46  ;;  %v3870_v31 = vadd.f32 %v3838_v49, %v3769_v12  ;;  %v7314_v56 = vmul.f32 -1.442695, %v7206_v1  ;;  %v7318_v44 = vmul.f32 %v6965_v26, %v7103_v3  ;;  %v7322_v17 = vmul.f32 %v7042_v8, %v7193_v27 }
 0x1b5   : > { %9981 = vst [vmem:[#allocation13_spill] sm:$0xff] %v7302_v40  ;;  %9982 = vst [vmem:[#allocation32_spill] sm:$0xff] %v7304_v5  ;;  %v2243_v58 = vmul.f32 %v9953_v50, %v7284_v45  ;;  %v3970_v63 = vadd.f32 %v3938_v24, %v3869_v16  ;;  %v7328_v54 = vmul.f32 %v9960_v32, %v7291_v19  ;;  %v929_v3 = vadd.f32 1.0, %v7211_v6 }
 0x1b6   : > { %9983 = vst [vmem:[#allocation79_spill] sm:$0xff] %v7311_v59  ;;  %v4906_v22 = vpop.eup %4905  ;;  %v7332_v7 = vmul.f32 %v9966_v61, %v7293_v15  ;;  %v3971_v4 = vadd.f32 %v3939_v10, %v3870_v31  ;;  %v2747_v27 = vmul.f32 %v6947_v18, %v7284_v45  ;;  %v7339_v49 = vmul.f32 %v7034_v9, %v7291_v19 }
 0x1b7   : > { %v7343_v12 = vmul.f32 %v7053_v52, %v7293_v15  ;;  %v7346_v16 = vadd.f32 %v7311_v59, %v3970_v63  ;;  %v7350_v24 = vmul.f32 %v7257_v55, %v7284_v45  ;;  %v7354_v6 = vmul.f32 %v7271_v25, %v7291_v19 }
 0x1b8   : > { %9984 = vst [vmem:[#allocation138_spill] sm:$0xff] %v7332_v7  ;;  %v7357_v10 = vadd.f32 %v7311_v59, %v3971_v4  ;;  %v2002_v31 = vld [vmem:[#allocation2 + $0x206] sm:$0xff]  ;;  %v7359_v5 = vld [vmem:[#allocation2 + $0x20e] sm:$0xff]  ;;  %4907 = vrcp.f32 %v950_v20  ;;  %v949_v19 = vadd.f32 1.0, %v4906_v22  ;;  %v7371_v4 = vmul.f32 %v7298_v35, %v7293_v15  ;;  %v7385_v15 = vld [vmem:[%s9606_s5 + $0x18] ss:$0 sm:$0xff] }
 0x1b9   : > { %9985 = vst [vmem:[#allocation139_spill] sm:$0xff] %v7343_v12  ;;  %9986 = vst [vmem:[#allocation140_spill] sm:$0xff] %v7346_v16  ;;  %v7361_v1 = vld [vmem:[#allocation2 + $0x207] sm:$0xff]  ;;  %v4613_v63 = vmul.f32 -1.442695, %v7346_v16  ;;  %v2040_v40 = vmul.f32 %v7136_v2, %v2002_v31  ;;  %v2041_v29 = vmul.f32 %v7136_v2, %v7359_v5  ;;  %v7367_v28 = vld [vmem:[#allocation2 + $0x20f] sm:$0xff]  ;;  %4909 = vrcp.f32 %v929_v3 }
 0x1ba   : > { %9987 = vst [vmem:[#allocation141_spill] sm:$0xff] %v7357_v10  ;;  %v4614_v21 = vmul.f32 -1.442695, %v7357_v10  ;;  %v2141_v45 = vmul.f32 %v7151_v53, %v7361_v1  ;;  %v7376_v20 = vld [vmem:[#allocation2 + $0x208] sm:$0xff]  ;;  %v2142_v22 = vmul.f32 %v7151_v53, %v7367_v28  ;;  %v3029_v10 = vmul.f32 %v7385_v15, %v7086_v38 }
 0x1bb   : > { %4911 = vpow2.f32 %v4613_v63  ;;  %v9988_v16 = vld [vmem:[#allocation76_spill] sm:$0xff]  ;;  %v2073_v2 = vadd.f32 %v2041_v29, %v7017_v23  ;;  %v2544_v3 = vmul.f32 %v6987_v36, %v2002_v31  ;;  %v2646_v7 = vmul.f32 %v7024_v34, %v7367_v28 }
 0x1bc   : > { %v2072_v51 = vadd.f32 %v2040_v40, %v9988_v16  ;;  %4913 = vpow2.f32 %v4614_v21  ;;  %v7389_v12 = vld [vmem:[#allocation2 + $0x209] sm:$0xff]  ;;  %v2545_v40 = vmul.f32 %v6987_v36, %v7359_v5  ;;  %v2242_v16 = vmul.f32 %v9953_v50, %v7376_v20 }
 0x1bd   : > { %v2174_v29 = vadd.f32 %v2142_v22, %v2073_v2  ;;  %4915 = vrcp.f32 %v949_v19  ;;  %v7396_v63 = vld [vmem:[#allocation2 + $0x20a] sm:$0xff]  ;;  %v2576_v53 = vadd.f32 %v2544_v3, %v6934_v37  ;;  %v2645_v21 = vmul.f32 %v7024_v34, %v7361_v1  ;;  %v7413_v37 = vld [vmem:[%s9606_s5 + $0x19] ss:$0 sm:$0xff] }
 0x1be   : > { %v2173_v23 = vadd.f32 %v2141_v45, %v2072_v51  ;;  %v2577_v38 = vadd.f32 %v2545_v40, %v7019_v43  ;;  %v3030_v51 = vmul.f32 %v7385_v15, %v7095_v62  ;;  %v2343_v19 = vmul.f32 %v9960_v32, %v7389_v12 }
 0x1bf   : > { %v7406_v45 = vadd.f32 %v2243_v58, %v2174_v29  ;;  %v3130_v43 = vmul.f32 %v7413_v37, %v7097_v33  ;;  %v2677_v22 = vadd.f32 %v2645_v21, %v2576_v53  ;;  %v2746_v40 = vmul.f32 %v6947_v18, %v7376_v20 }
 0x1c0   : > { %v2274_v2 = vadd.f32 %v2242_v16, %v2173_v23  ;;  %v2678_v3 = vadd.f32 %v2646_v7, %v2577_v38  ;;  %v3061_v62 = vadd.f32 %v3029_v10, %v7089_v13  ;;  %v3131_v58 = vmul.f32 %v7413_v37, %v7099_v48 }
 0x1c1   : > { %v2444_v29 = vmul.f32 %v9966_v61, %v7396_v63  ;;  %v3231_v16 = vmul.f32 %v6965_v26, %v7114_v0  ;;  %v2778_v34 = vadd.f32 %v2746_v40, %v2677_v22  ;;  %v2847_v33 = vmul.f32 %v7034_v9, %v7389_v12 }
 0x1c2   : > { %v2375_v23 = vadd.f32 %v2343_v19, %v2274_v2  ;;  %v2779_v36 = vadd.f32 %v2747_v27, %v2678_v3  ;;  %v3062_v53 = vadd.f32 %v3030_v51, %v7106_v11  ;;  %v3332_v13 = vmul.f32 %v7042_v8, %v7116_v47 }
 0x1c3   : > { %v3554_v48 = vmul.f32 %v7218_v39, %v2002_v31  ;;  %v2879_v10 = vadd.f32 %v2847_v33, %v2778_v34  ;;  %v2948_v38 = vmul.f32 %v7053_v52, %v7396_v63  ;;  %v3555_v0 = vmul.f32 %v7218_v39, %v7359_v5 }
 0x1c4   : > { %v7431_v7 = vadd.f32 %v2444_v29, %v2375_v23  ;;  %v4523_v27 = vmul.f32 -1.442695, %v7209_v41  ;;  %v3049_v2 = vmul.f32 %v7385_v15, %v2002_v31  ;;  %v3655_v47 = vmul.f32 %v7243_v14, %v7361_v1 }
 0x1c5   : > { %v4908_v21 = vpop.eup %4907  ;;  %v3586_v11 = vadd.f32 %v3554_v48, %v7101_v57  ;;  %4917 = vpow2.f32 %v7233_v42  ;;  %v7444_v51 = vadd.f32 %v2948_v38, %v2879_v10  ;;  %v3587_v34 = vadd.f32 %v3555_v0, %v7224_v30 }
 0x1c6   : > { %v3656_v19 = vmul.f32 %v7243_v14, %v7367_v28  ;;  %v4549_v22 = vmul.f32 -1.442695, %v7289_v46  ;;  %v4910_v3 = vpop.eup %4909  ;;  %v3081_v40 = vadd.f32 %v3049_v2, %v7093_v60  ;;  %v3756_v57 = vmul.f32 %v7257_v55, %v7376_v20 }
 0x1c7   : > { %v3687_v31 = vadd.f32 %v3655_v47, %v3586_v11  ;;  %4919 = vpow2.f32 %v7314_v56  ;;  %v3162_v42 = vadd.f32 %v3130_v43, %v3061_v62  ;;  %v3163_v29 = vadd.f32 %v3131_v58, %v3062_v53  ;;  %v9989_v47 = vld [vmem:[#allocation5_spill] sm:$0xff] }
 0x1c8   : > { %v4912_v23 = vpop.eup %4911  ;;  %v3688_v33 = vadd.f32 %v3656_v19, %v3587_v34  ;;  %4921 = vpow2.f32 %v4523_v27  ;;  %v3150_v10 = vmul.f32 %v7413_v37, %v7361_v1  ;;  %v3857_v60 = vmul.f32 %v7271_v25, %v7389_v12 }
 0x1c9   : > { %v4914_v30 = vpop.eup %4913  ;;  %v4137_v48 = vadd.f32 1.0, %v4912_v23  ;;  %v3788_v38 = vadd.f32 %v3756_v57, %v3687_v31  ;;  %v3050_v11 = vmul.f32 %v7385_v15, %v7359_v5  ;;  %4923 = vpow2.f32 %v4549_v22  ;;  %v9991_v31 = vld [vmem:[#allocation89_spill] sm:$0xff]  ;;  %v9992_v57 = vld [vmem:[#allocation35_spill] sm:$0xff] }
 0x1ca   : > { %v4916_v0 = vpop.eup %4915  ;;  %v4138_v2 = vadd.f32 1.0, %v4914_v30  ;;  %v3789_v56 = vadd.f32 %v7350_v24, %v3688_v33  ;;  %v3182_v43 = vadd.f32 %v3150_v10, %v3081_v40  ;;  %v3958_v58 = vmul.f32 %v7298_v35, %v7396_v63  ;;  %v9990_v40 = vld [vmem:[#allocation87_spill] sm:$0xff]  ;;  %v4781_v30 = vpop.f32.mrf.mxu1 }
 0x1cb   : > { %4925 = vrcp.f32 %v4137_v48  ;;  %v3889_v62 = vadd.f32 %v3857_v60, %v3788_v38  ;;  %v3263_v53 = vadd.f32 %v3231_v16, %v3162_v42  ;;  %v3264_v1 = vadd.f32 %v7318_v44, %v3163_v29  ;;  %v4749_v29 = vpop.f32.mrf.mxu0  ;;  %v5131_v10 = vld [vmem:[#allocation2 + $0x1a6] sm:$0xff] }
 0x1cc   : > { %4927 = vrcp.f32 %v4138_v2  ;;  %v3890_v27 = vadd.f32 %v7354_v6, %v3789_v56  ;;  %v3082_v34 = vadd.f32 %v3050_v11, %v9989_v47  ;;  %v3151_v5 = vmul.f32 %v7413_v37, %v7367_v28  ;;  %v9997_v38 = vld [vmem:[#allocation4_spill] sm:$0xff]  ;;  %v9998_v60 = vld [vmem:[#allocation51_spill] sm:$0xff]  ;;  %v7522_v47 = vld [vmem:[#allocation2 + $0xf1] sm:$0xff] }
 0x1cd   : > { %v3251_v24 = vmul.f32 %v6965_v26, %v7376_v20  ;;  %v3990_v19 = vadd.f32 %v3958_v58, %v3889_v62  ;;  %v1046_v16 = vmul.f32 %v4908_v21, %v9990_v40  ;;  %v1025_v44 = vmul.f32 %v4910_v3, %v9991_v31  ;;  %v7511_v11 = vld [vmem:[%s9605_s4] ss:$0 sm:$0xff]  ;;  %v10002_v58 = vld [vmem:[#allocation78_spill] sm:$0xff] }
 0x1ce   : > { %v3991_v22 = vadd.f32 %v7371_v4, %v3890_v27  ;;  %v1045_v6 = vmul.f32 %v4916_v0, %v9992_v57  ;;  %v2376_v28 = vadd.f32 %v7328_v54, %v7406_v45  ;;  %v2880_v20 = vadd.f32 %v7339_v49, %v2779_v36  ;;  %v9993_v49 = vld [vmem:[#allocation138_spill] sm:$0xff]  ;;  %v9994_v45 = vld [vmem:[#allocation139_spill] sm:$0xff]  ;;  %9999 = vst [vmem:[#allocation87_spill] sm:$0xff] %v7511_v11  ;;  %v7520_v27 = vld [vmem:[#allocation2 + $0xf0] sm:$0xff] }
 0x1cf   : > { %v3283_v23 = vadd.f32 %v3251_v24, %v3182_v43  ;;  %v7475_v42 = vadd.f32 %v7311_v59, %v3990_v19  ;;  %v3364_v33 = vadd.f32 %v3332_v13, %v3263_v53  ;;  %v3352_v4 = vmul.f32 %v7042_v8, %v7389_v12  ;;  %1160 = vst.msk [vmem:[#allocation2 + $0x230] sm:$0xff] %vm497_vm1, %v1046_v16  ;;  %v10001_v43 = vld [vmem:[#allocation39_spill] sm:$0xff]  ;;  %v10005_v24 = vld [vmem:[#allocation77_spill] sm:$0xff] }
 0x1d0   : > { %v7483_v21 = vadd.f32 %v7311_v59, %v3991_v22  ;;  %4292 = vst.msk [vmem:[%s5633_s8 + $0xf8] sm:$0xff] %vm497_vm1, %v1046_v16  ;;  %1139 = vst.msk [vmem:[#allocation2 + $0xe8] sm:$0xff] %vm497_vm1, %v1025_v44  ;;  %v3365_v3 = vadd.f32 %v7322_v17, %v3264_v1  ;;  %v3183_v36 = vadd.f32 %v3151_v5, %v3082_v34  ;;  %v7524_v34 = vld [vmem:[#allocation2 + $0xf2] sm:$0xff]  ;;  %v10007_v16 = vld [vmem:[#allocation3_spill] sm:$0xff] }
 0x1d1   : > { %4271 = vst.msk [vmem:[%s5633_s8 + $0x50] sm:$0xff] %vm497_vm1, %v1025_v44  ;;  %1159 = vst.msk [vmem:[#allocation2 + $0x228] sm:$0xff] %vm497_vm1, %v1045_v6  ;;  %v4633_v54 = vmul.f32 -1.442695, %v7475_v42  ;;  %v7497_v12 = vadd.f32 %v9993_v49, %v2376_v28  ;;  %v7500_v13 = vadd.f32 %v9994_v45, %v2880_v20  ;;  %v7503_v17 = vmul.f32 %v5131_v10, %v7218_v39  ;;  %v10006_v22 = vld [vmem:[#allocation17_spill] sm:$0xff]  ;;  %v10009_v20 = vld [vmem:[#allocation16_spill] sm:$0xff] }
 0x1d2   : > { %4291 = vst.msk [vmem:[%s5633_s8 + $0xf0] sm:$0xff] %vm497_vm1, %v1045_v6  ;;  %v4918_v48 = vpop.eup %4917  ;;  %v3434_v0 = vmul.f32 %v9998_v60, %v9997_v38  ;;  %v4634_v2 = vmul.f32 -1.442695, %v7483_v21  ;;  %v7514_v56 = vadd.f32 %v7511_v11, %v4749_v29  ;;  %v3252_v62 = vmul.f32 %v6965_v26, %v10001_v43  ;;  %10003 = vst [vmem:[#allocation35_spill] sm:$0xff] %v7520_v27  ;;  %v10012_v49 = vld [vmem:[#allocation133_spill] sm:$0xff] }
 0x1d3   : > { %9995 = vst [vmem:[#allocation76_spill] sm:$0xff] %v7500_v13  ;;  %9996 = vst [vmem:[#allocation5_spill] sm:$0xff] %v7503_v17  ;;  %v3433_v53 = vmul.f32 %v9998_v60, %v10002_v58  ;;  %v3384_v1 = vadd.f32 %v3352_v4, %v3283_v23  ;;  %4929 = vpow2.f32 %v4633_v54  ;;  %v3353_v19 = vmul.f32 %v7042_v8, %v10005_v24  ;;  %v10010_v4 = vld [vmem:[#allocation128_spill] sm:$0xff] }
 0x1d4   : > { %10000 = vst [vmem:[#allocation89_spill] sm:$0xff] %v7514_v56  ;;  %10004 = vst [vmem:[#allocation138_spill] sm:$0xff] %v7522_v47  ;;  %v4920_v5 = vpop.eup %4919  ;;  %v7530_v40 = vmul.f32 %v9998_v60, %v10006_v22  ;;  %4931 = vpow2.f32 %v4634_v2  ;;  %v7533_v31 = vadd.f32 %v4781_v30, %v10007_v16  ;;  %v3284_v6 = vadd.f32 %v3252_v62, %v3183_v36  ;;  %v10019_v24 = vld [vmem:[#allocation140_spill] sm:$0xff]  ;;  %v10020_v56 = vld [vmem:[#allocation141_spill] sm:$0xff] }
 0x1d5   : > { %v4922_v44 = vpop.eup %4921  ;;  %v7535_v57 = vadd.f32 %v3433_v53, %v3364_v33  ;;  %v3453_v23 = vmul.f32 %v9998_v60, %v7396_v63  ;;  %v7539_v28 = vadd.f32 %v3434_v0, %v3365_v3  ;;  %v1720_v29 = vmul.f32 %v10009_v20, %v7520_v27 }
 0x1d6   : > { %10008 = vst [vmem:[#allocation139_spill] sm:$0xff] %v7533_v31  ;;  %v7545_v54 = vmul.f32 %v10010_v4, %v7522_v47  ;;  %v7549_v45 = vmul.f32 %v10012_v49, %v7524_v34  ;;  %v932_v30 = vadd.f32 1.0, %v4918_v48  ;;  %v4924_v33 = vpop.eup %4923  ;;  %v2225_v63 = vmul.f32 %v9953_v50, %v7520_v27 }
 0x1d7   : > { %v7551_v10 = vadd.f32 %v3453_v23, %v3384_v1  ;;  %v7557_v3 = vmul.f32 %v9960_v32, %v7522_v47  ;;  %v7561_v36 = vmul.f32 %v9966_v61, %v7524_v34  ;;  %v7565_v0 = vmul.f32 %v6947_v18, %v7520_v27  ;;  %v7579_v62 = vld [vmem:[#allocation2 + $0xe6] sm:$0xff]  ;;  %v7581_v58 = vld [vmem:[#allocation2 + $0xee] sm:$0xff] }
 0x1d8   : > { %10011 = vst [vmem:[#allocation4_spill] sm:$0xff] %v7545_v54  ;;  %10013 = vst [vmem:[#allocation39_spill] sm:$0xff] %v7549_v45  ;;  %v4926_v38 = vpop.eup %4925  ;;  %v7569_v48 = vmul.f32 %v7034_v9, %v7522_v47  ;;  %v7573_v2 = vmul.f32 %v7053_v52, %v7524_v34  ;;  %v7577_v43 = vmul.f32 %v7257_v55, %v7520_v27  ;;  %v7583_v53 = vld [vmem:[#allocation2 + $0xe7] sm:$0xff]  ;;  %v7590_v17 = vld [vmem:[#allocation2 + $0xef] sm:$0xff]  ;;  %v1292_v31 = vadd.f32 1.0, %v4920_v5 }
 0x1d9   : > { %10014 = vst [vmem:[#allocation78_spill] sm:$0xff] %v7551_v10  ;;  %10015 = vst [vmem:[#allocation77_spill] sm:$0xff] %v7557_v3  ;;  %v4928_v1 = vpop.eup %4927  ;;  %v4233_v22 = vmul.f32 %v4926_v38, %v10019_v24  ;;  %v7588_v23 = vmul.f32 %v7271_v25, %v7522_v47  ;;  %v7592_v16 = vld [vmem:[#allocation2 + $0xe8] sm:$0xff]  ;;  %v3385_v11 = vadd.f32 %v3353_v19, %v3284_v6  ;;  %4933 = vrcp.f32 %v932_v30  ;;  %v10023_v47 = vld [vmem:[#allocation137_spill] sm:$0xff] }
 0x1da   : > { %10016 = vst [vmem:[#allocation17_spill] sm:$0xff] %v7561_v36  ;;  %10017 = vst [vmem:[#allocation16_spill] sm:$0xff] %v7569_v48  ;;  %v7594_v27 = vld [vmem:[#allocation2 + $0xe9] sm:$0xff]  ;;  %v10021_v36 = vld [vmem:[#allocation15_spill] sm:$0xff]  ;;  %v931_v38 = vadd.f32 1.0, %v4922_v44  ;;  %v1618_v48 = vmul.f32 %v10023_v47, %v7583_v53  ;;  %v1619_v5 = vmul.f32 %v10023_v47, %v7590_v17  ;;  %v1291_v19 = vadd.f32 1.0, %v4924_v33 }
 0x1db   : > { %10018 = vst [vmem:[#allocation128_spill] sm:$0xff] %v7573_v2  ;;  %v4234_v2 = vmul.f32 %v4928_v1, %v10020_v56  ;;  %v1517_v45 = vmul.f32 %v10021_v36, %v7579_v62  ;;  %v7599_v46 = vld [vmem:[#allocation2 + $0xea] sm:$0xff]  ;;  %4645 = vst.msk [vmem:[%s5633_s8 + $0x120] sm:$0xff] %vm497_vm1, %v4233_v22  ;;  %v1518_v24 = vmul.f32 %v10021_v36, %v7581_v58  ;;  %v10024_v6 = vld [vmem:[#allocation134_spill] sm:$0xff] }
 0x1dc   : > { %10022 = vst [vmem:[#allocation133_spill] sm:$0xff] %v7599_v46  ;;  %v1719_v56 = vmul.f32 %v10009_v20, %v7592_v16  ;;  %v1820_v44 = vmul.f32 %v10010_v4, %v7594_v27  ;;  %v2022_v30 = vmul.f32 %v10024_v6, %v7579_v62  ;;  %v2023_v36 = vmul.f32 %v10024_v6, %v7581_v58  ;;  %v10025_v33 = vld [vmem:[#allocation55_spill] sm:$0xff]  ;;  %v10026_v3 = vld [vmem:[#allocation86_spill] sm:$0xff]  ;;  %v10027_v20 = vld [vmem:[#allocation88_spill] sm:$0xff] }
 0x1dd   : > { %4646 = vst.msk [vmem:[%s5633_s8 + $0x128] sm:$0xff] %vm497_vm1, %v4234_v2  ;;  %v1650_v1 = vadd.f32 %v1618_v48, %v1517_v45  ;;  %v1651_v22 = vadd.f32 %v1619_v5, %v1518_v24  ;;  %v1921_v47 = vmul.f32 %v10012_v49, %v7599_v46  ;;  %v2123_v2 = vmul.f32 %v10025_v33, %v7583_v53  ;;  %v10029_v49 = vld [vmem:[#allocation129_spill] sm:$0xff] }
 0x1de   : > { %v2054_v54 = vadd.f32 %v2022_v30, %v10026_v3  ;;  %v2055_v41 = vadd.f32 %v2023_v36, %v10027_v20  ;;  %v2124_v4 = vmul.f32 %v10025_v33, %v7590_v17  ;;  %v2224_v10 = vmul.f32 %v9953_v50, %v7592_v16  ;;  %v10030_v36 = vld [vmem:[#allocation132_spill] sm:$0xff] }
 0x1df   : > { %v1751_v60 = vadd.f32 %v1719_v56, %v1650_v1  ;;  %v7629_v6 = vadd.f32 %v1720_v29, %v1651_v22  ;;  %v2325_v45 = vmul.f32 %v9960_v32, %v7594_v27  ;;  %v2526_v48 = vmul.f32 %v10029_v49, %v7579_v62  ;;  %v10031_v29 = vld [vmem:[#allocation131_spill] sm:$0xff] }
 0x1e0   : > { %v4930_v24 = vpop.eup %4929  ;;  %v2155_v5 = vadd.f32 %v2123_v2, %v2054_v54  ;;  %v2156_v3 = vadd.f32 %v2124_v4, %v2055_v41  ;;  %v2527_v30 = vmul.f32 %v10029_v49, %v7581_v58  ;;  %v2627_v33 = vmul.f32 %v10030_v36, %v7583_v53  ;;  %v10032_v54 = vld [vmem:[#allocation13_spill] sm:$0xff] }
 0x1e1   : > { %10028 = vst [vmem:[#allocation140_spill] sm:$0xff] %v7629_v6  ;;  %v4932_v20 = vpop.eup %4931  ;;  %v4157_v50 = vadd.f32 1.0, %v4930_v24  ;;  %v1852_v56 = vadd.f32 %v1820_v44, %v1751_v60  ;;  %v2558_v1 = vadd.f32 %v2526_v48, %v10031_v29  ;;  %v2628_v32 = vmul.f32 %v10030_v36, %v7590_v17  ;;  %v2712_v60 = vld [vmem:[#allocation2 + $0x230] sm:$0xff]  ;;  %v7693_v29 = vld [vmem:[#allocation2 + $0x226] sm:$0xff] }
 0x1e2   : > { %v4158_v22 = vadd.f32 1.0, %v4932_v20  ;;  %v2256_v6 = vadd.f32 %v2224_v10, %v2155_v5  ;;  %v7642_v59 = vadd.f32 %v2225_v63, %v2156_v3  ;;  %v2559_v41 = vadd.f32 %v2527_v30, %v10032_v54  ;;  %v2813_v63 = vld [vmem:[#allocation2 + $0x231] sm:$0xff] }
 0x1e3   : > { %4935 = vrcp.f32 %v4157_v50  ;;  %v7645_v2 = vadd.f32 %v1921_v47, %v1852_v56  ;;  %v2659_v4 = vadd.f32 %v2627_v33, %v2558_v1  ;;  %v2728_v13 = vmul.f32 %v6947_v18, %v7592_v16  ;;  %v7673_v20 = vld [vmem:[#allocation2 + $0x232] sm:$0xff] }
 0x1e4   : > { %4937 = vrcp.f32 %v4158_v22  ;;  %v2357_v44 = vadd.f32 %v2325_v45, %v2256_v6  ;;  %v2426_v48 = vmul.f32 %v9966_v61, %v7599_v46  ;;  %v2660_v24 = vadd.f32 %v2628_v32, %v2559_v41  ;;  %10034 = vst [vmem:[#allocation15_spill] sm:$0xff] %v7673_v20  ;;  %v7695_v1 = vld [vmem:[#allocation2 + $0x22e] sm:$0xff] }
 0x1e5   : > { %v7653_v10 = vmul.f32 %v7298_v35, %v7524_v34  ;;  %v2760_v5 = vadd.f32 %v2728_v13, %v2659_v4  ;;  %v2829_v47 = vmul.f32 %v7034_v9, %v7594_v27  ;;  %4939 = vrcp.f32 %v1292_v31  ;;  %v7703_v4 = vld [vmem:[#allocation2 + $0x227] sm:$0xff] }
 0x1e6   : > { %v7657_v3 = vadd.f32 %v2426_v48, %v2357_v44  ;;  %v7660_v30 = vadd.f32 %v7565_v0, %v2660_v24  ;;  %v7663_v6 = vadd.f32 %v7530_v40, %v3385_v11  ;;  %4941 = vrcp.f32 %v931_v38  ;;  %v7665_v61 = vpop.eup %4933 }
 0x1e7   : > { %v2749_v45 = vmul.f32 %v6947_v18, %v2712_v60  ;;  %v2861_v33 = vadd.f32 %v2829_v47, %v2760_v5  ;;  %v2930_v13 = vmul.f32 %v7053_v52, %v7599_v46  ;;  %4943 = vrcp.f32 %v1291_v19 }
 0x1e8   : > { %10033 = vst [vmem:[#allocation141_spill] sm:$0xff] %v7657_v3  ;;  %v7671_v31 = vmul.f32 %v7034_v9, %v2813_v63  ;;  %v7676_v0 = vmul.f32 %v6965_v26, %v2712_v60  ;;  %v3536_v11 = vmul.f32 %v7218_v39, %v7579_v62  ;;  %v3537_v40 = vmul.f32 %v7218_v39, %v7581_v58 }
 0x1e9   : > { %v7683_v38 = vmul.f32 %v7042_v8, %v2813_v63  ;;  %v7686_v50 = vmul.f32 %v7257_v55, %v2712_v60  ;;  %v7689_v19 = vmul.f32 %v7271_v25, %v2813_v63  ;;  %v7691_v56 = vadd.f32 %v2930_v13, %v2861_v33  ;;  %v7705_v60 = vld [vmem:[#allocation2 + $0x22f] sm:$0xff] }
 0x1ea   : > { %v3568_v32 = vadd.f32 %v3536_v11, %v7535_v57  ;;  %v3569_v22 = vadd.f32 %v3537_v40, %v7539_v28  ;;  %v3637_v54 = vmul.f32 %v7243_v14, %v7583_v53  ;;  %v3638_v41 = vmul.f32 %v7243_v14, %v7590_v17  ;;  %v7725_v33 = vld [vmem:[#allocation2 + $0x228] sm:$0xff] }
 0x1eb   : > { %10035 = vst [vmem:[#allocation137_spill] sm:$0xff] %v7691_v56  ;;  %v7709_v44 = vmul.f32 %v7298_v35, %v7673_v20  ;;  %v7713_v48 = vmul.f32 %v7385_v15, %v7579_v62  ;;  %v7717_v57 = vmul.f32 %v7385_v15, %v7581_v58  ;;  %v3738_v28 = vmul.f32 %v7257_v55, %v7592_v16  ;;  %v7727_v13 = vld [vmem:[#allocation2 + $0x229] sm:$0xff] }
 0x1ec   : > { %v3669_v24 = vadd.f32 %v3637_v54, %v3568_v32  ;;  %v3670_v63 = vadd.f32 %v3638_v41, %v3569_v22  ;;  %v2546_v5 = vmul.f32 %v10029_v49, %v7693_v29  ;;  %v2547_v47 = vmul.f32 %v10029_v49, %v7695_v1  ;;  %v7729_v62 = vld [vmem:[#allocation2 + $0x22a] sm:$0xff] }
 0x1ed   : > { %v3839_v58 = vmul.f32 %v7271_v25, %v7594_v27  ;;  %v3940_v11 = vmul.f32 %v7298_v35, %v7599_v46  ;;  %v2647_v40 = vmul.f32 %v10030_v36, %v7703_v4  ;;  %v2648_v32 = vmul.f32 %v10030_v36, %v7705_v60 }
 0x1ee   : > { %v3770_v22 = vadd.f32 %v3738_v28, %v3669_v24  ;;  %v3771_v49 = vadd.f32 %v7577_v43, %v3670_v63  ;;  %v2578_v54 = vadd.f32 %v2546_v5, %v7431_v7  ;;  %v2579_v41 = vadd.f32 %v2547_v47, %v7497_v12 }
 0x1ef   : > { %v2748_v56 = vmul.f32 %v6947_v18, %v7725_v33  ;;  %v2849_v20 = vmul.f32 %v7034_v9, %v7727_v13  ;;  %v2950_v46 = vmul.f32 %v7053_v52, %v7729_v62  ;;  %v3051_v3 = vmul.f32 %v7385_v15, %v7693_v29 }
 0x1f0   : > { %v4936_v36 = vpop.eup %4935  ;;  %v3871_v28 = vadd.f32 %v3839_v58, %v3770_v22  ;;  %v3872_v43 = vadd.f32 %v7588_v23, %v3771_v49  ;;  %v2679_v7 = vadd.f32 %v2647_v40, %v2578_v54  ;;  %v2680_v24 = vadd.f32 %v2648_v32, %v2579_v41  ;;  %v10036_v22 = vld [vmem:[#allocation76_spill] sm:$0xff]  ;;  %v10037_v54 = vld [vmem:[#allocation79_spill] sm:$0xff] }
 0x1f1   : > { %v4938_v12 = vpop.eup %4937  ;;  %v4253_v63 = vmul.f32 %v4936_v36, %v7475_v42  ;;  %v3052_v18 = vmul.f32 %v7385_v15, %v7695_v1  ;;  %v3083_v9 = vadd.f32 %v3051_v3, %v7444_v51  ;;  %v3152_v52 = vmul.f32 %v7413_v37, %v7703_v4 }
 0x1f2   : > { %v4940_v5 = vpop.eup %4939  ;;  %v4254_v47 = vmul.f32 %v4938_v12, %v7483_v21  ;;  %v3972_v58 = vadd.f32 %v3940_v11, %v3871_v28  ;;  %v3973_v23 = vadd.f32 %v7653_v10, %v3872_v43  ;;  %v2780_v40 = vadd.f32 %v2748_v56, %v2679_v7 }
 0x1f3   : > { %v4942_v32 = vpop.eup %4941  ;;  %4665 = vst.msk [vmem:[%s5633_s8 + $0x1c0] sm:$0xff] %vm497_vm1, %v4253_v63  ;;  %v2781_v42 = vadd.f32 %v2749_v45, %v2680_v24  ;;  %v3084_v49 = vadd.f32 %v3052_v18, %v10036_v22  ;;  %v3153_v15 = vmul.f32 %v7413_v37, %v7705_v60  ;;  %v3184_v51 = vadd.f32 %v3152_v52, %v3083_v9  ;;  %v10040_v9 = vld [vmem:[#allocation78_spill] sm:$0xff] }
 0x1f4   : > { %v4944_v3 = vpop.eup %4943  ;;  %4666 = vst.msk [vmem:[%s5633_s8 + $0x1c8] sm:$0xff] %vm497_vm1, %v4254_v47  ;;  %v7767_v41 = vadd.f32 %v10037_v54, %v3972_v58  ;;  %v7770_v21 = vadd.f32 %v10037_v54, %v3973_v23  ;;  %v2881_v10 = vadd.f32 %v2849_v20, %v2780_v40  ;;  %v3253_v56 = vmul.f32 %v6965_v26, %v7725_v33  ;;  %v10039_v26 = vld [vmem:[#allocation51_spill] sm:$0xff]  ;;  %v10041_v47 = vld [vmem:[#allocation130_spill] sm:$0xff] }
 0x1f5   : > { %v3132_v45 = vmul.f32 %v7413_v37, %v7583_v53  ;;  %v7777_v11 = vadd.f32 %v7671_v31, %v2781_v42  ;;  %v3185_v36 = vadd.f32 %v3153_v15, %v3084_v49  ;;  %v3354_v28 = vmul.f32 %v7042_v8, %v7727_v13  ;;  %v10043_v23 = vld [vmem:[#allocation135_spill] sm:$0xff]  ;;  %v10045_v49 = vld [vmem:[#allocation109_spill] sm:$0xff] }
 0x1f6   : > { %v4615_v43 = vmul.f32 -1.442695, %v7767_v41  ;;  %v4616_v7 = vmul.f32 -1.442695, %v7770_v21  ;;  %v7783_v24 = vadd.f32 %v2950_v46, %v2881_v10  ;;  %v3285_v20 = vadd.f32 %v3253_v56, %v3184_v51  ;;  %v10047_v51 = vld [vmem:[#allocation4_spill] sm:$0xff]  ;;  %v10048_v10 = vld [vmem:[#allocation77_spill] sm:$0xff] }
 0x1f7   : > { %v3286_v12 = vadd.f32 %v7676_v0, %v3185_v36  ;;  %v3455_v63 = vmul.f32 %v10039_v26, %v7729_v62  ;;  %v3556_v53 = vmul.f32 %v7218_v39, %v7693_v29  ;;  %v3557_v31 = vmul.f32 %v7218_v39, %v7695_v1 }
 0x1f8   : > { %10038 = vst [vmem:[#allocation134_spill] sm:$0xff] %v7783_v24  ;;  %4945 = vpow2.f32 %v4615_v43  ;;  %v3386_v8 = vadd.f32 %v3354_v28, %v3285_v20  ;;  %v3657_v18 = vmul.f32 %v7243_v14, %v7703_v4  ;;  %v3658_v46 = vmul.f32 %v7243_v14, %v7705_v60 }
 0x1f9   : > { %4947 = vpow2.f32 %v4616_v7  ;;  %v7797_v0 = vadd.f32 %v7683_v38, %v3286_v12  ;;  %v3588_v52 = vadd.f32 %v3556_v53, %v10040_v9  ;;  %v3589_v29 = vadd.f32 %v3557_v31, %v7663_v6  ;;  %v10044_v38 = vld [vmem:[#allocation108_spill] sm:$0xff]  ;;  %v10052_v12 = vld [vmem:[#allocation39_spill] sm:$0xff] }
 0x1fa   : > { %v3063_v1 = vadd.f32 %v7713_v48, %v10041_v47  ;;  %v7803_v58 = vadd.f32 %v3455_v63, %v3386_v8  ;;  %v3758_v4 = vmul.f32 %v7257_v55, %v7725_v33  ;;  %v1028_v60 = vmul.f32 %v7665_v61, %v10043_v23  ;;  %v10046_v48 = vld [vmem:[#allocation140_spill] sm:$0xff]  ;;  %v734_v47 = vpop.f32.mrf.mxu0 }
 0x1fb   : > { %v3689_v40 = vadd.f32 %v3657_v18, %v3588_v52  ;;  %v3690_v42 = vadd.f32 %v3658_v46, %v3589_v29  ;;  %v1304_v22 = vmul.f32 %v4940_v5, %v10044_v38  ;;  %v1027_v15 = vmul.f32 %v4942_v32, %v10045_v49  ;;  %v10049_v61 = vld [vmem:[#allocation16_spill] sm:$0xff]  ;;  %v10061_v49 = vld [vmem:[#allocation139_spill] sm:$0xff] }
 0x1fc   : > { %10042 = vst [vmem:[#allocation55_spill] sm:$0xff] %v7803_v58  ;;  %v3859_v6 = vmul.f32 %v7271_v25, %v7727_v13  ;;  %1142 = vst.msk [vmem:[#allocation2 + $0x110] sm:$0xff] %vm497_vm1, %v1028_v60  ;;  %v1853_v33 = vadd.f32 %v10047_v51, %v10046_v48  ;;  %v2358_v56 = vadd.f32 %v10048_v10, %v7642_v59  ;;  %v10050_v13 = vld [vmem:[#allocation136_spill] sm:$0xff]  ;;  %v10053_v59 = vld [vmem:[#allocation17_spill] sm:$0xff] }
 0x1fd   : > { %4274 = vst.msk [vmem:[%s5633_s8 + $0x68] sm:$0xff] %vm497_vm1, %v1028_v60  ;;  %v2862_v36 = vadd.f32 %v10049_v61, %v7660_v30  ;;  %v3790_v28 = vadd.f32 %v3758_v4, %v3689_v40  ;;  %v3791_v5 = vadd.f32 %v7686_v50, %v3690_v42  ;;  %v1309_v32 = vmul.f32 0.0, %v1304_v22  ;;  %1141 = vst.msk [vmem:[#allocation2 + $0x108] sm:$0xff] %vm497_vm1, %v1027_v15  ;;  %v10051_v7 = vld [vmem:[#allocation32_spill] sm:$0xff]  ;;  %v10062_v48 = vld [vmem:[#allocation87_spill] sm:$0xff] }
 0x1fe   : > { %4273 = vst.msk [vmem:[%s5633_s8 + $0x60] sm:$0xff] %vm497_vm1, %v1027_v15  ;;  %v1303_v43 = vmul.f32 %v4944_v3, %v10050_v13  ;;  %v3064_v20 = vadd.f32 %v7717_v57, %v10051_v7  ;;  %v7830_v26 = vadd.f32 %v10052_v12, %v1853_v33  ;;  %v7833_v63 = vadd.f32 %v10053_v59, %v2358_v56  ;;  %v10054_v30 = vld [vmem:[#allocation128_spill] sm:$0xff]  ;;  %v1270_v15 = vpop.f32.mrf.mxu1  ;;  %v5140_v56 = vld [vmem:[#allocation2 + $0x90] sm:$0xff]  ;;  %v10067_v7 = vld [vmem:[#allocation3_spill] sm:$0xff] }
 0x1ff   : > { %v7836_v53 = vadd.f32 %v10054_v30, %v2862_v36  ;;  %v3891_v50 = vadd.f32 %v3859_v6, %v3790_v28  ;;  %v3892_v31 = vadd.f32 %v7689_v19, %v3791_v5  ;;  %v3960_v8 = vmul.f32 %v7298_v35, %v7729_v62  ;;  %1313 = vst.msk [vmem:[#allocation2 + $0x10] sm:$0xff] %vm497_vm1, %v1309_v32  ;;  %v5133_v18 = vld [vmem:[#allocation2 + $0x1ae] sm:$0xff]  ;;  %v10066_v28 = vld [vmem:[#allocation35_spill] sm:$0xff] }
 0x200   : > { %v1308_v3 = vmul.f32 0.0, %v1303_v43  ;;  %v7843_v57 = vmul.f32 %v5133_v18, %v7218_v39  ;;  %v5134_v46 = vld [vmem:[#allocation2 + $0x1a7] sm:$0xff]  ;;  %v5135_v52 = vld [vmem:[#allocation2 + $0x1af] sm:$0xff]  ;;  %v3133_v19 = vmul.f32 %v7413_v37, %v7590_v17  ;;  %v3164_v62 = vadd.f32 %v3132_v45, %v3063_v1 }
 0x201   : > { %v7846_v9 = vmul.f32 %v5134_v46, %v7243_v14  ;;  %v7849_v29 = vmul.f32 %v5135_v52, %v7243_v14  ;;  %v3992_v4 = vadd.f32 %v3960_v8, %v3891_v50  ;;  %v3993_v23 = vadd.f32 %v7709_v44, %v3892_v31  ;;  %v10058_v39 = vld [vmem:[#allocation89_spill] sm:$0xff]  ;;  %v5136_v40 = vld [vmem:[#allocation2 + $0x1a8] sm:$0xff]  ;;  %v7866_v44 = vld [vmem:[%s9606_s5 + $0x1a] ss:$0 sm:$0xff] }
 0x202   : > { %10055 = vst [vmem:[#allocation86_spill] sm:$0xff] %v7843_v57  ;;  %1312 = vst.msk [vmem:[#allocation2 + $0x8] sm:$0xff] %vm497_vm1, %v1308_v3  ;;  %v4526_v60 = vmul.f32 -1.442695, %v10058_v39  ;;  %v7857_v42 = vmul.f32 %v5136_v40, %v7257_v55  ;;  %v5137_v38 = vld [vmem:[#allocation2 + $0x1a9] sm:$0xff]  ;;  %v3165_v22 = vadd.f32 %v3133_v19, %v3064_v20  ;;  %v3233_v45 = vmul.f32 %v7866_v44, %v7592_v16  ;;  %v7890_v36 = vld [vmem:[#allocation2 + $0x91] sm:$0xff] }
 0x203   : > { %10056 = vst [vmem:[#allocation88_spill] sm:$0xff] %v7846_v9  ;;  %10057 = vst [vmem:[#allocation129_spill] sm:$0xff] %v7849_v29  ;;  %v7860_v14 = vmul.f32 %v5137_v38, %v7271_v25  ;;  %v4552_v17 = vmul.f32 -1.442695, %v10061_v49  ;;  %v7871_v1 = vadd.f32 %v10037_v54, %v3992_v4  ;;  %v7874_v6 = vadd.f32 %v10037_v54, %v3993_v23  ;;  %v5139_v33 = vld [vmem:[#allocation2 + $0x1aa] sm:$0xff]  ;;  %v7915_v19 = vld [vmem:[#allocation2 + $0x92] sm:$0xff] }
 0x204   : > { %10059 = vst [vmem:[#allocation132_spill] sm:$0xff] %v7857_v42  ;;  %v7877_v51 = vadd.f32 %v10062_v48, %v734_v47  ;;  %v7880_v10 = vmul.f32 %v5139_v33, %v7298_v35  ;;  %v7883_v61 = vmul.f32 %v5140_v56, %v7866_v44  ;;  %v7888_v16 = vld [vmem:[%s9606_s5 + $0x1b] ss:$0 sm:$0xff]  ;;  %v3234_v5 = vmul.f32 %v7866_v44, %v10066_v28  ;;  %v7905_v3 = vld [vmem:[#allocation2 + $0x106] sm:$0xff]  ;;  %v7907_v18 = vld [vmem:[#allocation2 + $0x10e] sm:$0xff] }
 0x205   : > { %10060 = vst [vmem:[#allocation131_spill] sm:$0xff] %v7860_v14  ;;  %v7894_v54 = vmul.f32 %v7890_v36, %v7888_v16  ;;  %v4946_v32 = vpop.eup %4945  ;;  %v3265_v13 = vadd.f32 %v3233_v45, %v3164_v62  ;;  %v4635_v43 = vmul.f32 -1.442695, %v7871_v1  ;;  %4949 = vpow2.f32 %v4526_v60  ;;  %v7913_v52 = vld [vmem:[%s9606_s5 + $0x1c] ss:$0 sm:$0xff]  ;;  %v7926_v23 = vld [vmem:[#allocation2 + $0x110] sm:$0xff] }
 0x206   : > { %10063 = vst [vmem:[#allocation13_spill] sm:$0xff] %v7880_v10  ;;  %10064 = vst [vmem:[#allocation76_spill] sm:$0xff] %v7883_v61  ;;  %v7900_v20 = vadd.f32 %v10067_v7, %v1270_v15  ;;  %v4948_v12 = vpop.eup %4947  ;;  %v3266_v59 = vadd.f32 %v3234_v5, %v3165_v22  ;;  %v4139_v30 = vadd.f32 1.0, %v4946_v32  ;;  %v4636_v50 = vmul.f32 -1.442695, %v7874_v6  ;;  %v10070_v62 = vld [vmem:[#allocation138_spill] sm:$0xff] }
 0x207   : > { %10065 = vst [vmem:[#allocation79_spill] sm:$0xff] %v7894_v54  ;;  %4951 = vpow2.f32 %v4552_v17  ;;  %v3334_v31 = vmul.f32 %v7888_v16, %v7594_v27  ;;  %v4140_v8 = vadd.f32 1.0, %v4948_v12  ;;  %v4525_v46 = vmul.f32 -1.442695, %v7877_v51  ;;  %v7928_v60 = vld [vmem:[#allocation2 + $0x107] sm:$0xff]  ;;  %v7930_v40 = vld [vmem:[#allocation2 + $0x10f] sm:$0xff] }
 0x208   : > { %4953 = vpow2.f32 %v4635_v43  ;;  %v7919_v47 = vmul.f32 %v7915_v19, %v7913_v52  ;;  %v7922_v27 = vmul.f32 %v5140_v56, %v7257_v55  ;;  %v3335_v4 = vmul.f32 %v7888_v16, %v10070_v62  ;;  %v7938_v17 = vld [vmem:[#allocation2 + $0x108] sm:$0xff]  ;;  %v7944_v15 = vld [vmem:[%s9606_s5] ss:$0 sm:$0xff]  ;;  %v7959_v5 = vld [vmem:[%s9606_s5 + $0x2] ss:$0 sm:$0xff] }
 0x209   : > { %4955 = vrcp.f32 %v4139_v30  ;;  %v7934_v38 = vmul.f32 %v7913_v52, %v7524_v34  ;;  %v7936_v22 = vadd.f32 %v3334_v31, %v3265_v13  ;;  %v4551_v55 = vmul.f32 -1.442695, %v7900_v20  ;;  %v7950_v33 = vld [vmem:[#allocation2 + $0x109] sm:$0xff]  ;;  %v7966_v13 = vld [vmem:[%s9606_s5 + $0x1] ss:$0 sm:$0xff] }
 0x20a   : > { %10068 = vst [vmem:[#allocation51_spill] sm:$0xff] %v7919_v47  ;;  %10069 = vst [vmem:[#allocation78_spill] sm:$0xff] %v7922_v27  ;;  %4957 = vrcp.f32 %v4140_v8  ;;  %v1519_v45 = vmul.f32 %v7944_v15, %v7905_v3  ;;  %v1520_v34 = vmul.f32 %v7944_v15, %v7907_v18  ;;  %v7952_v56 = vld [vmem:[#allocation2 + $0x10a] sm:$0xff]  ;;  %v7954_v28 = vadd.f32 %v3335_v4, %v3266_v59  ;;  %v7993_v4 = vld [vmem:[%s9606_s5 + $0x3] ss:$0 sm:$0xff] }
 0x20b   : > { %4959 = vpow2.f32 %v4636_v50  ;;  %10071 = vst [vmem:[#allocation130_spill] sm:$0xff] %v7950_v33  ;;  %v1722_v32 = vmul.f32 %v7959_v5, %v7926_v23  ;;  %v1620_v43 = vmul.f32 %v7966_v13, %v7928_v60  ;;  %v1621_v7 = vmul.f32 %v7966_v13, %v7930_v40  ;;  %v7975_v12 = vld [vmem:[%s9606_s5 + $0xa] ss:$0 sm:$0xff]  ;;  %v7984_v50 = vld [vmem:[%s9606_s5 + $0x8] ss:$0 sm:$0xff]  ;;  %10074 = vst [vmem:[#allocation109_spill] sm:$0xff] %v7993_v4 }
 0x20c   : > { %4961 = vpow2.f32 %v4525_v46  ;;  %10072 = vst [vmem:[#allocation135_spill] sm:$0xff] %v7975_v12  ;;  %v2227_v59 = vmul.f32 %v7975_v12, %v7926_v23  ;;  %v1721_v30 = vmul.f32 %v7959_v5, %v7938_v17  ;;  %10073 = vst [vmem:[#allocation108_spill] sm:$0xff] %v7984_v50  ;;  %v2024_v31 = vmul.f32 %v7984_v50, %v7905_v3  ;;  %v8000_v14 = vld [vmem:[%s9606_s5 + $0x4] ss:$0 sm:$0xff] }
 0x20d   : > { %v2025_v8 = vmul.f32 %v7984_v50, %v7907_v18  ;;  %v1652_v46 = vadd.f32 %v1620_v43, %v1519_v45  ;;  %v1653_v62 = vadd.f32 %v1621_v7, %v1520_v34  ;;  %v1822_v10 = vmul.f32 %v7993_v4, %v7950_v33  ;;  %10075 = vst [vmem:[#allocation140_spill] sm:$0xff] %v8000_v14  ;;  %v8009_v34 = vld [vmem:[%s9606_s5 + $0x9] ss:$0 sm:$0xff] }
 0x20e   : > { %v1923_v42 = vmul.f32 %v8000_v14, %v7952_v56  ;;  %v2056_v29 = vadd.f32 %v2024_v31, %v7645_v2  ;;  %10076 = vst [vmem:[#allocation4_spill] sm:$0xff] %v8009_v34  ;;  %v2125_v43 = vmul.f32 %v8009_v34, %v7928_v60  ;;  %v2126_v7 = vmul.f32 %v8009_v34, %v7930_v40  ;;  %v8020_v2 = vld [vmem:[%s9606_s5 + $0x10] ss:$0 sm:$0xff] }
 0x20f   : > { %v2057_v45 = vadd.f32 %v2025_v8, %v7830_v26  ;;  %v1753_v9 = vadd.f32 %v1721_v30, %v1652_v46  ;;  %v8015_v57 = vadd.f32 %v1722_v32, %v1653_v62  ;;  %10077 = vst [vmem:[#allocation77_spill] sm:$0xff] %v8020_v2  ;;  %v2528_v26 = vmul.f32 %v8020_v2, %v7905_v3  ;;  %v8031_v32 = vld [vmem:[%s9606_s5 + $0x11] ss:$0 sm:$0xff] }
 0x210   : > { %v2529_v31 = vmul.f32 %v8020_v2, %v7907_v18  ;;  %v2157_v8 = vadd.f32 %v2125_v43, %v2056_v29  ;;  %v2226_v24 = vmul.f32 %v7975_v12, %v7938_v17  ;;  %10078 = vst [vmem:[#allocation16_spill] sm:$0xff] %v8031_v32  ;;  %v2629_v30 = vmul.f32 %v8031_v32, %v7928_v60  ;;  %v10079_v62 = vld [vmem:[#allocation141_spill] sm:$0xff]  ;;  %v8068_v2 = vld [vmem:[%s9606_s5 + $0xc] ss:$0 sm:$0xff] }
 0x211   : > { %v2158_v58 = vadd.f32 %v2126_v7, %v2057_v45  ;;  %v1854_v46 = vadd.f32 %v1822_v10, %v1753_v9  ;;  %v2560_v27 = vadd.f32 %v2528_v26, %v10079_v62  ;;  %v2630_v29 = vmul.f32 %v8031_v32, %v7930_v40  ;;  %v8044_v43 = vld [vmem:[%s9606_s5 + $0x12] ss:$0 sm:$0xff]  ;;  %10084 = vst [vmem:[#allocation17_spill] sm:$0xff] %v8068_v2 }
 0x212   : > { %v2561_v47 = vadd.f32 %v2529_v31, %v7833_v63  ;;  %v8039_v45 = vpop.eup %4949  ;;  %10080 = vst [vmem:[#allocation136_spill] sm:$0xff] %v8044_v43  ;;  %v2731_v7 = vmul.f32 %v8044_v43, %v7926_v23  ;;  %v2258_v54 = vadd.f32 %v2226_v24, %v2157_v8  ;;  %v8053_v63 = vld [vmem:[%s9606_s5 + $0xb] ss:$0 sm:$0xff]  ;;  %v2730_v32 = vmul.f32 %v8044_v43, %v7938_v17  ;;  %v8096_v43 = vld [vmem:[%s9606_s5 + $0x14] ss:$0 sm:$0xff] }
 0x213   : > { %v8048_v61 = vadd.f32 %v2227_v59, %v2158_v58  ;;  %10081 = vst [vmem:[#allocation32_spill] sm:$0xff] %v8053_v63  ;;  %v2327_v9 = vmul.f32 %v8053_v63, %v7950_v33  ;;  %v8059_v26 = vadd.f32 %v1923_v42, %v1854_v46  ;;  %v2661_v31 = vadd.f32 %v2629_v30, %v2560_v27  ;;  %v10083_v58 = vld [vmem:[#allocation133_spill] sm:$0xff] }
 0x214   : > { %v8057_v10 = vpop.eup %4951  ;;  %v2662_v62 = vadd.f32 %v2630_v29, %v2561_v47  ;;  %v3435_v59 = vmul.f32 %v7913_v52, %v10083_v58  ;;  %v2428_v34 = vmul.f32 %v8068_v2, %v7952_v56  ;;  %4963 = vpow2.f32 %v4551_v55  ;;  %v8077_v46 = vld [vmem:[%s9606_s5 + $0x13] ss:$0 sm:$0xff]  ;;  %v4752_v29 = vpop.f32.mrf.mxu0  ;;  %v8084_v55 = vld [vmem:[%s9605_s4] ss:$0 sm:$0xff] }
 0x215   : > { %10082 = vst [vmem:[#allocation39_spill] sm:$0xff] %v8059_v26  ;;  %v4954_v24 = vpop.eup %4953  ;;  %v2359_v8 = vadd.f32 %v2327_v9, %v2258_v54  ;;  %v2762_v47 = vadd.f32 %v2730_v32, %v2661_v31  ;;  %v2831_v54 = vmul.f32 %v8077_v46, %v7950_v33  ;;  %v4786_v9 = vpop.f32.mrf.mxu1  ;;  %10085 = vst [vmem:[#allocation128_spill] sm:$0xff] %v8084_v55 }
 0x216   : > { %v4956_v42 = vpop.eup %4955  ;;  %v4159_v27 = vadd.f32 1.0, %v4954_v24  ;;  %v8072_v30 = vadd.f32 %v2731_v7, %v2662_v62  ;;  %v3467_v32 = vadd.f32 %v3435_v59, %v7936_v22  ;;  %v3468_v62 = vadd.f32 %v7934_v38, %v7954_v28 }
 0x217   : > { %v4958_v24 = vpop.eup %4957  ;;  %v4235_v7 = vmul.f32 %v4956_v42, %v7767_v41  ;;  %v8088_v31 = vadd.f32 %v2428_v34, %v2359_v8  ;;  %v2863_v50 = vadd.f32 %v2831_v54, %v2762_v47  ;;  %v2932_v22 = vmul.f32 %v8096_v43, %v7952_v56  ;;  %v8118_v8 = vld [vmem:[#allocation2 + $0x111] sm:$0xff]  ;;  %v744_v47 = vpop.f32.mrf.mxu0 }
 0x218   : > { %v4960_v58 = vpop.eup %4959  ;;  %v4236_v26 = vmul.f32 %v4958_v24, %v7770_v21  ;;  %4965 = vrcp.f32 %v4159_v27  ;;  %v8102_v34 = vmul.f32 %v7890_v36, %v7271_v25  ;;  %v8107_v21 = vadd.f32 %v10062_v48, %v4752_v29  ;;  %v8125_v25 = vld [vmem:[%s9606_s5 + $0x20] ss:$0 sm:$0xff]  ;;  %v5163_v54 = vld [vmem:[#allocation2 + $0x1d2] sm:$0xff] }
 0x219   : > { %10086 = vst [vmem:[#allocation89_spill] sm:$0xff] %v8088_v31  ;;  %v4962_v41 = vpop.eup %4961  ;;  %4647 = vst.msk [vmem:[%s5633_s8 + $0x130] sm:$0xff] %vm497_vm1, %v4235_v7  ;;  %v4160_v38 = vadd.f32 1.0, %v4960_v58  ;;  %v8110_v28 = vadd.f32 %v4786_v9, %v8084_v55  ;;  %v8114_v59 = vmul.f32 %v7915_v19, %v7298_v35  ;;  %v8120_v42 = vadd.f32 %v2932_v22, %v2863_v50  ;;  %v5161_v35 = vld [vmem:[#allocation2 + $0x1d0] sm:$0xff]  ;;  %v8145_v58 = vld [vmem:[%s9606_s5 + $0x21] ss:$0 sm:$0xff] }
 0x21a   : > { %10087 = vst [vmem:[#allocation139_spill] sm:$0xff] %v8102_v34  ;;  %10088 = vst [vmem:[#allocation87_spill] sm:$0xff] %v8107_v21  ;;  %v3538_v36 = vmul.f32 %v8125_v25, %v7905_v3  ;;  %v3539_v27 = vmul.f32 %v8125_v25, %v7907_v18  ;;  %v8132_v19 = vmul.f32 %v5161_v35, %v7866_v44  ;;  %v8140_v9 = vld [vmem:[#allocation2 + $0x112] sm:$0xff]  ;;  %v8176_v55 = vld [vmem:[%s9606_s5 + $0x23] ss:$0 sm:$0xff]  ;;  %v1294_v31 = vadd.f32 1.0, %v8057_v10 }
 0x21b   : > { %10089 = vst [vmem:[#allocation35_spill] sm:$0xff] %v8110_v28  ;;  %10090 = vst [vmem:[#allocation3_spill] sm:$0xff] %v8114_v59  ;;  %v8138_v29 = vmul.f32 %v5163_v54, %v7913_v52  ;;  %4967 = vrcp.f32 %v4160_v38  ;;  %v3639_v22 = vmul.f32 %v8145_v58, %v7928_v60  ;;  %v4528_v38 = vmul.f32 -1.442695, %v8107_v21  ;;  %v8186_v21 = vld [vmem:[%s9606_s5 + $0x24] ss:$0 sm:$0xff] }
 0x21c   : > { %4648 = vst.msk [vmem:[%s5633_s8 + $0x138] sm:$0xff] %vm497_vm1, %v4236_v26  ;;  %10091 = vst [vmem:[#allocation138_spill] sm:$0xff] %v8120_v42  ;;  %v5162_v26 = vld [vmem:[#allocation2 + $0x1d1] sm:$0xff]  ;;  %v3570_v24 = vadd.f32 %v3538_v36, %v3467_v32  ;;  %v3571_v7 = vadd.f32 %v3539_v27, %v3468_v62  ;;  %v8156_v32 = vadd.f32 %v10062_v48, %v744_v47  ;;  %v8161_v62 = vld [vmem:[%s9606_s5 + $0x22] ss:$0 sm:$0xff] }
 0x21d   : > { %10092 = vst [vmem:[#allocation141_spill] sm:$0xff] %v8125_v25  ;;  %10093 = vst [vmem:[#allocation133_spill] sm:$0xff] %v8132_v19  ;;  %v8135_v50 = vmul.f32 %v5162_v26, %v7888_v16  ;;  %v1823_v19 = vmul.f32 %v7993_v4, %v8118_v8  ;;  %v3741_v36 = vmul.f32 %v8161_v62, %v7926_v23 }
 0x21e   : > { %10095 = vst [vmem:[#allocation143_spill] sm:$0xff] %v8138_v29  ;;  %10096 = vst [vmem:[#allocation144_spill] sm:$0xff] %v8145_v58  ;;  %v4560_v29 = vmul.f32 -1.442695, %v8110_v28  ;;  %v3671_v27 = vadd.f32 %v3639_v22, %v3570_v24  ;;  %v3740_v34 = vmul.f32 %v8161_v62, %v7938_v17  ;;  %v1924_v42 = vmul.f32 %v8000_v14, %v8140_v9 }
 0x21f   : > { %10094 = vst [vmem:[#allocation142_spill] sm:$0xff] %v8135_v50  ;;  %v3640_v50 = vmul.f32 %v8145_v58, %v7930_v40  ;;  %10097 = vst [vmem:[#allocation145_spill] sm:$0xff] %v8161_v62  ;;  %v2328_v48 = vmul.f32 %v8053_v63, %v8118_v8  ;;  %v2429_v47 = vmul.f32 %v8068_v2, %v8140_v9  ;;  %v934_v28 = vadd.f32 1.0, %v8039_v45 }
 0x220   : > { %v3772_v24 = vadd.f32 %v3740_v34, %v3671_v27  ;;  %v3841_v22 = vmul.f32 %v8176_v55, %v7950_v33  ;;  %10098 = vst [vmem:[#allocation146_spill] sm:$0xff] %v8186_v21  ;;  %v3943_v2 = vmul.f32 %v8186_v21, %v8140_v9  ;;  %v933_v63 = vadd.f32 1.0, %v4962_v41 }
 0x221   : > { %v3672_v59 = vadd.f32 %v3640_v50, %v3571_v7  ;;  %v3842_v50 = vmul.f32 %v8176_v55, %v8118_v8  ;;  %v1855_v12 = vadd.f32 %v1823_v19, %v8015_v57  ;;  %v4964_v34 = vpop.eup %4963  ;;  %v3942_v27 = vmul.f32 %v8186_v21, %v7952_v56 }
 0x222   : > { %4969 = vrcp.f32 %v934_v28  ;;  %v2832_v45 = vmul.f32 %v8077_v46, %v8118_v8  ;;  %v2360_v4 = vadd.f32 %v2328_v48, %v8048_v61  ;;  %v4527_v57 = vmul.f32 -1.442695, %v8156_v32  ;;  %v8209_v61 = vld [vmem:[%s9607_s6] ss:$0 sm:$0xff] }
 0x223   : > { %v3773_v7 = vadd.f32 %v3741_v36, %v3672_v59  ;;  %v3873_v59 = vadd.f32 %v3841_v22, %v3772_v24  ;;  %4971 = vrcp.f32 %v1294_v31  ;;  %v8196_v14 = vadd.f32 %v1924_v42, %v1855_v12  ;;  %v5171_v22 = vld [vmem:[#allocation2 + $0x8e] sm:$0xff] }
 0x224   : > { %4973 = vrcp.f32 %v933_v63  ;;  %v2933_v19 = vmul.f32 %v8096_v43, %v8140_v9  ;;  %v2864_v28 = vadd.f32 %v2832_v45, %v8072_v30  ;;  %v1293_v24 = vadd.f32 1.0, %v4964_v34  ;;  %v1466_v45 = vld [vmem:[#allocation2 + $0x6] sm:$0xff] }
 0x225   : > { %v3874_v36 = vadd.f32 %v3842_v50, %v3773_v7  ;;  %v3974_v33 = vadd.f32 %v3942_v27, %v3873_v59  ;;  %v4966_v41 = vpop.eup %4965  ;;  %v8202_v50 = vadd.f32 %v2429_v47, %v2360_v4  ;;  %4975 = vpow2.f32 %v4528_v38  ;;  %v10105_v47 = vld [vmem:[#allocation15_spill] sm:$0xff] }
 0x226   : > { %v4255_v12 = vmul.f32 %v4966_v41, %v7871_v1  ;;  %v8218_v4 = vmul.f32 %v8161_v62, %v5161_v35  ;;  %v8221_v30 = vmul.f32 %v8176_v55, %v5162_v26  ;;  %v8223_v31 = vadd.f32 %v2933_v19, %v2864_v28  ;;  %v8235_v35 = vld [vmem:[%s9606_s5 + $0x18] ss:$0 sm:$0xff]  ;;  %v5170_v26 = vld [vmem:[#allocation2 + $0x86] sm:$0xff]  ;;  %v1568_v28 = vld [vmem:[#allocation2 + $0xf] sm:$0xff] }
 0x227   : > { %v3975_v10 = vadd.f32 %v3943_v2, %v3874_v36  ;;  %v8212_v2 = vadd.f32 %v8209_v61, %v3974_v33  ;;  %4977 = vrcp.f32 %v1293_v24  ;;  %v8226_v42 = vmul.f32 %v8186_v21, %v5163_v54  ;;  %10103 = vst [vmem:[#allocation151_spill] sm:$0xff] %v8235_v35  ;;  %v5173_v36 = vld [vmem:[#allocation2 + $0x8f] sm:$0xff] }
 0x228   : > { %10099 = vst [vmem:[#allocation147_spill] sm:$0xff] %v8218_v4  ;;  %10100 = vst [vmem:[#allocation148_spill] sm:$0xff] %v8221_v30  ;;  %v4968_v1 = vpop.eup %4967  ;;  %4979 = vpow2.f32 %v4560_v29  ;;  %v8238_v38 = vmul.f32 %v5170_v26, %v8235_v35  ;;  %v2951_v54 = vmul.f32 %v8096_v43, %v10105_v47  ;;  %v8244_v34 = vmul.f32 %v5171_v22, %v8235_v35  ;;  %v5172_v29 = vld [vmem:[#allocation2 + $0x87] sm:$0xff] }
 0x229   : > { %v8215_v63 = vadd.f32 %v8209_v61, %v3975_v10  ;;  %10101 = vst [vmem:[#allocation149_spill] sm:$0xff] %v8223_v31  ;;  %10102 = vst [vmem:[#allocation150_spill] sm:$0xff] %v8226_v42  ;;  %v4617_v33 = vmul.f32 -1.442695, %v8212_v2  ;;  %v4256_v7 = vmul.f32 %v4968_v1, %v7874_v6  ;;  %4981 = vpow2.f32 %v4527_v57  ;;  %v1567_v10 = vld [vmem:[#allocation2 + $0x7] sm:$0xff] }
 0x22a   : > { %4667 = vst.msk [vmem:[%s5633_s8 + $0x1d0] sm:$0xff] %vm497_vm1, %v4255_v12  ;;  %10104 = vst [vmem:[#allocation152_spill] sm:$0xff] %v8238_v38  ;;  %v8247_v59 = vmul.f32 %v5172_v29, %v7413_v37  ;;  %v8250_v27 = vmul.f32 %v5173_v36, %v7413_v37  ;;  %v5174_v41 = vld [vmem:[#allocation2 + $0x88] sm:$0xff]  ;;  %v3033_v6 = vmul.f32 %v8235_v35, %v7905_v3 }
 0x22b   : > { %v4618_v48 = vmul.f32 -1.442695, %v8215_v63  ;;  %10106 = vst [vmem:[#allocation15_spill] sm:$0xff] %v8244_v34  ;;  %4983 = vpow2.f32 %v4617_v33  ;;  %v8253_v19 = vmul.f32 %v5174_v41, %v7866_v44  ;;  %4668 = vst.msk [vmem:[%s5633_s8 + $0x1d8] sm:$0xff] %vm497_vm1, %v4256_v7  ;;  %v1467_v57 = vld [vmem:[#allocation2 + $0xe] sm:$0xff]  ;;  %v8260_v24 = vadd.f32 %v2951_v54, %v7777_v11 }
 0x22c   : > { %10107 = vst [vmem:[#allocation153_spill] sm:$0xff] %v8247_v59  ;;  %10108 = vst [vmem:[#allocation154_spill] sm:$0xff] %v8250_v27  ;;  %v5175_v37 = vld [vmem:[#allocation2 + $0x89] sm:$0xff]  ;;  %v8269_v42 = vmul.f32 %v5170_v26, %v8125_v25  ;;  %v3034_v3 = vmul.f32 %v8235_v35, %v7907_v18  ;;  %v1503_v54 = vmul.f32 %v7944_v15, %v1466_v45 }
 0x22d   : > { %10109 = vst [vmem:[#allocation155_spill] sm:$0xff] %v8253_v19  ;;  %4985 = vpow2.f32 %v4618_v48  ;;  %10110 = vst [vmem:[#allocation156_spill] sm:$0xff] %v8260_v24  ;;  %v8263_v12 = vmul.f32 %v5175_v37, %v7888_v16  ;;  %v5176_v1 = vld [vmem:[#allocation2 + $0x8a] sm:$0xff]  ;;  %v8274_v48 = vmul.f32 %v5171_v22, %v8125_v25  ;;  %v1604_v30 = vmul.f32 %v7966_v13, %v1567_v10 }
 0x22e   : > { %v8266_v33 = vmul.f32 %v5176_v1, %v7913_v52  ;;  %10113 = vst [vmem:[#allocation159_spill] sm:$0xff] %v8269_v42  ;;  %v10115_v7 = vld [vmem:[#allocation137_spill] sm:$0xff]  ;;  %v8280_v4 = vmul.f32 %v5172_v29, %v8145_v58  ;;  %v3066_v24 = vadd.f32 %v3034_v3, %v7836_v53  ;;  %v1504_v26 = vmul.f32 %v7944_v15, %v1467_v57  ;;  %v8297_v29 = vld [vmem:[%s9606_s5 + $0x19] ss:$0 sm:$0xff]  ;;  %v10154_v27 = vld [vmem:[#allocation4_spill] sm:$0xff] }
 0x22f   : > { %10111 = vst [vmem:[#allocation157_spill] sm:$0xff] %v8263_v12  ;;  %10114 = vst [vmem:[#allocation160_spill] sm:$0xff] %v8274_v48  ;;  %v3065_v11 = vadd.f32 %v3033_v6, %v10115_v7  ;;  %v4970_v12 = vpop.eup %4969  ;;  %v8286_v18 = vmul.f32 %v5173_v36, %v8145_v58  ;;  %v8289_v22 = vmul.f32 %v5174_v41, %v8161_v62  ;;  %v5178_v36 = vld [vmem:[#allocation2 + $0x1c6] sm:$0xff] }
 0x230   : > { %10112 = vst [vmem:[#allocation158_spill] sm:$0xff] %v8266_v33  ;;  %10116 = vst [vmem:[#allocation137_spill] sm:$0xff] %v8280_v4  ;;  %v1605_v33 = vmul.f32 %v7966_v13, %v1568_v28  ;;  %v8292_v45 = vmul.f32 %v5175_v37, %v8176_v55  ;;  %v3134_v53 = vmul.f32 %v8297_v29, %v7928_v60  ;;  %v4972_v10 = vpop.eup %4971  ;;  %v1668_v28 = vld [vmem:[#allocation2 + $0x8] sm:$0xff]  ;;  %v1669_v60 = vld [vmem:[#allocation2 + $0x10] sm:$0xff] }
 0x231   : > { %10117 = vst [vmem:[#allocation161_spill] sm:$0xff] %v8286_v18  ;;  %10118 = vst [vmem:[#allocation162_spill] sm:$0xff] %v8289_v22  ;;  %v8302_v6 = vmul.f32 %v5176_v1, %v8186_v21  ;;  %v8305_v41 = vmul.f32 %v5178_v36, %v8235_v35  ;;  %v3135_v57 = vmul.f32 %v8297_v29, %v7930_v40  ;;  %v4974_v3 = vpop.eup %4973 }
 0x232   : > { %10119 = vst [vmem:[#allocation163_spill] sm:$0xff] %v8292_v45  ;;  %10120 = vst [vmem:[#allocation164_spill] sm:$0xff] %v8297_v29  ;;  %v1030_v37 = vmul.f32 %v4970_v12, %v10058_v39  ;;  %v3456_v7 = vmul.f32 %v7913_v52, %v10105_v47  ;;  %v3166_v45 = vadd.f32 %v3134_v53, %v3065_v11  ;;  %v4976_v40 = vpop.eup %4975  ;;  %v1769_v53 = vld [vmem:[#allocation2 + $0x9] sm:$0xff] }
 0x233   : > { %10121 = vst [vmem:[#allocation165_spill] sm:$0xff] %v8302_v6  ;;  %10122 = vst [vmem:[#allocation166_spill] sm:$0xff] %v8305_v41  ;;  %v1636_v22 = vadd.f32 %v1604_v30, %v1503_v54  ;;  %v1306_v1 = vmul.f32 %v4972_v10, %v10061_v49  ;;  %v5179_v6 = vld [vmem:[#allocation2 + $0x1ce] sm:$0xff]  ;;  %v3167_v41 = vadd.f32 %v3135_v57, %v3066_v24 }
 0x234   : > { %v8314_v18 = vmul.f32 %v5179_v6, %v8235_v35  ;;  %v1637_v4 = vadd.f32 %v1605_v33, %v1504_v26  ;;  %1144 = vst.msk [vmem:[#allocation2 + $0x130] sm:$0xff] %vm497_vm1, %v1030_v37  ;;  %4276 = vst.msk [vmem:[%s5633_s8 + $0x78] sm:$0xff] %vm497_vm1, %v1030_v37  ;;  %v1029_v39 = vmul.f32 %v4974_v3, %v7877_v51  ;;  %v4978_v11 = vpop.eup %4977  ;;  %v5180_v24 = vld [vmem:[#allocation2 + $0x1c7] sm:$0xff]  ;;  %v5181_v54 = vld [vmem:[#allocation2 + $0x1cf] sm:$0xff] }
 0x235   : > { %v3235_v47 = vmul.f32 %v7866_v44, %v7938_v17  ;;  %v1705_v30 = vmul.f32 %v7959_v5, %v1668_v28  ;;  %v1311_v49 = vmul.f32 0.0, %v1306_v1  ;;  %v8324_v12 = vadd.f32 %v3456_v7, %v7797_v0  ;;  %v4980_v0 = vpop.eup %4979  ;;  %v5182_v10 = vld [vmem:[#allocation2 + $0x1c8] sm:$0xff]  ;;  %v1770_v28 = vld [vmem:[#allocation2 + $0x11] sm:$0xff] }
 0x236   : > { %10123 = vst [vmem:[#allocation167_spill] sm:$0xff] %v8314_v18  ;;  %v8327_v33 = vmul.f32 %v5180_v24, %v8297_v29  ;;  %v8330_v26 = vmul.f32 %v5181_v54, %v8297_v29  ;;  %v3236_v51 = vmul.f32 %v7866_v44, %v7926_v23  ;;  %v1706_v17 = vmul.f32 %v7959_v5, %v1669_v60  ;;  %v4982_v23 = vpop.eup %4981  ;;  %v8343_v1 = vld [vmem:[#allocation2 + $0x1c9] sm:$0xff] }
 0x237   : > { %10124 = vst [vmem:[#allocation168_spill] sm:$0xff] %v8324_v12  ;;  %1143 = vst.msk [vmem:[#allocation2 + $0x128] sm:$0xff] %vm497_vm1, %v1029_v39  ;;  %v8339_v57 = vmul.f32 %v5182_v10, %v7866_v44  ;;  %v3267_v37 = vadd.f32 %v3235_v47, %v3166_v45  ;;  %v1737_v3 = vadd.f32 %v1705_v30, %v1636_v22 }
 0x238   : > { %10125 = vst [vmem:[#allocation169_spill] sm:$0xff] %v8327_v33  ;;  %10126 = vst [vmem:[#allocation170_spill] sm:$0xff] %v8330_v26  ;;  %v1305_v7 = vmul.f32 %v4978_v11, %v7900_v20  ;;  %v8347_v60 = vmul.f32 %v8343_v1, %v7888_v16  ;;  %v1738_v45 = vadd.f32 %v1706_v17, %v1637_v4  ;;  %v4984_v22 = vpop.eup %4983  ;;  %v10132_v20 = vld [vmem:[#allocation130_spill] sm:$0xff] }
 0x239   : > { %4275 = vst.msk [vmem:[%s5633_s8 + $0x70] sm:$0xff] %vm497_vm1, %v1029_v39  ;;  %10127 = vst [vmem:[#allocation171_spill] sm:$0xff] %v8339_v57  ;;  %v8349_v39 = vld [vmem:[#allocation2 + $0x1ca] sm:$0xff]  ;;  %v3268_v57 = vadd.f32 %v3236_v51, %v3167_v41  ;;  %v8356_v47 = vmul.f32 %v5178_v36, %v8125_v25  ;;  %v3336_v30 = vmul.f32 %v7888_v16, %v10132_v20  ;;  %v4141_v12 = vadd.f32 1.0, %v4984_v22  ;;  %v1871_v41 = vld [vmem:[#allocation2 + $0x12] sm:$0xff] }
 0x23a   : > { %1315 = vst.msk [vmem:[#allocation2 + $0x30] sm:$0xff] %vm497_vm1, %v1311_v49  ;;  %10128 = vst [vmem:[#allocation172_spill] sm:$0xff] %v8347_v60  ;;  %v8353_v44 = vmul.f32 %v8349_v39, %v7913_v52  ;;  %v10133_v49 = vld [vmem:[#allocation109_spill] sm:$0xff]  ;;  %v1310_v26 = vmul.f32 0.0, %v1305_v7  ;;  %v4986_v33 = vpop.eup %4985  ;;  %v3337_v60 = vmul.f32 %v7888_v16, %v8118_v8  ;;  %v935_v7 = vadd.f32 1.0, %v4982_v23 }
 0x23b   : > { %10129 = vst [vmem:[#allocation173_spill] sm:$0xff] %v8349_v39  ;;  %10131 = vst [vmem:[#allocation175_spill] sm:$0xff] %v8356_v47  ;;  %v1806_v11 = vmul.f32 %v10133_v49, %v1769_v53  ;;  %v1807_v18 = vmul.f32 %v10133_v49, %v1770_v28  ;;  %v3368_v4 = vadd.f32 %v3336_v30, %v3267_v37  ;;  %v4142_v51 = vadd.f32 1.0, %v4986_v33  ;;  %v1870_v36 = vld [vmem:[#allocation2 + $0xa] sm:$0xff]  ;;  %v10148_v30 = vld [vmem:[#allocation135_spill] sm:$0xff] }
 0x23c   : > { %10130 = vst [vmem:[#allocation174_spill] sm:$0xff] %v8353_v44  ;;  %v936_v44 = vadd.f32 1.0, %v4976_v40  ;;  %1314 = vst.msk [vmem:[#allocation2 + $0x28] sm:$0xff] %vm497_vm1, %v1310_v26  ;;  %v1441_v47 = vadd.f32 1.0, %v4980_v0  ;;  %4987 = vrcp.f32 %v4141_v12  ;;  %v3369_v20 = vadd.f32 %v3337_v60, %v3268_v57  ;;  %v8373_v40 = vld [vmem:[#allocation2 + $0x130] sm:$0xff]  ;;  %v10137_v26 = vld [vmem:[#allocation140_spill] sm:$0xff] }
 0x23d   : > { %v1838_v17 = vadd.f32 %v1806_v11, %v1737_v3  ;;  %v1839_v53 = vadd.f32 %v1807_v18, %v1738_v45  ;;  %v8366_v48 = vmul.f32 %v5179_v6, %v8125_v25  ;;  %v8369_v16 = vmul.f32 %v5180_v24, %v8145_v58  ;;  %10136 = vst [vmem:[#allocation176_spill] sm:$0xff] %v8373_v40  ;;  %v8379_v0 = vld [vmem:[#allocation2 + $0x131] sm:$0xff] }
 0x23e   : > { %v3437_v8 = vmul.f32 %v7913_v52, %v7952_v56  ;;  %4989 = vrcp.f32 %v4142_v51  ;;  %v3438_v33 = vmul.f32 %v7913_v52, %v8140_v9  ;;  %v1908_v12 = vmul.f32 %v10137_v26, %v1871_v41  ;;  %10138 = vst [vmem:[#allocation140_spill] sm:$0xff] %v8379_v0  ;;  %v8381_v6 = vld [vmem:[#allocation2 + $0x132] sm:$0xff]  ;;  %v8383_v57 = vld [vmem:[#allocation2 + $0x126] sm:$0xff] }
 0x23f   : > { %10134 = vst [vmem:[#allocation130_spill] sm:$0xff] %v8366_v48  ;;  %10135 = vst [vmem:[#allocation109_spill] sm:$0xff] %v8369_v16  ;;  %v1907_v18 = vmul.f32 %v10137_v26, %v1870_v36  ;;  %4991 = vrcp.f32 %v936_v44  ;;  %v8386_v24 = vmul.f32 %v5181_v54, %v8145_v58  ;;  %v8389_v56 = vmul.f32 %v5182_v10, %v8161_v62  ;;  %v8393_v52 = vld [vmem:[#allocation2 + $0x12e] sm:$0xff]  ;;  %v10153_v48 = vld [vmem:[#allocation39_spill] sm:$0xff] }
 0x240   : > { %10139 = vst [vmem:[#allocation177_spill] sm:$0xff] %v8381_v6  ;;  %10140 = vst [vmem:[#allocation178_spill] sm:$0xff] %v8383_v57  ;;  %v8391_v28 = vadd.f32 %v3437_v8, %v3368_v4  ;;  %v8395_v9 = vld [vmem:[#allocation2 + $0x127] sm:$0xff]  ;;  %v8397_v37 = vld [vmem:[#allocation2 + $0x12f] sm:$0xff]  ;;  %4993 = vrcp.f32 %v1441_v47  ;;  %v8401_v23 = vadd.f32 %v3438_v33, %v3369_v20  ;;  %v8403_v60 = vadd.f32 %v1908_v12, %v1839_v53 }
 0x241   : > { %10141 = vst [vmem:[#allocation179_spill] sm:$0xff] %v8386_v24  ;;  %10142 = vst [vmem:[#allocation180_spill] sm:$0xff] %v8389_v56  ;;  %v8399_v3 = vadd.f32 %v1907_v18, %v1838_v17  ;;  %4995 = vrcp.f32 %v935_v7  ;;  %v1724_v54 = vmul.f32 %v7959_v5, %v8373_v40  ;;  %v8409_v10 = vmul.f32 %v10133_v49, %v8379_v0  ;;  %v8417_v22 = vld [vmem:[#allocation2 + $0x128] sm:$0xff] }
 0x242   : > { %10143 = vst [vmem:[#allocation181_spill] sm:$0xff] %v8393_v52  ;;  %10144 = vst [vmem:[#allocation182_spill] sm:$0xff] %v8395_v9  ;;  %v8413_v44 = vmul.f32 %v10137_v26, %v8381_v6  ;;  %v1521_v45 = vmul.f32 %v7944_v15, %v8383_v57  ;;  %v8419_v47 = vld [vmem:[#allocation2 + $0x129] sm:$0xff]  ;;  %v2229_v11 = vmul.f32 %v10148_v30, %v8373_v40 }
 0x243   : > { %10145 = vst [vmem:[#allocation183_spill] sm:$0xff] %v8397_v37  ;;  %10146 = vst [vmem:[#allocation184_spill] sm:$0xff] %v8417_v22  ;;  %v1522_v41 = vmul.f32 %v7944_v15, %v8393_v52  ;;  %v1622_v4 = vmul.f32 %v7966_v13, %v8395_v9  ;;  %v1623_v51 = vmul.f32 %v7966_v13, %v8397_v37  ;;  %v10149_v17 = vld [vmem:[#allocation32_spill] sm:$0xff] }
 0x244   : > { %10147 = vst [vmem:[#allocation185_spill] sm:$0xff] %v8419_v47  ;;  %v8431_v36 = vmul.f32 %v10149_v17, %v8379_v0  ;;  %v10150_v20 = vld [vmem:[#allocation136_spill] sm:$0xff]  ;;  %v1723_v24 = vmul.f32 %v7959_v5, %v8417_v22  ;;  %v1824_v16 = vmul.f32 %v10133_v49, %v8419_v47  ;;  %v2127_v59 = vmul.f32 %v10154_v27, %v8395_v9 }
 0x245   : > { %v2733_v53 = vmul.f32 %v10150_v20, %v8373_v40  ;;  %v8435_v7 = vld [vmem:[#allocation2 + $0x12a] sm:$0xff]  ;;  %v1654_v18 = vadd.f32 %v1622_v4, %v1521_v45  ;;  %v1655_v56 = vadd.f32 %v1623_v51, %v1522_v41  ;;  %v2128_v34 = vmul.f32 %v10154_v27, %v8397_v37 }
 0x246   : > { %10151 = vst [vmem:[#allocation135_spill] sm:$0xff] %v8435_v7  ;;  %v10152_v8 = vld [vmem:[#allocation108_spill] sm:$0xff]  ;;  %v1925_v45 = vmul.f32 %v10137_v26, %v8435_v7  ;;  %v10155_v41 = vld [vmem:[#allocation77_spill] sm:$0xff] }
 0x247   : > { %v2026_v33 = vmul.f32 %v10152_v8, %v8383_v57  ;;  %v2027_v12 = vmul.f32 %v10152_v8, %v8393_v52  ;;  %v1755_v38 = vadd.f32 %v1723_v24, %v1654_v18  ;;  %v8451_v29 = vadd.f32 %v1724_v54, %v1655_v56  ;;  %v10156_v56 = vld [vmem:[#allocation89_spill] sm:$0xff] }
 0x248   : > { %v2530_v4 = vmul.f32 %v10155_v41, %v8383_v57  ;;  %v2329_v24 = vmul.f32 %v10149_v17, %v8419_v47 }
 0x249   : > { %v2058_v42 = vadd.f32 %v2026_v33, %v10153_v48  ;;  %v2059_v19 = vadd.f32 %v2027_v12, %v8196_v14  ;;  %v2228_v14 = vmul.f32 %v10148_v30, %v8417_v22  ;;  %v2531_v48 = vmul.f32 %v10155_v41, %v8393_v52  ;;  %v10157_v12 = vld [vmem:[#allocation16_spill] sm:$0xff]  ;;  %v4988_v35 = vpop.eup %4987 }
 0x24a   : > { %v1856_v33 = vadd.f32 %v1824_v16, %v1755_v38  ;;  %v2562_v54 = vadd.f32 %v2530_v4, %v10156_v56  ;;  %v2631_v18 = vmul.f32 %v10157_v12, %v8395_v9  ;;  %v4237_v38 = vmul.f32 %v4988_v35, %v8212_v2 }
 0x24b   : > { %v2159_v51 = vadd.f32 %v2127_v59, %v2058_v42  ;;  %v2160_v31 = vadd.f32 %v2128_v34, %v2059_v19  ;;  %v2563_v34 = vadd.f32 %v2531_v48, %v8202_v50  ;;  %v2632_v59 = vmul.f32 %v10157_v12, %v8397_v37  ;;  %v4990_v19 = vpop.eup %4989  ;;  %v10159_v50 = vld [vmem:[#allocation17_spill] sm:$0xff] }
 0x24c   : > { %v8472_v16 = vadd.f32 %v1925_v45, %v1856_v33  ;;  %v2663_v41 = vadd.f32 %v2631_v18, %v2562_v54  ;;  %v2732_v4 = vmul.f32 %v10150_v20, %v8417_v22  ;;  %v8476_v56 = vpop.eup %4991  ;;  %4649 = vst.msk [vmem:[%s5633_s8 + $0x140] sm:$0xff] %vm497_vm1, %v4237_v38  ;;  %v8487_v2 = vmul.f32 %v10159_v50, %v8381_v6  ;;  %v1671_v20 = vld [vmem:[#allocation2 + $0x30] sm:$0xff] }
 0x24d   : > { %v2260_v39 = vadd.f32 %v2228_v14, %v2159_v51  ;;  %v8466_v42 = vadd.f32 %v2229_v11, %v2160_v31  ;;  %v4238_v31 = vmul.f32 %v4990_v19, %v8215_v63  ;;  %v2430_v51 = vmul.f32 %v10159_v50, %v8435_v7  ;;  %v8481_v48 = vpop.eup %4993  ;;  %v1772_v45 = vld [vmem:[#allocation2 + $0x31] sm:$0xff] }
 0x24e   : > { %10158 = vst [vmem:[#allocation32_spill] sm:$0xff] %v8472_v16  ;;  %v2664_v14 = vadd.f32 %v2632_v59, %v2563_v34  ;;  %v8491_v35 = vmul.f32 %v8077_v46, %v8379_v0  ;;  %v2764_v63 = vadd.f32 %v2732_v4, %v2663_v41  ;;  %v8495_v33 = vpop.eup %4995  ;;  %v3743_v54 = vmul.f32 %v8161_v62, %v8373_v40  ;;  %v1873_v12 = vld [vmem:[#allocation2 + $0x32] sm:$0xff] }
 0x24f   : > { %v2361_v11 = vadd.f32 %v2329_v24, %v2260_v39  ;;  %v2833_v39 = vmul.f32 %v8077_v46, %v8419_v47  ;;  %4650 = vst.msk [vmem:[%s5633_s8 + $0x148] sm:$0xff] %vm497_vm1, %v4238_v31  ;;  %v8501_v24 = vmul.f32 %v8096_v43, %v8381_v6  ;;  %v3844_v59 = vmul.f32 %v8176_v55, %v8379_v0 }
 0x250   : > { %v8507_v34 = vadd.f32 %v2733_v53, %v2664_v14  ;;  %v3945_v46 = vmul.f32 %v8186_v21, %v8381_v6  ;;  %v2934_v38 = vmul.f32 %v8096_v43, %v8435_v7  ;;  %v1708_v41 = vmul.f32 %v7959_v5, %v1671_v20 }
 0x251   : > { %10160 = vst [vmem:[#allocation136_spill] sm:$0xff] %v8501_v24  ;;  %v8505_v18 = vadd.f32 %v2430_v51, %v2361_v11  ;;  %v2865_v19 = vadd.f32 %v2833_v39, %v2764_v63  ;;  %v1809_v4 = vmul.f32 %v10133_v49, %v1772_v45  ;;  %v3540_v31 = vmul.f32 %v8125_v25, %v8383_v57  ;;  %v1468_v11 = vld [vmem:[#allocation2 + $0x26] sm:$0xff]  ;;  %v1469_v51 = vld [vmem:[#allocation2 + $0x2e] sm:$0xff] }
 0x252   : > { %v3541_v53 = vmul.f32 %v8125_v25, %v8393_v52  ;;  %v1910_v14 = vmul.f32 %v10137_v26, %v1873_v12  ;;  %v8524_v63 = vmul.f32 %v10149_v17, %v1772_v45  ;;  %v1569_v39 = vld [vmem:[#allocation2 + $0x27] sm:$0xff]  ;;  %v3641_v0 = vmul.f32 %v8145_v58, %v8395_v9  ;;  %v1570_v52 = vld [vmem:[#allocation2 + $0x2f] sm:$0xff] }
 0x253   : > { %10161 = vst [vmem:[#allocation108_spill] sm:$0xff] %v8505_v18  ;;  %v2213_v18 = vmul.f32 %v10148_v30, %v1671_v20  ;;  %v8526_v43 = vadd.f32 %v2934_v38, %v2865_v19  ;;  %v3572_v16 = vadd.f32 %v3540_v31, %v8391_v28  ;;  %v3642_v40 = vmul.f32 %v8145_v58, %v8397_v37  ;;  %v1670_v57 = vld [vmem:[#allocation2 + $0x28] sm:$0xff] }
 0x254   : > { %v3573_v6 = vadd.f32 %v3541_v53, %v8401_v23  ;;  %v1771_v25 = vld [vmem:[#allocation2 + $0x29] sm:$0xff]  ;;  %v8535_v20 = vmul.f32 %v10159_v50, %v1873_v12  ;;  %v3742_v45 = vmul.f32 %v8161_v62, %v8417_v22  ;;  %v1505_v19 = vmul.f32 %v7944_v15, %v1468_v11 }
 0x255   : > { %10162 = vst [vmem:[#allocation39_spill] sm:$0xff] %v8526_v43  ;;  %v1506_v28 = vmul.f32 %v7944_v15, %v1469_v51  ;;  %v1872_v23 = vld [vmem:[#allocation2 + $0x2a] sm:$0xff]  ;;  %v3673_v38 = vadd.f32 %v3641_v0, %v3572_v16  ;;  %v3843_v53 = vmul.f32 %v8176_v55, %v8419_v47  ;;  %v1606_v43 = vmul.f32 %v7966_v13, %v1569_v39 }
 0x256   : > { %v3674_v31 = vadd.f32 %v3642_v40, %v3573_v6  ;;  %v3944_v37 = vmul.f32 %v8186_v21, %v8435_v7  ;;  %v1607_v12 = vmul.f32 %v7966_v13, %v1570_v52  ;;  %v1707_v9 = vmul.f32 %v7959_v5, %v1670_v57 }
 0x257   : > { %v1808_v22 = vmul.f32 %v10133_v49, %v1771_v25  ;;  %v3774_v58 = vadd.f32 %v3742_v45, %v3673_v38  ;;  %v1638_v15 = vadd.f32 %v1606_v43, %v1505_v19  ;;  %v1909_v0 = vmul.f32 %v10137_v26, %v1872_v23 }
 0x258   : > { %v3775_v24 = vadd.f32 %v3743_v54, %v3674_v31  ;;  %v1639_v40 = vadd.f32 %v1607_v12, %v1506_v28  ;;  %v2010_v6 = vmul.f32 %v10152_v8, %v1468_v11  ;;  %v2011_v16 = vmul.f32 %v10152_v8, %v1469_v51  ;;  %v10169_v28 = vld [vmem:[#allocation34_spill] sm:$0xff] }
 0x259   : > { %v2111_v47 = vmul.f32 %v10154_v27, %v1569_v39  ;;  %v3875_v62 = vadd.f32 %v3843_v53, %v3774_v58  ;;  %v1739_v21 = vadd.f32 %v1707_v9, %v1638_v15  ;;  %v2112_v13 = vmul.f32 %v10154_v27, %v1570_v52  ;;  %v10171_v31 = vld [vmem:[#allocation6_spill] sm:$0xff]  ;;  %v10173_v15 = vld [vmem:[#allocation40_spill] sm:$0xff] }
 0x25a   : > { %v3876_v7 = vadd.f32 %v3844_v59, %v3775_v24  ;;  %v1740_v5 = vadd.f32 %v1708_v41, %v1639_v40  ;;  %v2042_v49 = vadd.f32 %v2010_v6, %v8399_v3  ;;  %v2043_v54 = vadd.f32 %v2011_v16, %v8403_v60  ;;  %v10163_v60 = vld [vmem:[#allocation87_spill] sm:$0xff]  ;;  %v10172_v53 = vld [vmem:[#allocation38_spill] sm:$0xff]  ;;  %v4755_v40 = vpop.f32.mrf.mxu0  ;;  %v10175_v6 = vld [vmem:[#allocation173_spill] sm:$0xff] }
 0x25b   : > { %v2212_v43 = vmul.f32 %v10148_v30, %v1670_v57  ;;  %v3976_v26 = vadd.f32 %v3944_v37, %v3875_v62  ;;  %v1840_v19 = vadd.f32 %v1808_v22, %v1739_v21  ;;  %v2313_v11 = vmul.f32 %v10149_v17, %v1771_v25  ;;  %v10164_v25 = vld [vmem:[#allocation35_spill] sm:$0xff]  ;;  %v10165_v17 = vld [vmem:[#allocation29_spill] sm:$0xff] }
 0x25c   : > { %v3977_v45 = vadd.f32 %v3945_v46, %v3876_v7  ;;  %v1841_v8 = vadd.f32 %v1809_v4, %v1740_v5  ;;  %v2143_v51 = vadd.f32 %v2111_v47, %v2042_v49  ;;  %v2144_v58 = vadd.f32 %v2112_v13, %v2043_v54  ;;  %v10167_v46 = vld [vmem:[#allocation31_spill] sm:$0xff]  ;;  %v10177_v13 = vld [vmem:[#allocation145_spill] sm:$0xff]  ;;  %v10179_v49 = vld [vmem:[#allocation136_spill] sm:$0xff] }
 0x25d   : > { %v2414_v9 = vmul.f32 %v10159_v50, %v1872_v23  ;;  %v8560_v27 = vadd.f32 %v8209_v61, %v3976_v26  ;;  %v1941_v3 = vadd.f32 %v1909_v0, %v1840_v19  ;;  %v1032_v62 = vmul.f32 %v8476_v56, %v10163_v60  ;;  %v10166_v50 = vld [vmem:[#allocation30_spill] sm:$0xff]  ;;  %v10180_v54 = vld [vmem:[#allocation7_spill] sm:$0xff]  ;;  %v10181_v26 = vld [vmem:[#allocation41_spill] sm:$0xff] }
 0x25e   : > { %v8563_v52 = vadd.f32 %v8209_v61, %v3977_v45  ;;  %v1942_v57 = vadd.f32 %v1910_v14, %v1841_v8  ;;  %v2244_v21 = vadd.f32 %v2212_v43, %v2143_v51  ;;  %v2245_v37 = vadd.f32 %v2213_v18, %v2144_v58  ;;  %v10182_v19 = vld [vmem:[#allocation42_spill] sm:$0xff]  ;;  %v10183_v8 = vld [vmem:[#allocation128_spill] sm:$0xff] }
 0x25f   : > { %v1453_v22 = vmul.f32 %v8481_v48, %v10164_v25  ;;  %v4619_v47 = vmul.f32 -1.442695, %v8560_v27  ;;  %v2044_v7 = vadd.f32 %v10165_v17, %v1941_v3  ;;  %1146 = vst.msk [vmem:[#allocation2 + $0x150] sm:$0xff] %vm497_vm1, %v1032_v62  ;;  %4278 = vst.msk [vmem:[%s5633_s8 + $0x88] sm:$0xff] %vm497_vm1, %v1032_v62  ;;  %v1031_v56 = vmul.f32 %v8495_v33, %v8156_v32  ;;  %v10168_v32 = vld [vmem:[#allocation33_spill] sm:$0xff]  ;;  %v10187_v17 = vld [vmem:[#allocation43_spill] sm:$0xff] }
 0x260   : > { %v4620_v30 = vmul.f32 -1.442695, %v8563_v52  ;;  %v2045_v24 = vadd.f32 %v10166_v50, %v1942_v57  ;;  %v2345_v18 = vadd.f32 %v2313_v11, %v2244_v21  ;;  %v2346_v59 = vadd.f32 %v8524_v63, %v2245_v37  ;;  %v5186_v58 = vld [vmem:[#allocation2 + $0xb1] sm:$0xff]  ;;  %v8633_v21 = vld [vmem:[%s9605_s4] ss:$0 sm:$0xff] }
 0x261   : > { %v1458_v48 = vmul.f32 0.0, %v1453_v22  ;;  %4997 = vpow2.f32 %v4619_v47  ;;  %v2145_v41 = vadd.f32 %v10167_v46, %v2044_v7  ;;  %1145 = vst.msk [vmem:[#allocation2 + $0x148] sm:$0xff] %vm497_vm1, %v1031_v56  ;;  %v1857_v4 = vadd.f32 %v8409_v10, %v8451_v29  ;;  %4277 = vst.msk [vmem:[%s5633_s8 + $0x80] sm:$0xff] %vm497_vm1, %v1031_v56  ;;  %v5187_v3 = vld [vmem:[#allocation2 + $0xb2] sm:$0xff]  ;;  %v10186_v47 = vld [vmem:[#allocation8_spill] sm:$0xff] }
 0x262   : > { %v2362_v14 = vadd.f32 %v8431_v36, %v8466_v42  ;;  %4999 = vpow2.f32 %v4620_v30  ;;  %v2146_v33 = vadd.f32 %v10168_v32, %v2045_v24  ;;  %v2446_v39 = vadd.f32 %v2414_v9, %v2345_v18  ;;  %v1409_v36 = vpop.f32.mrf.mxu1  ;;  %v10184_v62 = vld [vmem:[#allocation37_spill] sm:$0xff]  ;;  %v5192_v46 = vld [vmem:[#allocation2 + $0xa6] sm:$0xff] }
 0x263   : > { %v2447_v63 = vadd.f32 %v8535_v20, %v2346_v59  ;;  %1463 = vst.msk [vmem:[#allocation2 + $0x250] sm:$0xff] %vm497_vm1, %v1458_v48  ;;  %v2246_v23 = vadd.f32 %v10169_v28, %v2145_v41  ;;  %v8592_v38 = vadd.f32 %v8413_v44, %v1857_v4  ;;  %v2866_v10 = vadd.f32 %v8491_v35, %v8507_v34  ;;  %v10174_v44 = vld [vmem:[#allocation146_spill] sm:$0xff]  ;;  %v10178_v35 = vld [vmem:[#allocation36_spill] sm:$0xff]  ;;  %v5189_v25 = vld [vmem:[#allocation2 + $0x1f0] sm:$0xff] }
 0x264   : > { %v8595_v29 = vadd.f32 %v8487_v2, %v2362_v14  ;;  %v8601_v42 = vmul.f32 %v8343_v1, %v8176_v55  ;;  %v2247_v20 = vadd.f32 %v10171_v31, %v2146_v33  ;;  %v2548_v12 = vadd.f32 %v10172_v53, %v2446_v39  ;;  %v5185_v2 = vld [vmem:[#allocation2 + $0xb0] sm:$0xff]  ;;  %v10192_v14 = vld [vmem:[#allocation99_spill] sm:$0xff]  ;;  %v10193_v33 = vld [vmem:[#allocation100_spill] sm:$0xff] }
 0x265   : > { %v2549_v0 = vadd.f32 %v10173_v15, %v2447_v63  ;;  %v8608_v16 = vmul.f32 %v10175_v6, %v10174_v44  ;;  %v8611_v5 = vmul.f32 %v5185_v2, %v10177_v13  ;;  %v2347_v34 = vadd.f32 %v10178_v35, %v2246_v23  ;;  %v10188_v56 = vld [vmem:[#allocation9_spill] sm:$0xff]  ;;  %v10194_v63 = vld [vmem:[#allocation44_spill] sm:$0xff]  ;;  %v10195_v23 = vld [vmem:[#allocation10_spill] sm:$0xff] }
 0x266   : > { %10170 = vst [vmem:[#allocation4_spill] sm:$0xff] %v8601_v42  ;;  %v8615_v1 = vadd.f32 %v10179_v49, %v2866_v10  ;;  %v2348_v43 = vadd.f32 %v10180_v54, %v2247_v20  ;;  %v2649_v45 = vadd.f32 %v10181_v26, %v2548_v12  ;;  %v8621_v51 = vadd.f32 %v10183_v8, %v1409_v36  ;;  %v5190_v24 = vld [vmem:[#allocation2 + $0x1f1] sm:$0xff]  ;;  %v5194_v53 = vld [vmem:[#allocation2 + $0xa7] sm:$0xff] }
 0x267   : > { %10176 = vst [vmem:[#allocation77_spill] sm:$0xff] %v8608_v16  ;;  %v2650_v11 = vadd.f32 %v10182_v19, %v2549_v0  ;;  %v8624_v9 = vmul.f32 %v5186_v58, %v8176_v55  ;;  %v8627_v60 = vmul.f32 %v5187_v3, %v10174_v44  ;;  %v2448_v57 = vadd.f32 %v10184_v62, %v2347_v34  ;;  %v5191_v59 = vld [vmem:[#allocation2 + $0x1f2] sm:$0xff]  ;;  %v10196_v12 = vld [vmem:[#allocation144_spill] sm:$0xff]  ;;  %v10200_v26 = vld [vmem:[#allocation11_spill] sm:$0xff] }
 0x268   : > { %v8636_v37 = vadd.f32 %v8633_v21, %v4755_v40  ;;  %v8639_v22 = vmul.f32 %v5189_v25, %v10177_v13  ;;  %v2449_v30 = vadd.f32 %v10186_v47, %v2348_v43  ;;  %v2750_v7 = vadd.f32 %v10187_v17, %v2649_v45  ;;  %v10191_v41 = vld [vmem:[#allocation141_spill] sm:$0xff]  ;;  %v10198_v34 = vld [vmem:[#allocation102_spill] sm:$0xff]  ;;  %v5196_v19 = vld [vmem:[#allocation2 + $0xa8] sm:$0xff] }
 0x269   : > { %v2751_v50 = vadd.f32 %v10188_v56, %v2650_v11  ;;  %v8645_v18 = vmul.f32 %v5190_v24, %v8176_v55  ;;  %v8648_v48 = vmul.f32 %v5191_v59, %v10174_v44  ;;  %v8651_v4 = vmul.f32 %v5192_v46, %v10191_v41  ;;  %v5193_v31 = vld [vmem:[#allocation2 + $0xae] sm:$0xff]  ;;  %v10201_v25 = vld [vmem:[#allocation103_spill] sm:$0xff]  ;;  %v10204_v24 = vld [vmem:[#allocation106_spill] sm:$0xff] }
 0x26a   : > { %10185 = vst [vmem:[#allocation89_spill] sm:$0xff] %v8639_v22  ;;  %v2550_v32 = vadd.f32 %v10192_v14, %v2448_v57  ;;  %v2551_v39 = vadd.f32 %v10193_v33, %v2449_v30  ;;  %v2851_v28 = vadd.f32 %v10194_v63, %v2750_v7  ;;  %v4559_v36 = vmul.f32 -1.442695, %v8621_v51  ;;  %v10197_v0 = vld [vmem:[#allocation101_spill] sm:$0xff]  ;;  %v10202_v17 = vld [vmem:[#allocation80_spill] sm:$0xff]  ;;  %v10205_v14 = vld [vmem:[#allocation178_spill] sm:$0xff] }
 0x26b   : > { %10189 = vst [vmem:[#allocation16_spill] sm:$0xff] %v8645_v18  ;;  %10190 = vst [vmem:[#allocation17_spill] sm:$0xff] %v8648_v48  ;;  %v2852_v10 = vadd.f32 %v10195_v23, %v2751_v50  ;;  %v8659_v20 = vmul.f32 %v5193_v31, %v10191_v41  ;;  %v8662_v15 = vmul.f32 %v5194_v53, %v10196_v12  ;;  %v4530_v6 = vmul.f32 -1.442695, %v8636_v37  ;;  %v5195_v2 = vld [vmem:[#allocation2 + $0xaf] sm:$0xff]  ;;  %v10209_v53 = vld [vmem:[#allocation107_spill] sm:$0xff] }
 0x26c   : > { %v2651_v40 = vadd.f32 %v10197_v0, %v2550_v32  ;;  %v8667_v35 = vmul.f32 %v5195_v2, %v10196_v12  ;;  %v2652_v49 = vadd.f32 %v10198_v34, %v2551_v39  ;;  %v10199_v54 = vld [vmem:[#allocation45_spill] sm:$0xff]  ;;  %v8673_v11 = vmul.f32 %v5196_v19, %v10177_v13  ;;  %v10206_v32 = vld [vmem:[#allocation151_spill] sm:$0xff]  ;;  %v10207_v63 = vld [vmem:[#allocation12_spill] sm:$0xff] }
 0x26d   : > { %v2952_v43 = vadd.f32 %v10199_v54, %v2851_v28  ;;  %v2953_v45 = vadd.f32 %v10200_v26, %v2852_v10  ;;  %v5197_v58 = vld [vmem:[#allocation2 + $0xa9] sm:$0xff]  ;;  %5001 = vpow2.f32 %v4559_v36  ;;  %v3035_v33 = vmul.f32 %v10206_v32, %v10205_v14  ;;  %v10212_v54 = vld [vmem:[#allocation138_spill] sm:$0xff]  ;;  %v10259_v16 = vld [vmem:[#allocation39_spill] sm:$0xff] }
 0x26e   : > { %v8676_v3 = vmul.f32 %v5197_v58, %v8176_v55  ;;  %v5198_v62 = vld [vmem:[#allocation2 + $0xaa] sm:$0xff]  ;;  %v2752_v47 = vadd.f32 %v10201_v25, %v2651_v40  ;;  %v4998_v30 = vpop.eup %4997  ;;  %v2753_v7 = vadd.f32 %v10202_v17, %v2652_v49  ;;  %5003 = vpow2.f32 %v4530_v6  ;;  %v10210_v40 = vld [vmem:[#allocation110_spill] sm:$0xff]  ;;  %v10215_v58 = vld [vmem:[#allocation111_spill] sm:$0xff] }
 0x26f   : > { %v8679_v57 = vmul.f32 %v5198_v62, %v10174_v44  ;;  %v10203_v56 = vld [vmem:[#allocation105_spill] sm:$0xff]  ;;  %v3056_v59 = vadd.f32 %v10204_v24, %v2953_v45  ;;  %v5000_v46 = vpop.eup %4999  ;;  %v4143_v39 = vadd.f32 1.0, %v4998_v30  ;;  %v3067_v36 = vadd.f32 %v3035_v33, %v10212_v54  ;;  %v10214_v45 = vld [vmem:[#allocation82_spill] sm:$0xff]  ;;  %v10216_v62 = vld [vmem:[#allocation83_spill] sm:$0xff] }
 0x270   : > { %v3055_v50 = vadd.f32 %v10203_v56, %v2952_v43  ;;  %v2853_v28 = vadd.f32 %v10207_v63, %v2752_v47  ;;  %v4144_v23 = vadd.f32 1.0, %v5000_v46  ;;  %v10208_v10 = vld [vmem:[#allocation81_spill] sm:$0xff]  ;;  %v10213_v43 = vld [vmem:[#allocation104_spill] sm:$0xff]  ;;  %v754_v47 = vpop.f32.mrf.mxu0  ;;  %v10223_v63 = vld [vmem:[#allocation15_spill] sm:$0xff] }
 0x271   : > { %v2854_v31 = vadd.f32 %v10208_v10, %v2753_v7  ;;  %v3157_v2 = vadd.f32 %v10210_v40, %v3056_v59  ;;  %v10211_v34 = vld [vmem:[#allocation181_spill] sm:$0xff]  ;;  %5005 = vrcp.f32 %v4143_v39  ;;  %v5199_v30 = vld [vmem:[#allocation2 + $0x1e6] sm:$0xff]  ;;  %v8715_v54 = vadd.f32 %v8633_v21, %v754_v47  ;;  %v8729_v21 = vld [vmem:[%s9606_s5 + $0x1a] ss:$0 sm:$0xff] }
 0x272   : > { %v3156_v0 = vadd.f32 %v10209_v53, %v3055_v50  ;;  %v3036_v49 = vmul.f32 %v10206_v32, %v10211_v34  ;;  %v2954_v26 = vadd.f32 %v10213_v43, %v2853_v28  ;;  %5007 = vrcp.f32 %v4144_v23  ;;  %v10218_v7 = vld [vmem:[#allocation149_spill] sm:$0xff]  ;;  %v10219_v50 = vld [vmem:[#allocation182_spill] sm:$0xff]  ;;  %v10220_v24 = vld [vmem:[#allocation164_spill] sm:$0xff] }
 0x273   : > { %v2955_v19 = vadd.f32 %v10214_v45, %v2854_v31  ;;  %v3258_v25 = vadd.f32 %v10216_v62, %v3157_v2  ;;  %v8699_v17 = vmul.f32 %v5199_v30, %v10191_v41  ;;  %v3136_v59 = vmul.f32 %v10220_v24, %v10219_v50  ;;  %v10221_v46 = vld [vmem:[#allocation152_spill] sm:$0xff]  ;;  %v10227_v34 = vld [vmem:[#allocation153_spill] sm:$0xff]  ;;  %v10234_v50 = vld [vmem:[#allocation155_spill] sm:$0xff] }
 0x274   : > { %v3257_v6 = vadd.f32 %v10215_v58, %v3156_v0  ;;  %v3068_v56 = vadd.f32 %v3036_v49, %v10218_v7  ;;  %v3057_v14 = vadd.f32 %v10221_v46, %v2954_v26  ;;  %v5200_v33 = vld [vmem:[#allocation2 + $0x1ee] sm:$0xff]  ;;  %v10226_v0 = vld [vmem:[#allocation183_spill] sm:$0xff] }
 0x275   : > { %10217 = vst [vmem:[#allocation87_spill] sm:$0xff] %v8699_v17  ;;  %v8706_v39 = vmul.f32 %v5200_v33, %v10191_v41  ;;  %v3058_v28 = vadd.f32 %v10223_v63, %v2955_v19  ;;  %v10224_v23 = vld [vmem:[#allocation112_spill] sm:$0xff]  ;;  %v3137_v40 = vmul.f32 %v10220_v24, %v10226_v0  ;;  %v3168_v2 = vadd.f32 %v3136_v59, %v3067_v36  ;;  %v10229_v41 = vld [vmem:[#allocation154_spill] sm:$0xff]  ;;  %v10230_v19 = vld [vmem:[#allocation113_spill] sm:$0xff] }
 0x276   : > { %v3358_v10 = vadd.f32 %v10224_v23, %v3257_v6  ;;  %v10225_v31 = vld [vmem:[#allocation84_spill] sm:$0xff]  ;;  %v3158_v49 = vadd.f32 %v10227_v34, %v3057_v14  ;;  %v10231_v6 = vld [vmem:[#allocation85_spill] sm:$0xff]  ;;  %v4529_v34 = vmul.f32 -1.442695, %v8715_v54 }
 0x277   : > { %10222 = vst [vmem:[#allocation35_spill] sm:$0xff] %v8706_v39  ;;  %v3359_v53 = vadd.f32 %v10225_v31, %v3258_v25  ;;  %v5201_v43 = vld [vmem:[#allocation2 + $0x1e7] sm:$0xff]  ;;  %v3159_v45 = vadd.f32 %v10229_v41, %v3058_v28  ;;  %v5202_v25 = vld [vmem:[#allocation2 + $0x1ef] sm:$0xff]  ;;  %v3169_v36 = vadd.f32 %v3137_v40, %v3068_v56 }
 0x278   : > { %v8718_v26 = vmul.f32 %v5201_v43, %v10196_v12  ;;  %v3459_v58 = vadd.f32 %v10230_v19, %v3358_v10  ;;  %v8724_v30 = vmul.f32 %v5202_v25, %v10196_v12  ;;  %v10233_v47 = vld [vmem:[#allocation184_spill] sm:$0xff]  ;;  %v3259_v59 = vadd.f32 %v10234_v50, %v3158_v49  ;;  %v10237_v28 = vld [vmem:[#allocation159_spill] sm:$0xff]  ;;  %v10240_v0 = vld [vmem:[#allocation157_spill] sm:$0xff]  ;;  %v4789_v43 = vpop.f32.mrf.mxu1 }
 0x279   : > { %v3460_v62 = vadd.f32 %v10231_v6, %v3359_v53  ;;  %v3237_v7 = vmul.f32 %v8729_v21, %v10233_v47  ;;  %v5204_v46 = vld [vmem:[#allocation2 + $0x1e8] sm:$0xff]  ;;  %v10241_v49 = vld [vmem:[#allocation79_spill] sm:$0xff]  ;;  %v10242_v19 = vld [vmem:[#allocation137_spill] sm:$0xff]  ;;  %5009 = vpow2.f32 %v4529_v34 }
 0x27a   : > { %10228 = vst [vmem:[#allocation29_spill] sm:$0xff] %v8718_v26  ;;  %10232 = vst [vmem:[#allocation30_spill] sm:$0xff] %v8724_v30  ;;  %v8735_v14 = vmul.f32 %v5204_v46, %v10177_v13  ;;  %v10236_v33 = vld [vmem:[#allocation76_spill] sm:$0xff]  ;;  %v3562_v12 = vadd.f32 %v10237_v28, %v3459_v58  ;;  %v3360_v40 = vadd.f32 %v10240_v0, %v3259_v59  ;;  %v10243_v25 = vld [vmem:[#allocation161_spill] sm:$0xff]  ;;  %v5002_v58 = vpop.eup %5001 }
 0x27b   : > { %v3260_v63 = vadd.f32 %v10236_v33, %v3159_v45  ;;  %v10238_v23 = vld [vmem:[#allocation160_spill] sm:$0xff]  ;;  %v3269_v53 = vadd.f32 %v3237_v7, %v3168_v2  ;;  %v8748_v45 = vadd.f32 %v4789_v43, %v10183_v8  ;;  %v8756_v7 = vld [vmem:[%s9606_s5 + $0x1b] ss:$0 sm:$0xff]  ;;  %v10246_v59 = vld [vmem:[#allocation185_spill] sm:$0xff]  ;;  %v5004_v28 = vpop.eup %5003 }
 0x27c   : > { %10235 = vst [vmem:[#allocation31_spill] sm:$0xff] %v8735_v14  ;;  %v3563_v56 = vadd.f32 %v10238_v23, %v3460_v62  ;;  %v10239_v10 = vld [vmem:[#allocation176_spill] sm:$0xff]  ;;  %v3663_v6 = vadd.f32 %v10242_v19, %v3562_v12  ;;  %v3338_v46 = vmul.f32 %v8756_v7, %v10246_v59  ;;  %v10247_v33 = vld [vmem:[#allocation158_spill] sm:$0xff]  ;;  %v10249_v23 = vld [vmem:[#allocation51_spill] sm:$0xff] }
 0x27d   : > { %v3238_v31 = vmul.f32 %v8729_v21, %v10239_v10  ;;  %v3361_v41 = vadd.f32 %v10241_v49, %v3260_v63  ;;  %10244 = vst [vmem:[#allocation33_spill] sm:$0xff] %v8748_v45  ;;  %v5205_v62 = vld [vmem:[#allocation2 + $0x1e9] sm:$0xff]  ;;  %v3461_v63 = vadd.f32 %v10247_v33, %v3360_v40  ;;  %v10250_v10 = vld [vmem:[#allocation162_spill] sm:$0xff]  ;;  %v10253_v59 = vld [vmem:[#allocation163_spill] sm:$0xff] }
 0x27e   : > { %v3664_v47 = vadd.f32 %v10243_v25, %v3563_v56  ;;  %v8751_v50 = vmul.f32 %v5205_v62, %v8176_v55  ;;  %v5207_v12 = vld [vmem:[#allocation2 + $0x1ea] sm:$0xff]  ;;  %v3764_v0 = vadd.f32 %v10250_v10, %v3663_v6  ;;  %v3370_v19 = vadd.f32 %v3338_v46, %v3269_v53  ;;  %v5006_v62 = vpop.eup %5005  ;;  %v10255_v53 = vld [vmem:[#allocation135_spill] sm:$0xff] }
 0x27f   : > { %v3270_v2 = vadd.f32 %v3238_v31, %v3169_v36  ;;  %v8762_v8 = vmul.f32 %v5207_v12, %v10174_v44  ;;  %v3462_v56 = vadd.f32 %v10249_v23, %v3361_v41  ;;  %v10251_v36 = vld [vmem:[#allocation78_spill] sm:$0xff]  ;;  %v10252_v43 = vld [vmem:[#allocation140_spill] sm:$0xff]  ;;  %v3564_v25 = vadd.f32 %v8651_v4, %v3461_v63  ;;  %v10254_v12 = vld [vmem:[#allocation139_spill] sm:$0xff]  ;;  %v5008_v6 = vpop.eup %5007 }
 0x280   : > { %10245 = vst [vmem:[#allocation34_spill] sm:$0xff] %v8751_v50  ;;  %v3765_v31 = vadd.f32 %v10251_v36, %v3664_v47  ;;  %v3339_v49 = vmul.f32 %v8756_v7, %v10252_v43  ;;  %v3865_v33 = vadd.f32 %v10253_v59, %v3764_v0  ;;  %v8774_v41 = vmul.f32 -1.442695, %v8748_v45  ;;  %v8779_v47 = vld [vmem:[%s9606_s5 + $0x1c] ss:$0 sm:$0xff]  ;;  %v10257_v0 = vld [vmem:[#allocation3_spill] sm:$0xff] }
 0x281   : > { %10248 = vst [vmem:[#allocation6_spill] sm:$0xff] %v8762_v8  ;;  %v3565_v40 = vadd.f32 %v8659_v20, %v3462_v56  ;;  %v3439_v4 = vmul.f32 %v8779_v47, %v10255_v53  ;;  %v4239_v20 = vmul.f32 %v5006_v62, %v8560_v27  ;;  %v3665_v34 = vadd.f32 %v8662_v15, %v3564_v25  ;;  %v10256_v56 = vld [vmem:[#allocation165_spill] sm:$0xff] }
 0x282   : > { %v3866_v48 = vadd.f32 %v10254_v12, %v3765_v31  ;;  %v3371_v46 = vadd.f32 %v3339_v49, %v3270_v2  ;;  %v4240_v63 = vmul.f32 %v5008_v6, %v8563_v52  ;;  %v3966_v10 = vadd.f32 %v10256_v56, %v3865_v33  ;;  %v8789_v31 = vld [vmem:[#allocation2 + $0x150] sm:$0xff]  ;;  %v8840_v33 = vld [vmem:[%s9606_s5 + $0xa] ss:$0 sm:$0xff] }
 0x283   : > { %v3666_v23 = vadd.f32 %v8667_v35, %v3565_v40  ;;  %v8791_v43 = vld [vmem:[#allocation2 + $0x151] sm:$0xff]  ;;  %v8795_v53 = vadd.f32 %v3439_v4, %v3370_v19  ;;  %4651 = vst.msk [vmem:[%s5633_s8 + $0x150] sm:$0xff] %vm497_vm1, %v4239_v20  ;;  %v3766_v27 = vadd.f32 %v8673_v11, %v3665_v34  ;;  %v8800_v52 = vadd.f32 1.0, %v5002_v58  ;;  %v8819_v11 = vld [vmem:[%s9606_s5 + $0x2] ss:$0 sm:$0xff]  ;;  %v8846_v4 = vld [vmem:[#allocation2 + $0x146] sm:$0xff] }
 0x284   : > { %v3967_v36 = vadd.f32 %v10257_v0, %v3866_v48  ;;  %v10258_v59 = vld [vmem:[#allocation177_spill] sm:$0xff]  ;;  %4652 = vst.msk [vmem:[%s5633_s8 + $0x158] sm:$0xff] %vm497_vm1, %v4240_v63  ;;  %v8806_v48 = vadd.f32 %v8209_v61, %v3966_v10  ;;  %v8813_v49 = vadd.f32 1.0, %v5004_v28  ;;  %v8828_v58 = vld [vmem:[%s9606_s5 + $0x3] ss:$0 sm:$0xff]  ;;  %v8844_v6 = vmul.f32 %v8840_v33, %v8789_v31  ;;  %v8848_v20 = vld [vmem:[#allocation2 + $0x147] sm:$0xff] }
 0x285   : > { %v3440_v12 = vmul.f32 %v8779_v47, %v10258_v59  ;;  %v3767_v15 = vadd.f32 %v8611_v5, %v3666_v23  ;;  %v8811_v2 = vld [vmem:[#allocation2 + $0x152] sm:$0xff]  ;;  %v3867_v19 = vadd.f32 %v8676_v3, %v3766_v27  ;;  %v8823_v5 = vmul.f32 %v8819_v11, %v8789_v31  ;;  %v8880_v59 = vld [vmem:[%s9606_s5] ss:$0 sm:$0xff]  ;;  %v8912_v45 = vld [vmem:[#allocation2 + $0x149] sm:$0xff] }
 0x286   : > { %v8809_v35 = vadd.f32 %v8209_v61, %v3967_v36  ;;  %v8832_v28 = vmul.f32 %v8828_v58, %v8791_v43  ;;  %v4609_v62 = vmul.f32 -1.442695, %v8806_v48  ;;  %v8859_v63 = vmul.f32 %v8779_v47, %v8811_v2  ;;  %v8861_v23 = vld [vmem:[#allocation2 + $0x14e] sm:$0xff] }
 0x287   : > { %v3472_v25 = vadd.f32 %v3440_v12, %v3371_v46  ;;  %v3868_v3 = vadd.f32 %v8624_v9, %v3767_v15  ;;  %v3968_v34 = vadd.f32 %v8679_v57, %v3867_v19  ;;  %v3240_v9 = vmul.f32 %v8729_v21, %v8789_v31  ;;  %v8872_v0 = vld [vmem:[#allocation2 + $0x14f] sm:$0xff] }
 0x288   : > { %v4610_v40 = vmul.f32 -1.442695, %v8809_v35  ;;  %v8855_v46 = vmul.f32 %v8756_v7, %v8791_v43  ;;  %5011 = vpow2.f32 %v4609_v62  ;;  %v8866_v10 = vmul.f32 %v10177_v13, %v8789_v31  ;;  %v8887_v13 = vld [vmem:[%s9606_s5 + $0x1] ss:$0 sm:$0xff]  ;;  %v8898_v15 = vld [vmem:[#allocation2 + $0x148] sm:$0xff] }
 0x289   : > { %v3969_v56 = vadd.f32 %v8627_v60, %v3868_v3  ;;  %v8870_v57 = vmul.f32 %v8176_v55, %v8791_v43  ;;  %v8875_v36 = vadd.f32 %v8209_v61, %v3968_v34  ;;  %v1523_v60 = vmul.f32 %v8880_v59, %v8846_v4  ;;  %v5010_v34 = vpop.eup %5009  ;;  %v8914_v8 = vld [vmem:[#allocation2 + $0x14a] sm:$0xff] }
 0x28a   : > { %5013 = vpow2.f32 %v4610_v40  ;;  %v1624_v55 = vmul.f32 %v8887_v13, %v8848_v20  ;;  %v8896_v27 = vmul.f32 %v10174_v44, %v8811_v2  ;;  %v3037_v19 = vmul.f32 %v10206_v32, %v8846_v4 }
 0x28b   : > { %v8892_v12 = vadd.f32 %v8209_v61, %v3969_v56  ;;  %v3038_v3 = vmul.f32 %v10206_v32, %v8861_v23  ;;  %v4611_v62 = vmul.f32 -1.442695, %v8875_v36  ;;  %v1524_v40 = vmul.f32 %v8880_v59, %v8861_v23 }
 0x28c   : > { %v1625_v61 = vmul.f32 %v8887_v13, %v8872_v0  ;;  %v3138_v44 = vmul.f32 %v10220_v24, %v8848_v20  ;;  %v3069_v32 = vadd.f32 %v3037_v19, %v10259_v16  ;;  %v3139_v50 = vmul.f32 %v10220_v24, %v8872_v0  ;;  %v8931_v16 = vld [vmem:[%s9606_s5 + $0x20] ss:$0 sm:$0xff] }
 0x28d   : > { %v4612_v56 = vmul.f32 -1.442695, %v8892_v12  ;;  %v3070_v18 = vadd.f32 %v3038_v3, %v8615_v1  ;;  %5015 = vpow2.f32 %v4611_v62  ;;  %v8920_v42 = vadd.f32 %v1624_v55, %v1523_v60  ;;  %v8947_v62 = vld [vmem:[%s9606_s5 + $0x21] ss:$0 sm:$0xff] }
 0x28e   : > { %v8924_v22 = vmul.f32 %v8819_v11, %v8898_v15  ;;  %v3239_v14 = vmul.f32 %v8729_v21, %v8898_v15  ;;  %v3170_v30 = vadd.f32 %v3138_v44, %v3069_v32  ;;  %v3542_v1 = vmul.f32 %v8931_v16, %v8846_v4 }
 0x28f   : > { %5017 = vpow2.f32 %v4612_v56  ;;  %v3171_v26 = vadd.f32 %v3139_v50, %v3070_v18  ;;  %v8935_v24 = vadd.f32 %v1625_v61, %v1524_v40  ;;  %v3340_v60 = vmul.f32 %v8756_v7, %v8912_v45 }
 0x290   : > { %v3441_v55 = vmul.f32 %v8779_v47, %v8914_v8  ;;  %v3543_v19 = vmul.f32 %v8931_v16, %v8861_v23  ;;  %v3271_v18 = vadd.f32 %v3239_v14, %v3170_v30  ;;  %v3574_v3 = vadd.f32 %v3542_v1, %v8795_v53  ;;  %v8965_v53 = vld [vmem:[%s9606_s5 + $0x8] ss:$0 sm:$0xff] }
 0x291   : > { %v3272_v50 = vadd.f32 %v3240_v9, %v3171_v26  ;;  %v3643_v40 = vmul.f32 %v8947_v62, %v8848_v20  ;;  %v3644_v44 = vmul.f32 %v8947_v62, %v8872_v0  ;;  %5019 = vrcp.f32 %v8800_v52  ;;  %v8957_v26 = vld [vmem:[%s9606_s5 + $0x22] ss:$0 sm:$0xff] }
 0x292   : > { %v3575_v61 = vadd.f32 %v3543_v19, %v3472_v25  ;;  %v937_v56 = vadd.f32 1.0, %v5010_v34  ;;  %v3372_v32 = vadd.f32 %v3340_v60, %v3271_v18  ;;  %v3744_v14 = vmul.f32 %v8957_v26, %v8898_v15  ;;  %v1419_v34 = vpop.f32.mrf.mxu1 }
 0x293   : > { %v3675_v30 = vadd.f32 %v3643_v40, %v3574_v3  ;;  %5021 = vrcp.f32 %v8813_v49  ;;  %v2028_v52 = vmul.f32 %v8965_v53, %v8846_v4  ;;  %v2029_v25 = vmul.f32 %v8965_v53, %v8861_v23  ;;  %v8976_v49 = vld [vmem:[%s9606_s5 + $0x23] ss:$0 sm:$0xff]  ;;  %v8984_v40 = vld [vmem:[%s9606_s5 + $0x10] ss:$0 sm:$0xff] }
 0x294   : > { %v3676_v9 = vadd.f32 %v3644_v44, %v3575_v61  ;;  %5023 = vrcp.f32 %v937_v56  ;;  %v8971_v1 = vadd.f32 %v3441_v55, %v3372_v32  ;;  %v3845_v19 = vmul.f32 %v8976_v49, %v8912_v45  ;;  %10261 = vst [vmem:[#allocation40_spill] sm:$0xff] %v8984_v40  ;;  %v8992_v44 = vld [vmem:[%s9606_s5 + $0x24] ss:$0 sm:$0xff] }
 0x295   : > { %v3776_v60 = vadd.f32 %v3744_v14, %v3675_v30  ;;  %v3373_v18 = vadd.f32 %v8855_v46, %v3272_v50  ;;  %v5012_v3 = vpop.eup %5011  ;;  %v2532_v55 = vmul.f32 %v8984_v40, %v8846_v4  ;;  %v3946_v56 = vmul.f32 %v8992_v44, %v8914_v8  ;;  %v5221_v4 = vld [vmem:[%s9605_s4] ss:$0 sm:$0xff] }
 0x296   : > { %10260 = vst [vmem:[#allocation38_spill] sm:$0xff] %v8971_v1  ;;  %v3777_v61 = vadd.f32 %v8866_v10, %v3676_v9  ;;  %5025 = vpow2.f32 %v8774_v41  ;;  %v4133_v50 = vadd.f32 1.0, %v5012_v3  ;;  %v9003_v10 = vadd.f32 %v5221_v4, %v1419_v34  ;;  %v10264_v9 = vld [vmem:[#allocation32_spill] sm:$0xff] }
 0x297   : > { %v5014_v46 = vpop.eup %5013  ;;  %v3877_v32 = vadd.f32 %v3845_v19, %v3776_v60  ;;  %v8998_v30 = vadd.f32 %v8859_v63, %v3373_v18  ;;  %v2060_v39 = vadd.f32 %v2028_v52, %v10264_v9  ;;  %v2533_v17 = vmul.f32 %v8984_v40, %v8861_v23  ;;  %v10265_v3 = vld [vmem:[#allocation108_spill] sm:$0xff]  ;;  %v9024_v52 = vld [vmem:[%s9606_s5 + $0x11] ss:$0 sm:$0xff] }
 0x298   : > { %10263 = vst [vmem:[#allocation173_spill] sm:$0xff] %v9003_v10  ;;  %v4134_v14 = vadd.f32 1.0, %v5014_v46  ;;  %v3878_v41 = vadd.f32 %v8870_v57, %v3777_v61  ;;  %5027 = vrcp.f32 %v4133_v50  ;;  %v2564_v60 = vadd.f32 %v2532_v55, %v10265_v3  ;;  %v9017_v23 = vld [vmem:[%s9606_s5 + $0x9] ss:$0 sm:$0xff]  ;;  %10266 = vst [vmem:[#allocation145_spill] sm:$0xff] %v9024_v52 }
 0x299   : > { %10262 = vst [vmem:[#allocation146_spill] sm:$0xff] %v8998_v30  ;;  %v3978_v19 = vadd.f32 %v3946_v56, %v3877_v32  ;;  %v4561_v63 = vmul.f32 -1.442695, %v9003_v10  ;;  %v2061_v18 = vadd.f32 %v2029_v25, %v8592_v38  ;;  %v2565_v34 = vadd.f32 %v2533_v17, %v8595_v29  ;;  %v9031_v29 = vld [vmem:[%s9607_s6] ss:$0 sm:$0xff] }
 0x29a   : > { %5029 = vrcp.f32 %v4134_v14  ;;  %v3979_v46 = vadd.f32 %v8896_v27, %v3878_v41  ;;  %v5016_v4 = vpop.eup %5015  ;;  %v2129_v57 = vmul.f32 %v9017_v23, %v8848_v20  ;;  %v2633_v38 = vmul.f32 %v9024_v52, %v8848_v20 }
 0x29b   : > { %v9034_v17 = vadd.f32 %v9031_v29, %v3978_v19  ;;  %5031 = vpow2.f32 %v4561_v63  ;;  %v4135_v25 = vadd.f32 1.0, %v5016_v4  ;;  %v2130_v55 = vmul.f32 %v9017_v23, %v8872_v0  ;;  %v9048_v63 = vld [vmem:[%s9606_s5 + $0x12] ss:$0 sm:$0xff] }
 0x29c   : > { %v5018_v27 = vpop.eup %5017  ;;  %v2634_v61 = vmul.f32 %v9024_v52, %v8872_v0  ;;  %v9041_v56 = vadd.f32 %v9031_v29, %v3979_v46  ;;  %v2161_v50 = vadd.f32 %v2129_v57, %v2060_v39  ;;  %v2665_v32 = vadd.f32 %v2633_v38, %v2564_v60 }
 0x29d   : > { %v4136_v20 = vadd.f32 1.0, %v5018_v27  ;;  %v4621_v14 = vmul.f32 -1.442695, %v9034_v17  ;;  %5033 = vrcp.f32 %v4135_v25  ;;  %v2162_v9 = vadd.f32 %v2130_v55, %v2061_v18 }
 0x29e   : > { %v2666_v41 = vadd.f32 %v2634_v61, %v2565_v34  ;;  %v4622_v3 = vmul.f32 -1.442695, %v9041_v56  ;;  %v5020_v19 = vpop.eup %5019  ;;  %v2735_v0 = vmul.f32 %v9048_v63, %v8789_v31  ;;  %v2230_v39 = vmul.f32 %v8840_v33, %v8898_v15 }
 0x29f   : > { %5035 = vrcp.f32 %v4136_v20  ;;  %v2734_v60 = vmul.f32 %v9048_v63, %v8898_v15  ;;  %v1757_v34 = vadd.f32 %v8924_v22, %v8920_v42  ;;  %v1758_v46 = vadd.f32 %v8823_v5, %v8935_v24  ;;  %v9067_v22 = vld [vmem:[%s9606_s5 + $0x4] ss:$0 sm:$0xff]  ;;  %v3219_v5 = vld [vmem:[#allocation2 + $0x250] sm:$0xff] }
 0x2a0   : > { %v5022_v18 = vpop.eup %5021  ;;  %5037 = vpow2.f32 %v4621_v14  ;;  %v1452_v4 = vmul.f32 %v5020_v19, %v8621_v51  ;;  %v2262_v38 = vadd.f32 %v2230_v39, %v2161_v50  ;;  %v2263_v25 = vadd.f32 %v8844_v6, %v2162_v9  ;;  %v9076_v6 = vld [vmem:[%s9606_s5 + $0xb] ss:$0 sm:$0xff]  ;;  %v9083_v24 = vld [vmem:[%s9606_s5 + $0x13] ss:$0 sm:$0xff] }
 0x2a1   : > { %v5024_v57 = vpop.eup %5023  ;;  %v2766_v27 = vadd.f32 %v2734_v60, %v2665_v32  ;;  %5039 = vpow2.f32 %v4622_v3  ;;  %v1034_v31 = vmul.f32 %v5022_v18, %v8636_v37  ;;  %v2767_v15 = vadd.f32 %v2735_v0, %v2666_v41  ;;  %v9095_v32 = vld [vmem:[%s9606_s5 + $0xc] ss:$0 sm:$0xff]  ;;  %v9112_v3 = vld [vmem:[#allocation2 + $0x251] sm:$0xff] }
 0x2a2   : > { %v1457_v55 = vmul.f32 0.0, %v1452_v4  ;;  %v1033_v61 = vmul.f32 %v5024_v57, %v8715_v54  ;;  %v1928_v51 = vmul.f32 %v9067_v22, %v8811_v2  ;;  %v1826_v37 = vmul.f32 %v8828_v58, %v8912_v45  ;;  %10267 = vst [vmem:[#allocation36_spill] sm:$0xff] %v9112_v3  ;;  %v9114_v19 = vld [vmem:[#allocation2 + $0x252] sm:$0xff] }
 0x2a3   : > { %v5026_v42 = vpop.eup %5025  ;;  %v2331_v54 = vmul.f32 %v9076_v6, %v8912_v45  ;;  %v2835_v20 = vmul.f32 %v9083_v24, %v8912_v45  ;;  %1148 = vst.msk [vmem:[#allocation2 + $0x170] sm:$0xff] %vm497_vm1, %v1034_v31  ;;  %4280 = vst.msk [vmem:[%s5633_s8 + $0x98] sm:$0xff] %vm497_vm1, %v1034_v31  ;;  %v2332_v50 = vmul.f32 %v9076_v6, %v8791_v43  ;;  %v9104_v45 = vld [vmem:[%s9606_s5 + $0x14] ss:$0 sm:$0xff] }
 0x2a4   : > { %v2433_v14 = vmul.f32 %v9095_v32, %v8811_v2  ;;  %v2836_v9 = vmul.f32 %v9083_v24, %v8791_v43  ;;  %v2937_v41 = vmul.f32 %v9104_v45, %v8811_v2  ;;  %1462 = vst.msk [vmem:[#allocation2 + $0x248] sm:$0xff] %vm497_vm1, %v1457_v55  ;;  %1147 = vst.msk [vmem:[#allocation2 + $0x168] sm:$0xff] %vm497_vm1, %v1033_v61  ;;  %v1443_v31 = vadd.f32 1.0, %v5026_v42 }
 0x2a5   : > { %4279 = vst.msk [vmem:[%s5633_s8 + $0x90] sm:$0xff] %vm497_vm1, %v1033_v61  ;;  %10268 = vst [vmem:[#allocation136_spill] sm:$0xff] %v9114_v19  ;;  %v1858_v0 = vadd.f32 %v1826_v37, %v1757_v34  ;;  %v2363_v43 = vadd.f32 %v2331_v54, %v2262_v38  ;;  %v2867_v39 = vadd.f32 %v2835_v20, %v2766_v27  ;;  %v5028_v18 = vpop.eup %5027 }
 0x2a6   : > { %v1859_v60 = vadd.f32 %v8832_v28, %v1758_v46  ;;  %v9118_v4 = vmul.f32 %v8729_v21, %v3219_v5  ;;  %v2364_v2 = vadd.f32 %v2332_v50, %v2263_v25  ;;  %v2868_v57 = vadd.f32 %v2836_v9, %v2767_v15 }
 0x2a7   : > { %v5030_v55 = vpop.eup %5029  ;;  %v4229_v61 = vmul.f32 %v5028_v18, %v8806_v48  ;;  %v1927_v10 = vmul.f32 %v9067_v22, %v8914_v8  ;;  %v2432_v34 = vmul.f32 %v9095_v32, %v8914_v8  ;;  %v2936_v28 = vmul.f32 %v9104_v45, %v8914_v8 }
 0x2a8   : > { %v5032_v46 = vpop.eup %5031  ;;  %v4230_v38 = vmul.f32 %v5030_v55, %v8809_v35  ;;  %v9129_v27 = vmul.f32 %v8957_v26, %v3219_v5  ;;  %v9133_v25 = vmul.f32 %v8976_v49, %v9112_v3  ;;  %v9137_v48 = vmul.f32 %v8992_v44, %v9114_v19 }
 0x2a9   : > { %4641 = vst.msk [vmem:[%s5633_s8 + $0x100] sm:$0xff] %vm497_vm1, %v4229_v61  ;;  %v9141_v15 = vadd.f32 %v1927_v10, %v1858_v0  ;;  %v9143_v42 = vadd.f32 %v2432_v34, %v2363_v43  ;;  %v9145_v8 = vadd.f32 %v2936_v28, %v2867_v39  ;;  %v9147_v35 = vadd.f32 %v1928_v51, %v1859_v60  ;;  %v9190_v34 = vld [vmem:[%s9606_s5 + $0x19] ss:$0 sm:$0xff] }
 0x2aa   : > { %4642 = vst.msk [vmem:[%s5633_s8 + $0x108] sm:$0xff] %vm497_vm1, %v4230_v38  ;;  %v9151_v5 = vld [vmem:[#allocation2 + $0x170] sm:$0xff]  ;;  %v9157_v20 = vadd.f32 %v2433_v14, %v2364_v2  ;;  %v9159_v50 = vadd.f32 %v2937_v41, %v2868_v57  ;;  %5041 = vrcp.f32 %v1443_v31  ;;  %v9161_v10 = vadd.f32 1.0, %v5032_v46  ;;  %v5034_v9 = vpop.eup %5033  ;;  %v9183_v57 = vld [vmem:[%s9606_s5 + $0x18] ss:$0 sm:$0xff]  ;;  %10277 = vst [vmem:[#allocation141_spill] sm:$0xff] %v9190_v34 }
 0x2ab   : > { %10269 = vst [vmem:[#allocation7_spill] sm:$0xff] %v9143_v42  ;;  %10270 = vst [vmem:[#allocation41_spill] sm:$0xff] %v9145_v8  ;;  %v9153_v37 = vld [vmem:[#allocation2 + $0x171] sm:$0xff]  ;;  %v3015_v0 = vld [vmem:[#allocation2 + $0x246] sm:$0xff]  ;;  %v9165_v39 = vmul.f32 %v8819_v11, %v9151_v5  ;;  %v9177_v41 = vmul.f32 %v8840_v33, %v9151_v5  ;;  %v4231_v2 = vmul.f32 %v5034_v9, %v8875_v36 }
 0x2ac   : > { %v9155_v54 = vld [vmem:[#allocation2 + $0x172] sm:$0xff]  ;;  %10271 = vst [vmem:[#allocation42_spill] sm:$0xff] %v9157_v20  ;;  %10272 = vst [vmem:[#allocation128_spill] sm:$0xff] %v9159_v50  ;;  %v3117_v51 = vld [vmem:[#allocation2 + $0x247] sm:$0xff]  ;;  %v9169_v60 = vmul.f32 %v8828_v58, %v9153_v37  ;;  %v5036_v18 = vpop.eup %5035  ;;  %v3053_v31 = vmul.f32 %v9183_v57, %v3015_v0 }
 0x2ad   : > { %10273 = vst [vmem:[#allocation37_spill] sm:$0xff] %v9161_v10  ;;  %v3016_v43 = vld [vmem:[#allocation2 + $0x24e] sm:$0xff]  ;;  %v9173_v14 = vmul.f32 %v9067_v22, %v9155_v54  ;;  %10275 = vst [vmem:[#allocation43_spill] sm:$0xff] %v9177_v41  ;;  %v3154_v28 = vmul.f32 %v9190_v34, %v3117_v51  ;;  %v5038_v38 = vpop.eup %5037  ;;  %v4232_v9 = vmul.f32 %v5036_v18, %v8892_v12  ;;  %v10278_v8 = vld [vmem:[#allocation134_spill] sm:$0xff] }
 0x2ae   : > { %10276 = vst [vmem:[#allocation9_spill] sm:$0xff] %v9183_v57  ;;  %v3054_v55 = vmul.f32 %v9183_v57, %v3016_v43  ;;  %v3118_v61 = vld [vmem:[#allocation2 + $0x24f] sm:$0xff]  ;;  %v5040_v1 = vpop.eup %5039  ;;  %4643 = vst.msk [vmem:[%s5633_s8 + $0x110] sm:$0xff] %vm497_vm1, %v4231_v2  ;;  %v4145_v50 = vadd.f32 1.0, %v5038_v38  ;;  %v3085_v57 = vadd.f32 %v3053_v31, %v10278_v8  ;;  %v3558_v18 = vmul.f32 %v8931_v16, %v3015_v0  ;;  %v10280_v8 = vld [vmem:[#allocation55_spill] sm:$0xff] }
 0x2af   : > { %10274 = vst [vmem:[#allocation8_spill] sm:$0xff] %v9173_v14  ;;  %v3218_v36 = vld [vmem:[#allocation2 + $0x248] sm:$0xff]  ;;  %v3155_v10 = vmul.f32 %v9190_v34, %v3118_v61  ;;  %4644 = vst.msk [vmem:[%s5633_s8 + $0x118] sm:$0xff] %vm497_vm1, %v4232_v9  ;;  %v4146_v12 = vadd.f32 1.0, %v5040_v1  ;;  %v3559_v34 = vmul.f32 %v8931_v16, %v3016_v43  ;;  %v3659_v40 = vmul.f32 %v8947_v62, %v3117_v51 }
 0x2b0   : > { %v3319_v46 = vld [vmem:[#allocation2 + $0x249] sm:$0xff]  ;;  %v3255_v19 = vmul.f32 %v8729_v21, %v3218_v36  ;;  %5043 = vrcp.f32 %v4145_v50  ;;  %v3186_v41 = vadd.f32 %v3154_v28, %v3085_v57  ;;  %v3660_v2 = vmul.f32 %v8947_v62, %v3118_v61 }
 0x2b1   : > { %v3356_v3 = vmul.f32 %v8756_v7, %v3319_v46  ;;  %v3420_v30 = vld [vmem:[#allocation2 + $0x24a] sm:$0xff]  ;;  %5045 = vrcp.f32 %v4146_v12  ;;  %v3590_v31 = vadd.f32 %v3558_v18, %v10280_v8  ;;  %v3760_v38 = vmul.f32 %v8957_v26, %v3218_v36 }
 0x2b2   : > { %v10279_v20 = vld [vmem:[#allocation156_spill] sm:$0xff]  ;;  %v3457_v52 = vmul.f32 %v8779_v47, %v3420_v30  ;;  %v3287_v9 = vadd.f32 %v3255_v19, %v3186_v41  ;;  %v3861_v0 = vmul.f32 %v8976_v49, %v3319_v46  ;;  %v3962_v43 = vmul.f32 %v8992_v44, %v3420_v30 }
 0x2b3   : > { %v3086_v42 = vadd.f32 %v3054_v55, %v10279_v20  ;;  %v10281_v20 = vld [vmem:[#allocation168_spill] sm:$0xff]  ;;  %v3691_v50 = vadd.f32 %v3659_v40, %v3590_v31  ;;  %v9226_v19 = vmul.f32 %v9048_v63, %v9151_v5  ;;  %v9234_v40 = vmul.f32 %v9104_v45, %v9155_v54 }
 0x2b4   : > { %v3591_v55 = vadd.f32 %v3559_v34, %v10281_v20  ;;  %v3388_v57 = vadd.f32 %v3356_v3, %v3287_v9  ;;  %v9236_v30 = vld [vmem:[#allocation2 + $0x166] sm:$0xff]  ;;  %v9243_v3 = vmul.f32 %v8729_v21, %v9151_v5  ;;  %v9247_v34 = vmul.f32 %v8756_v7, %v9153_v37  ;;  %v9251_v36 = vld [vmem:[#allocation2 + $0x16f] sm:$0xff] }
 0x2b5   : > { %v3187_v14 = vadd.f32 %v3155_v10, %v3086_v42  ;;  %v9218_v42 = vmul.f32 %v9076_v6, %v9153_v37  ;;  %v9222_v10 = vmul.f32 %v9095_v32, %v9155_v54  ;;  %v3792_v41 = vadd.f32 %v3760_v38, %v3691_v50  ;;  %v9249_v28 = vld [vmem:[#allocation2 + $0x167] sm:$0xff] }
 0x2b6   : > { %v3692_v51 = vadd.f32 %v3660_v2, %v3591_v55  ;;  %v9253_v46 = vld [vmem:[#allocation2 + $0x168] sm:$0xff]  ;;  %v9255_v12 = vadd.f32 %v3457_v52, %v3388_v57  ;;  %v9259_v18 = vmul.f32 %v8779_v47, %v9155_v54  ;;  %v9267_v2 = vmul.f32 %v8976_v49, %v9153_v37 }
 0x2b7   : > { %v9212_v1 = vadd.f32 %v9118_v4, %v3187_v14  ;;  %v9230_v4 = vmul.f32 %v9083_v24, %v9153_v37  ;;  %v9238_v14 = vld [vmem:[#allocation2 + $0x16e] sm:$0xff]  ;;  %v9273_v20 = vpop.eup %5041  ;;  %v3893_v52 = vadd.f32 %v3861_v0, %v3792_v41  ;;  %v9278_v38 = vmul.f32 %v8992_v44, %v9155_v54 }
 0x2b8   : > { %v3793_v61 = vadd.f32 %v9129_v27, %v3692_v51  ;;  %10282 = vst [vmem:[#allocation99_spill] sm:$0xff] %v9255_v12  ;;  %v9263_v27 = vmul.f32 %v8957_v26, %v9151_v5  ;;  %v9269_v8 = vld [vmem:[#allocation2 + $0x169] sm:$0xff]  ;;  %v1525_v5 = vmul.f32 %v8880_v59, %v9236_v30  ;;  %v1526_v37 = vmul.f32 %v8880_v59, %v9238_v14 }
 0x2b9   : > { %v9271_v31 = vld [vmem:[#allocation2 + $0x16a] sm:$0xff]  ;;  %v1626_v9 = vmul.f32 %v8887_v13, %v9249_v28  ;;  %v1627_v50 = vmul.f32 %v8887_v13, %v9251_v36  ;;  %v1727_v0 = vmul.f32 %v8819_v11, %v9253_v46  ;;  %v1828_v54 = vmul.f32 %v8828_v58, %v9269_v8 }
 0x2ba   : > { %v3894_v55 = vadd.f32 %v9133_v25, %v3793_v61  ;;  %v3994_v25 = vadd.f32 %v3962_v43, %v3893_v52  ;;  %v1929_v57 = vmul.f32 %v9067_v22, %v9271_v31  ;;  %v2030_v61 = vmul.f32 %v8965_v53, %v9236_v30 }
 0x2bb   : > { %v1658_v41 = vadd.f32 %v1626_v9, %v1525_v5  ;;  %v1659_v59 = vadd.f32 %v1627_v50, %v1526_v37  ;;  %v2031_v13 = vmul.f32 %v8965_v53, %v9238_v14  ;;  %v2131_v58 = vmul.f32 %v9017_v23, %v9249_v28 }
 0x2bc   : > { %v3995_v51 = vadd.f32 %v9137_v48, %v3894_v55  ;;  %v9300_v12 = vadd.f32 %v9031_v29, %v3994_v25  ;;  %v2132_v22 = vmul.f32 %v9017_v23, %v9251_v36  ;;  %v2062_v52 = vadd.f32 %v2030_v61, %v9141_v15 }
 0x2bd   : > { %v1759_v48 = vadd.f32 %v1727_v0, %v1658_v41  ;;  %v1760_v43 = vadd.f32 %v9165_v39, %v1659_v59  ;;  %v2063_v53 = vadd.f32 %v2031_v13, %v9147_v35  ;;  %v5044_v55 = vpop.eup %5043  ;;  %v2232_v9 = vmul.f32 %v8840_v33, %v9253_v46  ;;  %v10283_v59 = vld [vmem:[#allocation8_spill] sm:$0xff] }
 0x2be   : > { %v9303_v11 = vadd.f32 %v9031_v29, %v3995_v51  ;;  %v4637_v5 = vmul.f32 -1.442695, %v9300_v12  ;;  %v2333_v23 = vmul.f32 %v9076_v6, %v9269_v8  ;;  %v5046_v50 = vpop.eup %5045  ;;  %v4241_v39 = vmul.f32 %v5044_v55, %v9034_v17  ;;  %v10284_v17 = vld [vmem:[#allocation43_spill] sm:$0xff] }
 0x2bf   : > { %v1860_v0 = vadd.f32 %v1828_v54, %v1759_v48  ;;  %v1861_v15 = vadd.f32 %v9169_v60, %v1760_v43  ;;  %v2163_v25 = vadd.f32 %v2131_v58, %v2062_v52  ;;  %v4242_v35 = vmul.f32 %v5046_v50, %v9041_v56  ;;  %v10285_v60 = vld [vmem:[#allocation40_spill] sm:$0xff]  ;;  %v10286_v58 = vld [vmem:[#allocation145_spill] sm:$0xff]  ;;  %v10288_v43 = vld [vmem:[#allocation47_spill] sm:$0xff] }
 0x2c0   : > { %v4638_v37 = vmul.f32 -1.442695, %v9303_v11  ;;  %5047 = vpow2.f32 %v4637_v5  ;;  %v2164_v51 = vadd.f32 %v2132_v22, %v2063_v53  ;;  %v2434_v41 = vmul.f32 %v9095_v32, %v9271_v31  ;;  %4653 = vst.msk [vmem:[%s5633_s8 + $0x160] sm:$0xff] %vm497_vm1, %v4241_v39  ;;  %v10287_v22 = vld [vmem:[#allocation46_spill] sm:$0xff]  ;;  %v10289_v5 = vld [vmem:[#allocation7_spill] sm:$0xff] }
 0x2c1   : > { %v1961_v33 = vadd.f32 %v1929_v57, %v1860_v0  ;;  %v1962_v6 = vadd.f32 %v10283_v59, %v1861_v15  ;;  %v2264_v61 = vadd.f32 %v2232_v9, %v2163_v25  ;;  %4654 = vst.msk [vmem:[%s5633_s8 + $0x168] sm:$0xff] %vm497_vm1, %v4242_v35  ;;  %v2534_v13 = vmul.f32 %v10285_v60, %v9236_v30  ;;  %v10290_v9 = vld [vmem:[#allocation42_spill] sm:$0xff]  ;;  %v10291_v0 = vld [vmem:[#allocation48_spill] sm:$0xff]  ;;  %v10292_v25 = vld [vmem:[#allocation49_spill] sm:$0xff] }
 0x2c2   : > { %5049 = vpow2.f32 %v4638_v37  ;;  %v2265_v54 = vadd.f32 %v10284_v17, %v2164_v51  ;;  %v2535_v56 = vmul.f32 %v10285_v60, %v9238_v14  ;;  %v2635_v32 = vmul.f32 %v10286_v58, %v9249_v28 }
 0x2c3   : > { %v2064_v48 = vadd.f32 %v10287_v22, %v1961_v33  ;;  %v2065_v57 = vadd.f32 %v10288_v43, %v1962_v6  ;;  %v2365_v52 = vadd.f32 %v2333_v23, %v2264_v61  ;;  %v2636_v53 = vmul.f32 %v10286_v58, %v9251_v36  ;;  %v10293_v61 = vld [vmem:[#allocation50_spill] sm:$0xff] }
 0x2c4   : > { %v2366_v55 = vadd.f32 %v9218_v42, %v2265_v54  ;;  %v2566_v37 = vadd.f32 %v2534_v13, %v10289_v5  ;;  %v2567_v50 = vadd.f32 %v2535_v56, %v10290_v9  ;;  %v2736_v39 = vmul.f32 %v9048_v63, %v9253_v46  ;;  %v10294_v54 = vld [vmem:[#allocation14_spill] sm:$0xff]  ;;  %v10296_v56 = vld [vmem:[#allocation9_spill] sm:$0xff] }
 0x2c5   : > { %v2165_v15 = vadd.f32 %v10291_v0, %v2064_v48  ;;  %v2166_v35 = vadd.f32 %v10292_v25, %v2065_v57  ;;  %v2466_v51 = vadd.f32 %v2434_v41, %v2365_v52  ;;  %v2837_v23 = vmul.f32 %v9083_v24, %v9269_v8  ;;  %v10295_v63 = vld [vmem:[#allocation54_spill] sm:$0xff]  ;;  %v10297_v41 = vld [vmem:[#allocation56_spill] sm:$0xff]  ;;  %v10300_v52 = vld [vmem:[#allocation57_spill] sm:$0xff] }
 0x2c6   : > { %v2467_v33 = vadd.f32 %v9222_v10, %v2366_v55  ;;  %v2667_v59 = vadd.f32 %v2635_v32, %v2566_v37  ;;  %v2668_v6 = vadd.f32 %v2636_v53, %v2567_v50  ;;  %v2938_v42 = vmul.f32 %v9104_v45, %v9271_v31  ;;  %v10298_v32 = vld [vmem:[#allocation52_spill] sm:$0xff]  ;;  %v10299_v45 = vld [vmem:[#allocation18_spill] sm:$0xff]  ;;  %v10301_v55 = vld [vmem:[#allocation41_spill] sm:$0xff] }
 0x2c7   : > { %v2266_v17 = vadd.f32 %v10293_v61, %v2165_v15  ;;  %v2267_v60 = vadd.f32 %v10294_v54, %v2166_v35  ;;  %v2568_v13 = vadd.f32 %v10295_v63, %v2466_v51  ;;  %v3039_v58 = vmul.f32 %v10296_v56, %v9236_v30  ;;  %v10302_v37 = vld [vmem:[#allocation58_spill] sm:$0xff]  ;;  %v10303_v15 = vld [vmem:[#allocation128_spill] sm:$0xff]  ;;  %v10304_v25 = vld [vmem:[#allocation53_spill] sm:$0xff] }
 0x2c8   : > { %v2569_v22 = vadd.f32 %v10297_v41, %v2467_v33  ;;  %v2768_v48 = vadd.f32 %v2736_v39, %v2667_v59  ;;  %v2769_v24 = vadd.f32 %v9226_v19, %v2668_v6  ;;  %v3040_v10 = vmul.f32 %v10296_v56, %v9238_v14  ;;  %v10305_v35 = vld [vmem:[#allocation19_spill] sm:$0xff]  ;;  %v10307_v6 = vld [vmem:[#allocation141_spill] sm:$0xff] }
 0x2c9   : > { %v2367_v43 = vadd.f32 %v10298_v32, %v2266_v17  ;;  %v2368_v57 = vadd.f32 %v10299_v45, %v2267_v60  ;;  %v2669_v53 = vadd.f32 %v10300_v52, %v2568_v13  ;;  %v3071_v5 = vadd.f32 %v3039_v58, %v10301_v55  ;;  %v10306_v33 = vld [vmem:[#allocation59_spill] sm:$0xff]  ;;  %v10308_v17 = vld [vmem:[#allocation20_spill] sm:$0xff]  ;;  %v10309_v13 = vld [vmem:[#allocation114_spill] sm:$0xff] }
 0x2ca   : > { %v2670_v9 = vadd.f32 %v10302_v37, %v2569_v22  ;;  %v2869_v50 = vadd.f32 %v2837_v23, %v2768_v48  ;;  %v2870_v0 = vadd.f32 %v9230_v4, %v2769_v24  ;;  %v3072_v39 = vadd.f32 %v3040_v10, %v10303_v15  ;;  %v10310_v58 = vld [vmem:[#allocation115_spill] sm:$0xff]  ;;  %v10311_v22 = vld [vmem:[#allocation60_spill] sm:$0xff] }
 0x2cb   : > { %v2468_v19 = vadd.f32 %v10304_v25, %v2367_v43  ;;  %v2469_v51 = vadd.f32 %v10305_v35, %v2368_v57  ;;  %v2770_v59 = vadd.f32 %v10306_v33, %v2669_v53  ;;  %v3140_v61 = vmul.f32 %v10307_v6, %v9249_v28  ;;  %v10312_v43 = vld [vmem:[#allocation21_spill] sm:$0xff]  ;;  %v10313_v57 = vld [vmem:[#allocation62_spill] sm:$0xff]  ;;  %v10315_v55 = vld [vmem:[#allocation116_spill] sm:$0xff] }
 0x2cc   : > { %v2771_v54 = vadd.f32 %v10308_v17, %v2670_v9  ;;  %v2970_v60 = vadd.f32 %v2938_v42, %v2869_v50  ;;  %v2971_v63 = vadd.f32 %v9234_v40, %v2870_v0  ;;  %v3141_v23 = vmul.f32 %v10307_v6, %v9251_v36  ;;  %v10314_v42 = vld [vmem:[#allocation63_spill] sm:$0xff]  ;;  %v10316_v9 = vld [vmem:[#allocation117_spill] sm:$0xff]  ;;  %v10318_v25 = vld [vmem:[#allocation22_spill] sm:$0xff] }
 0x2cd   : > { %v5048_v4 = vpop.eup %5047  ;;  %v2570_v56 = vadd.f32 %v10309_v13, %v2468_v19  ;;  %v2571_v41 = vadd.f32 %v10310_v58, %v2469_v51  ;;  %v2871_v48 = vadd.f32 %v10311_v22, %v2770_v59  ;;  %v3172_v24 = vadd.f32 %v3140_v61, %v3071_v5  ;;  %v10317_v0 = vld [vmem:[#allocation61_spill] sm:$0xff]  ;;  %v10319_v5 = vld [vmem:[#allocation64_spill] sm:$0xff]  ;;  %v10320_v33 = vld [vmem:[#allocation118_spill] sm:$0xff] }
 0x2ce   : > { %v4161_v32 = vadd.f32 1.0, %v5048_v4  ;;  %v2872_v45 = vadd.f32 %v10312_v43, %v2771_v54  ;;  %v3073_v52 = vadd.f32 %v10313_v57, %v2970_v60  ;;  %v3074_v53 = vadd.f32 %v10314_v42, %v2971_v63  ;;  %v10321_v6 = vld [vmem:[#allocation90_spill] sm:$0xff]  ;;  %v10322_v17 = vld [vmem:[#allocation121_spill] sm:$0xff]  ;;  %v10330_v42 = vld [vmem:[#allocation23_spill] sm:$0xff] }
 0x2cf   : > { %v5050_v10 = vpop.eup %5049  ;;  %v2671_v37 = vadd.f32 %v10315_v55, %v2570_v56  ;;  %v2672_v50 = vadd.f32 %v10316_v9, %v2571_v41  ;;  %v2972_v15 = vadd.f32 %v10317_v0, %v2871_v48  ;;  %v3173_v35 = vadd.f32 %v3141_v23, %v3072_v39  ;;  %v10323_v60 = vld [vmem:[#allocation122_spill] sm:$0xff]  ;;  %v10324_v4 = vld [vmem:[#allocation65_spill] sm:$0xff]  ;;  %v10325_v41 = vld [vmem:[#allocation119_spill] sm:$0xff] }
 0x2d0   : > { %v4162_v40 = vadd.f32 1.0, %v5050_v10  ;;  %5051 = vrcp.f32 %v4161_v32  ;;  %v2973_v19 = vadd.f32 %v10318_v25, %v2872_v45  ;;  %v3174_v51 = vadd.f32 %v10319_v5, %v3073_v52  ;;  %v10326_v23 = vld [vmem:[#allocation91_spill] sm:$0xff]  ;;  %v10328_v32 = vld [vmem:[#allocation66_spill] sm:$0xff]  ;;  %v10329_v45 = vld [vmem:[#allocation124_spill] sm:$0xff] }
 0x2d1   : > { %v2772_v59 = vadd.f32 %v10320_v33, %v2671_v37  ;;  %v2773_v61 = vadd.f32 %v10321_v6, %v2672_v50  ;;  %v3075_v54 = vadd.f32 %v10322_v17, %v2972_v15  ;;  %v3175_v13 = vadd.f32 %v10324_v4, %v3074_v53  ;;  %v10327_v48 = vld [vmem:[#allocation123_spill] sm:$0xff]  ;;  %v10331_v55 = vld [vmem:[#allocation120_spill] sm:$0xff]  ;;  %v10333_v9 = vld [vmem:[#allocation125_spill] sm:$0xff] }
 0x2d2   : > { %5053 = vrcp.f32 %v4162_v40  ;;  %v3076_v63 = vadd.f32 %v10323_v60, %v2973_v19  ;;  %v3241_v56 = vmul.f32 %v8729_v21, %v9253_v46  ;;  %v3274_v58 = vadd.f32 %v9243_v3, %v3173_v35  ;;  %v10332_v37 = vld [vmem:[#allocation92_spill] sm:$0xff]  ;;  %v10334_v15 = vld [vmem:[#allocation93_spill] sm:$0xff]  ;;  %v10335_v35 = vld [vmem:[#allocation67_spill] sm:$0xff] }
 0x2d3   : > { %v2873_v39 = vadd.f32 %v10325_v41, %v2772_v59  ;;  %v2874_v22 = vadd.f32 %v10326_v23, %v2773_v61  ;;  %v3176_v10 = vadd.f32 %v10327_v48, %v3075_v54  ;;  %v3275_v43 = vadd.f32 %v10328_v32, %v3174_v51  ;;  %v10336_v51 = vld [vmem:[#allocation24_spill] sm:$0xff]  ;;  %v10337_v33 = vld [vmem:[#allocation166_spill] sm:$0xff]  ;;  %v10338_v6 = vld [vmem:[#allocation167_spill] sm:$0xff] }
 0x2d4   : > { %v3177_v57 = vadd.f32 %v10329_v45, %v3076_v63  ;;  %v3273_v52 = vadd.f32 %v3241_v56, %v3172_v24  ;;  %v3276_v40 = vadd.f32 %v10330_v42, %v3175_v13  ;;  %v3342_v53 = vmul.f32 %v8756_v7, %v9269_v8  ;;  %v10339_v17 = vld [vmem:[#allocation126_spill] sm:$0xff]  ;;  %v10341_v13 = vld [vmem:[#allocation68_spill] sm:$0xff]  ;;  %v10345_v32 = vld [vmem:[#allocation127_spill] sm:$0xff] }
 0x2d5   : > { %v2974_v21 = vadd.f32 %v10331_v55, %v2873_v39  ;;  %v2975_v3 = vadd.f32 %v10332_v37, %v2874_v22  ;;  %v3277_v50 = vadd.f32 %v10333_v9, %v3176_v10  ;;  %v3375_v0 = vadd.f32 %v9247_v34, %v3274_v58  ;;  %v10340_v63 = vld [vmem:[#allocation94_spill] sm:$0xff]  ;;  %v10342_v58 = vld [vmem:[#allocation25_spill] sm:$0xff]  ;;  %v10346_v45 = vld [vmem:[#allocation95_spill] sm:$0xff] }
 0x2d6   : > { %v3278_v25 = vadd.f32 %v10334_v15, %v3177_v57  ;;  %v3374_v19 = vadd.f32 %v3342_v53, %v3273_v52  ;;  %v3376_v5 = vadd.f32 %v10335_v35, %v3275_v43  ;;  %v3377_v24 = vadd.f32 %v10336_v51, %v3276_v40  ;;  %v10343_v39 = vld [vmem:[#allocation169_spill] sm:$0xff]  ;;  %v10344_v22 = vld [vmem:[#allocation170_spill] sm:$0xff]  ;;  %v10348_v53 = vld [vmem:[#allocation171_spill] sm:$0xff] }
 0x2d7   : > { %v3077_v59 = vadd.f32 %v10337_v33, %v2974_v21  ;;  %v3078_v61 = vadd.f32 %v10338_v6, %v2975_v3  ;;  %v3378_v54 = vadd.f32 %v10339_v17, %v3277_v50  ;;  %v3443_v60 = vmul.f32 %v8779_v47, %v9271_v31  ;;  %v10349_v21 = vld [vmem:[#allocation133_spill] sm:$0xff]  ;;  %v10352_v15 = vld [vmem:[#allocation38_spill] sm:$0xff]  ;;  %v10356_v33 = vld [vmem:[#allocation172_spill] sm:$0xff] }
 0x2d8   : > { %v3379_v4 = vadd.f32 %v10340_v63, %v3278_v25  ;;  %v3476_v34 = vadd.f32 %v9259_v18, %v3375_v0  ;;  %v3477_v56 = vadd.f32 %v10341_v13, %v3376_v5  ;;  %v3478_v41 = vadd.f32 %v10342_v58, %v3377_v24  ;;  %v10347_v18 = vld [vmem:[#allocation70_spill] sm:$0xff]  ;;  %v10350_v3 = vld [vmem:[#allocation69_spill] sm:$0xff]  ;;  %v10359_v13 = vld [vmem:[#allocation71_spill] sm:$0xff] }
 0x2d9   : > { %v3178_v23 = vadd.f32 %v10343_v39, %v3077_v59  ;;  %v3179_v48 = vadd.f32 %v10344_v22, %v3078_v61  ;;  %v3475_v10 = vadd.f32 %v3443_v60, %v3374_v19  ;;  %v3479_v43 = vadd.f32 %v10345_v32, %v3378_v54  ;;  %v10351_v50 = vld [vmem:[#allocation5_spill] sm:$0xff]  ;;  %v10353_v19 = vld [vmem:[#allocation146_spill] sm:$0xff]  ;;  %v10360_v58 = vld [vmem:[#allocation72_spill] sm:$0xff] }
 0x2da   : > { %v3480_v57 = vadd.f32 %v10346_v45, %v3379_v4  ;;  %v3544_v52 = vmul.f32 %v8931_v16, %v9236_v30  ;;  %v3545_v42 = vmul.f32 %v8931_v16, %v9238_v14  ;;  %v3579_v40 = vadd.f32 %v10347_v18, %v3476_v34  ;;  %v10354_v5 = vld [vmem:[#allocation86_spill] sm:$0xff]  ;;  %v10355_v30 = vld [vmem:[#allocation175_spill] sm:$0xff] }
 0x2db   : > { %v3279_v55 = vadd.f32 %v10348_v53, %v3178_v23  ;;  %v3280_v37 = vadd.f32 %v10349_v21, %v3179_v48  ;;  %v3578_v9 = vadd.f32 %v10350_v3, %v3475_v10  ;;  %v3580_v0 = vadd.f32 %v10351_v50, %v3477_v56  ;;  %v10357_v6 = vld [vmem:[#allocation142_spill] sm:$0xff]  ;;  %v10362_v48 = vld [vmem:[#allocation143_spill] sm:$0xff]  ;;  %v10369_v3 = vld [vmem:[#allocation73_spill] sm:$0xff] }
 0x2dc   : > { %v3576_v25 = vadd.f32 %v3544_v52, %v10352_v15  ;;  %v3577_v35 = vadd.f32 %v3545_v42, %v10353_v19  ;;  %v3581_v51 = vadd.f32 %v10354_v5, %v3478_v41  ;;  %v3582_v24 = vadd.f32 %v10355_v30, %v3479_v43  ;;  %v10358_v17 = vld [vmem:[#allocation130_spill] sm:$0xff]  ;;  %v10363_v43 = vld [vmem:[#allocation88_spill] sm:$0xff]  ;;  %v10365_v52 = vld [vmem:[#allocation109_spill] sm:$0xff] }
 0x2dd   : > { %v5052_v14 = vpop.eup %5051  ;;  %v3380_v59 = vadd.f32 %v10356_v33, %v3279_v55  ;;  %v3381_v61 = vadd.f32 %v10357_v6, %v3280_v37  ;;  %v3583_v54 = vadd.f32 %v10358_v17, %v3480_v57  ;;  %v3645_v60 = vmul.f32 %v8947_v62, %v9249_v28  ;;  %v10361_v23 = vld [vmem:[#allocation174_spill] sm:$0xff]  ;;  %v10366_v42 = vld [vmem:[#allocation87_spill] sm:$0xff]  ;;  %v10371_v15 = vld [vmem:[#allocation132_spill] sm:$0xff] }
 0x2de   : > { %v4257_v4 = vmul.f32 %v5052_v14, %v9300_v12  ;;  %v3646_v34 = vmul.f32 %v8947_v62, %v9251_v36  ;;  %v3679_v56 = vadd.f32 %v10359_v13, %v3578_v9  ;;  %v3680_v41 = vadd.f32 %v10360_v58, %v3579_v40  ;;  %v10364_v12 = vld [vmem:[#allocation129_spill] sm:$0xff]  ;;  %v10367_v40 = vld [vmem:[#allocation35_spill] sm:$0xff]  ;;  %v10370_v50 = vld [vmem:[#allocation26_spill] sm:$0xff] }
 0x2df   : > { %v5054_v63 = vpop.eup %5053  ;;  %v3481_v22 = vadd.f32 %v10361_v23, %v3380_v59  ;;  %v3482_v10 = vadd.f32 %v10362_v48, %v3381_v61  ;;  %v3677_v32 = vadd.f32 %v3645_v60, %v3576_v25  ;;  %v3681_v45 = vadd.f32 %v10363_v43, %v3580_v0  ;;  %v10368_v53 = vld [vmem:[#allocation179_spill] sm:$0xff]  ;;  %v10372_v19 = vld [vmem:[#allocation29_spill] sm:$0xff]  ;;  %v10373_v5 = vld [vmem:[#allocation30_spill] sm:$0xff] }
 0x2e0   : > { %v4258_v39 = vmul.f32 %v5054_v63, %v9303_v11  ;;  %4669 = vst.msk [vmem:[%s5633_s8 + $0x1e0] sm:$0xff] %vm497_vm1, %v4257_v4  ;;  %v3678_v28 = vadd.f32 %v3646_v34, %v3577_v35  ;;  %v3682_v57 = vadd.f32 %v10364_v12, %v3581_v51  ;;  %v3683_v36 = vadd.f32 %v10365_v52, %v3582_v24  ;;  %v10374_v24 = vld [vmem:[#allocation96_spill] sm:$0xff]  ;;  %v10376_v6 = vld [vmem:[#allocation147_spill] sm:$0xff]  ;;  %v10378_v60 = vld [vmem:[#allocation89_spill] sm:$0xff] }
 0x2e1   : > { %v3584_v18 = vadd.f32 %v10366_v42, %v3481_v22  ;;  %v3585_v11 = vadd.f32 %v10367_v40, %v3482_v10  ;;  %v3684_v55 = vadd.f32 %v10368_v53, %v3583_v54  ;;  %v3746_v21 = vmul.f32 %v8957_v26, %v9253_v46  ;;  %v10375_v33 = vld [vmem:[#allocation180_spill] sm:$0xff]  ;;  %v10377_v17 = vld [vmem:[#allocation31_spill] sm:$0xff]  ;;  %v10379_v4 = vld [vmem:[#allocation74_spill] sm:$0xff] }
 0x2e2   : > { %4670 = vst.msk [vmem:[%s5633_s8 + $0x1e8] sm:$0xff] %vm497_vm1, %v4258_v39  ;;  %v3779_v37 = vadd.f32 %v9263_v27, %v3678_v28  ;;  %v3780_v9 = vadd.f32 %v10369_v3, %v3679_v56  ;;  %v3781_v0 = vadd.f32 %v10370_v50, %v3680_v41  ;;  %v3782_v25 = vadd.f32 %v10371_v15, %v3681_v45  ;;  %v10380_v13 = vld [vmem:[#allocation27_spill] sm:$0xff]  ;;  %v10382_v23 = vld [vmem:[#allocation97_spill] sm:$0xff]  ;;  %v10383_v48 = vld [vmem:[#allocation4_spill] sm:$0xff] }
 0x2e3   : > { %v3685_v35 = vadd.f32 %v10372_v19, %v3584_v18  ;;  %v3686_v51 = vadd.f32 %v10373_v5, %v3585_v11  ;;  %v3778_v30 = vadd.f32 %v3746_v21, %v3677_v32  ;;  %v3783_v14 = vadd.f32 %v10374_v24, %v3682_v57  ;;  %v10381_v41 = vld [vmem:[#allocation131_spill] sm:$0xff]  ;;  %v10384_v32 = vld [vmem:[#allocation148_spill] sm:$0xff]  ;;  %v10389_v40 = vld [vmem:[#allocation13_spill] sm:$0xff] }
 0x2e4   : > { %v3784_v59 = vadd.f32 %v10375_v33, %v3683_v36  ;;  %v3785_v61 = vadd.f32 %v10376_v6, %v3684_v55  ;;  %v3847_v46 = vmul.f32 %v8976_v49, %v9269_v8  ;;  %v3880_v27 = vadd.f32 %v9267_v2, %v3779_v37  ;;  %v10385_v8 = vld [vmem:[#allocation34_spill] sm:$0xff]  ;;  %v10386_v2 = vld [vmem:[#allocation16_spill] sm:$0xff]  ;;  %v10387_v52 = vld [vmem:[#allocation75_spill] sm:$0xff] }
 0x2e5   : > { %v3786_v54 = vadd.f32 %v10377_v17, %v3685_v35  ;;  %v3787_v63 = vadd.f32 %v10378_v60, %v3686_v51  ;;  %v3881_v34 = vadd.f32 %v10379_v4, %v3780_v9  ;;  %v3882_v56 = vadd.f32 %v10380_v13, %v3781_v0  ;;  %v10388_v42 = vld [vmem:[#allocation28_spill] sm:$0xff]  ;;  %v10390_v55 = vld [vmem:[#allocation98_spill] sm:$0xff]  ;;  %v10391_v37 = vld [vmem:[#allocation77_spill] sm:$0xff] }
 0x2e6   : > { %v3879_v58 = vadd.f32 %v3847_v46, %v3778_v30  ;;  %v3883_v39 = vadd.f32 %v10381_v41, %v3782_v25  ;;  %v3884_v22 = vadd.f32 %v10382_v23, %v3783_v14  ;;  %v3885_v10 = vadd.f32 %v10383_v48, %v3784_v59  ;;  %v10392_v9 = vld [vmem:[#allocation150_spill] sm:$0xff]  ;;  %v10394_v25 = vld [vmem:[#allocation17_spill] sm:$0xff]  ;;  %v10395_v30 = vld [vmem:[#allocation36_spill] sm:$0xff] }
 0x2e7   : > { %v3886_v28 = vadd.f32 %v10384_v32, %v3785_v61  ;;  %v3887_v43 = vadd.f32 %v10385_v8, %v3786_v54  ;;  %v3888_v45 = vadd.f32 %v10386_v2, %v3787_v63  ;;  %v3948_v12 = vmul.f32 %v8992_v44, %v9271_v31  ;;  %v10393_v0 = vld [vmem:[#allocation6_spill] sm:$0xff]  ;;  %v10396_v46 = vld [vmem:[#allocation33_spill] sm:$0xff]  ;;  %v10397_v17 = vld [vmem:[#allocation136_spill] sm:$0xff] }
 0x2e8   : > { %v3981_v57 = vadd.f32 %v9278_v38, %v3880_v27  ;;  %v3982_v36 = vadd.f32 %v10387_v52, %v3881_v34  ;;  %v3983_v18 = vadd.f32 %v10388_v42, %v3882_v56  ;;  %v3984_v11 = vadd.f32 %v10389_v40, %v3883_v39  ;;  %v10398_v63 = vld [vmem:[#allocation37_spill] sm:$0xff] }
 0x2e9   : > { %v3980_v53 = vadd.f32 %v3948_v12, %v3879_v58  ;;  %v3985_v21 = vadd.f32 %v10390_v55, %v3884_v22  ;;  %v3986_v3 = vadd.f32 %v10391_v37, %v3885_v10  ;;  %v3987_v50 = vadd.f32 %v10392_v9, %v3886_v28  ;;  %v10399_v10 = vld [vmem:[#allocation173_spill] sm:$0xff] }
 0x2ea   : > { %v3988_v15 = vadd.f32 %v10393_v0, %v3887_v43  ;;  %v3989_v19 = vadd.f32 %v10394_v25, %v3888_v45  ;;  %v9495_v31 = vadd.f32 %v9031_v29, %v3981_v57  ;;  %v9498_v38 = vadd.f32 %v9031_v29, %v3982_v36 }
 0x2eb   : > { %v9501_v35 = vadd.f32 %v9031_v29, %v3980_v53  ;;  %v9504_v5 = vadd.f32 %v9031_v29, %v3983_v18  ;;  %v9507_v51 = vadd.f32 %v9031_v29, %v3984_v11  ;;  %v3357_v24 = vmul.f32 %v8756_v7, %v10395_v30 }
 0x2ec   : > { %v9512_v14 = vadd.f32 %v9031_v29, %v3985_v21  ;;  %v9515_v33 = vadd.f32 %v9031_v29, %v3986_v3  ;;  %v4624_v6 = vmul.f32 -1.442695, %v9495_v31  ;;  %v4625_v61 = vmul.f32 -1.442695, %v9498_v38 }
 0x2ed   : > { %v4623_v59 = vmul.f32 -1.442695, %v9501_v35  ;;  %v1455_v27 = vmul.f32 %v9273_v20, %v10396_v46  ;;  %v3458_v54 = vmul.f32 %v8779_v47, %v10397_v17  ;;  %v9525_v7 = vadd.f32 %v9031_v29, %v3987_v50  ;;  %v10400_v46 = vld [vmem:[#allocation99_spill] sm:$0xff] }
 0x2ee   : > { %v4626_v60 = vmul.f32 -1.442695, %v9504_v5  ;;  %5055 = vrcp.f32 %v10398_v63  ;;  %v9530_v4 = vadd.f32 %v9031_v29, %v3988_v15  ;;  %v9533_v34 = vadd.f32 %v9031_v29, %v3989_v19 }
 0x2ef   : > { %5057 = vpow2.f32 %v4623_v59  ;;  %v4627_v13 = vmul.f32 -1.442695, %v9507_v51  ;;  %v4628_v20 = vmul.f32 -1.442695, %v9512_v14  ;;  %v1460_v47 = vmul.f32 0.0, %v1455_v27 }
 0x2f0   : > { %5059 = vpow2.f32 %v4624_v6  ;;  %v3389_v56 = vadd.f32 %v3357_v24, %v9212_v1  ;;  %v4629_v58 = vmul.f32 -1.442695, %v9515_v33  ;;  %v4630_v41 = vmul.f32 -1.442695, %v9525_v7 }
 0x2f1   : > { %5061 = vpow2.f32 %v4625_v61  ;;  %1465 = vst.msk [vmem:[#allocation2 + $0x270] sm:$0xff] %vm497_vm1, %v1460_v47  ;;  %v4631_v23 = vmul.f32 -1.442695, %v9530_v4  ;;  %v4632_v22 = vmul.f32 -1.442695, %v9533_v34 }
 0x2f2   : > { %5063 = vpow2.f32 %v4626_v60  ;;  %v3490_v39 = vadd.f32 %v3458_v54, %v3389_v56 }
 0x2f3   : > { %5065 = vpow2.f32 %v4627_v13 }
 0x2f4   : > { %5067 = vpow2.f32 %v4628_v20 }
 0x2f5   : > { %5069 = vpow2.f32 %v4629_v58 }
 0x2f6   : > { %5071 = vpow2.f32 %v4630_v41 }
 0x2f7   : > { %5073 = vpow2.f32 %v4631_v23 }
 0x2f8   : > { %5075 = vpow2.f32 %v4632_v22  ;;  %v3726_v59 = vld [vmem:[#allocation2 + $0x270] sm:$0xff] }
 0x2f9   : > { %v3827_v61 = vld [vmem:[#allocation2 + $0x271] sm:$0xff]  ;;  %v3763_v20 = vmul.f32 %v8957_v26, %v3726_v59 }
 0x2fa   : > { %v3928_v47 = vld [vmem:[#allocation2 + $0x272] sm:$0xff] }
 0x2fb   : > { %v5056_v1 = vpop.eup %5055 }
 0x2fc   : > { %v5058_v48 = vpop.eup %5057  ;;  %v1454_v32 = vmul.f32 %v5056_v1, %v10399_v10 }
 0x2fd   : > { %v5060_v28 = vpop.eup %5059  ;;  %v4147_v8 = vadd.f32 1.0, %v5058_v48 }
 0x2fe   : > { %v5062_v43 = vpop.eup %5061  ;;  %v4148_v2 = vadd.f32 1.0, %v5060_v28  ;;  %v1459_v45 = vmul.f32 0.0, %v1454_v32 }
 0x2ff   : > { %v5064_v12 = vpop.eup %5063  ;;  %v4149_v57 = vadd.f32 1.0, %v5062_v43  ;;  %5077 = vrcp.f32 %v4147_v8 }
 0x300   : > { %v5066_v52 = vpop.eup %5065  ;;  %v4150_v36 = vadd.f32 1.0, %v5064_v12  ;;  %5079 = vrcp.f32 %v4148_v2  ;;  %1464 = vst.msk [vmem:[#allocation2 + $0x268] sm:$0xff] %vm497_vm1, %v1459_v45 }
 0x301   : > { %v5068_v42 = vpop.eup %5067  ;;  %v4151_v18 = vadd.f32 1.0, %v5066_v52  ;;  %5081 = vrcp.f32 %v4149_v57 }
 0x302   : > { %v5070_v40 = vpop.eup %5069  ;;  %v4152_v11 = vadd.f32 1.0, %v5068_v42  ;;  %5083 = vrcp.f32 %v4150_v36 }
 0x303   : > { %v5072_v53 = vpop.eup %5071  ;;  %v4153_v55 = vadd.f32 1.0, %v5070_v40  ;;  %5085 = vrcp.f32 %v4151_v18 }
 0x304   : > { %v5074_v21 = vpop.eup %5073  ;;  %v4154_v37 = vadd.f32 1.0, %v5072_v53  ;;  %5087 = vrcp.f32 %v4152_v11 }
 0x305   : > { %v5076_v3 = vpop.eup %5075  ;;  %v4155_v9 = vadd.f32 1.0, %v5074_v21  ;;  %5089 = vrcp.f32 %v4153_v55 }
 0x306   : > { %v4156_v50 = vadd.f32 1.0, %v5076_v3  ;;  %5091 = vrcp.f32 %v4154_v37 }
 0x307   : > { %5093 = vrcp.f32 %v4155_v9  ;;  %v3522_v0 = vld [vmem:[#allocation2 + $0x266] sm:$0xff]  ;;  %v3523_v15 = vld [vmem:[#allocation2 + $0x26e] sm:$0xff] }
 0x308   : > { %v3624_v25 = vld [vmem:[#allocation2 + $0x267] sm:$0xff]  ;;  %5095 = vrcp.f32 %v4156_v50  ;;  %v3560_v19 = vmul.f32 %v8931_v16, %v3522_v0  ;;  %v3561_v30 = vmul.f32 %v8931_v16, %v3523_v15  ;;  %v3625_v24 = vld [vmem:[#allocation2 + $0x26f] sm:$0xff] }
 0x309   : > { %v3725_v6 = vld [vmem:[#allocation2 + $0x268] sm:$0xff]  ;;  %v3661_v54 = vmul.f32 %v8947_v62, %v3624_v25  ;;  %v3662_v60 = vmul.f32 %v8947_v62, %v3625_v24 }
 0x30a   : > { %v3592_v27 = vadd.f32 %v3560_v19, %v10400_v46  ;;  %v3593_v17 = vadd.f32 %v3561_v30, %v3490_v39  ;;  %v3826_v63 = vld [vmem:[#allocation2 + $0x269] sm:$0xff]  ;;  %v3762_v16 = vmul.f32 %v8957_v26, %v3725_v6  ;;  %v3864_v39 = vmul.f32 %v8976_v49, %v3827_v61 }
 0x30b   : > { %v3927_v22 = vld [vmem:[#allocation2 + $0x26a] sm:$0xff]  ;;  %v3863_v32 = vmul.f32 %v8976_v49, %v3826_v63  ;;  %v3965_v26 = vmul.f32 %v8992_v44, %v3928_v47 }
 0x30c   : > { %v5078_v13 = vpop.eup %5077  ;;  %v3693_v56 = vadd.f32 %v3661_v54, %v3592_v27  ;;  %v3694_v58 = vadd.f32 %v3662_v60, %v3593_v17  ;;  %v3964_v45 = vmul.f32 %v8992_v44, %v3927_v22 }
 0x30d   : > { %v5080_v41 = vpop.eup %5079  ;;  %v4243_v23 = vmul.f32 %v5078_v13, %v9501_v35 }
 0x30e   : > { %v5082_v1 = vpop.eup %5081  ;;  %v4244_v62 = vmul.f32 %v5080_v41, %v9495_v31  ;;  %v3794_v48 = vadd.f32 %v3762_v16, %v3693_v56  ;;  %v3795_v10 = vadd.f32 %v3763_v20, %v3694_v58 }
 0x30f   : > { %v5084_v28 = vpop.eup %5083  ;;  %v4245_v8 = vmul.f32 %v5082_v1, %v9498_v38  ;;  %4655 = vst.msk [vmem:[%s5633_s8 + $0x170] sm:$0xff] %vm497_vm1, %v4243_v23 }
 0x310   : > { %v5086_v35 = vpop.eup %5085  ;;  %v4246_v43 = vmul.f32 %v5084_v28, %v9504_v5  ;;  %4656 = vst.msk [vmem:[%s5633_s8 + $0x178] sm:$0xff] %vm497_vm1, %v4244_v62  ;;  %v3895_v31 = vadd.f32 %v3863_v32, %v3794_v48  ;;  %v3896_v2 = vadd.f32 %v3864_v39, %v3795_v10 }
 0x311   : > { %v5088_v49 = vpop.eup %5087  ;;  %v4247_v12 = vmul.f32 %v5086_v35, %v9507_v51  ;;  %4657 = vst.msk [vmem:[%s5633_s8 + $0x180] sm:$0xff] %vm497_vm1, %v4245_v8 }
 0x312   : > { %v5090_v38 = vpop.eup %5089  ;;  %v4248_v57 = vmul.f32 %v5088_v49, %v9512_v14  ;;  %4658 = vst.msk [vmem:[%s5633_s8 + $0x188] sm:$0xff] %vm497_vm1, %v4246_v43  ;;  %v3996_v5 = vadd.f32 %v3964_v45, %v3895_v31  ;;  %v3997_v52 = vadd.f32 %v3965_v26, %v3896_v2 }
 0x313   : > { %v5092_v36 = vpop.eup %5091  ;;  %v4249_v42 = vmul.f32 %v5090_v38, %v9515_v33  ;;  %4659 = vst.msk [vmem:[%s5633_s8 + $0x190] sm:$0xff] %vm497_vm1, %v4247_v12 }
 0x314   : > { %v5094_v44 = vpop.eup %5093  ;;  %v4250_v51 = vmul.f32 %v5092_v36, %v9525_v7  ;;  %4660 = vst.msk [vmem:[%s5633_s8 + $0x198] sm:$0xff] %vm497_vm1, %v4248_v57  ;;  %v4035_v18 = vadd.f32 %v9031_v29, %v3996_v5  ;;  %v4036_v14 = vadd.f32 %v9031_v29, %v3997_v52 }
 0x315   : > { %v5096_v40 = vpop.eup %5095  ;;  %v4251_v11 = vmul.f32 %v5094_v44, %v9530_v4  ;;  %4661 = vst.msk [vmem:[%s5633_s8 + $0x1a0] sm:$0xff] %vm497_vm1, %v4249_v42 }
 0x316   : > { %v4252_v53 = vmul.f32 %v5096_v40, %v9533_v34  ;;  %4662 = vst.msk [vmem:[%s5633_s8 + $0x1a8] sm:$0xff] %vm497_vm1, %v4250_v51  ;;  %v4639_v33 = vmul.f32 -1.442695, %v4035_v18  ;;  %v4640_v55 = vmul.f32 -1.442695, %v4036_v14 }
 0x317   : > { %4663 = vst.msk [vmem:[%s5633_s8 + $0x1b0] sm:$0xff] %vm497_vm1, %v4251_v11 }
 0x318   : > { %4664 = vst.msk [vmem:[%s5633_s8 + $0x1b8] sm:$0xff] %vm497_vm1, %v4252_v53  ;;  %5097 = vpow2.f32 %v4639_v33 }
 0x319   : > { %5099 = vpow2.f32 %v4640_v55 }
 0x325   : > { %v5098_v29 = vpop.eup %5097 }
 0x326   : > { %v5100_v7 = vpop.eup %5099  ;;  %v4163_v21 = vadd.f32 1.0, %v5098_v29 }
 0x327   : > { %v4164_v4 = vadd.f32 1.0, %v5100_v7 }
 0x328   : > { %5101 = vrcp.f32 %v4163_v21 }
 0x329   : > { %5103 = vrcp.f32 %v4164_v4 }
 0x335   : > { %v5102_v37 = vpop.eup %5101 }
 0x336   : > { %v5104_v34 = vpop.eup %5103  ;;  %v4259_v3 = vmul.f32 %v5102_v37, %v4035_v18 }
 0x337   : > { %v4260_v9 = vmul.f32 %v5104_v34, %v4036_v14 }
 0x338   : > { %4671 = vst.msk [vmem:[%s5633_s8 + $0x1f0] sm:$0xff] %vm497_vm1, %v4259_v3 }
 0x339   : > { %4672 = vst.msk [vmem:[%s5633_s8 + $0x1f8] sm:$0xff] %vm497_vm1, %v4260_v9 }
 0x33a PF: > { %s17_s26 = sadd.s32 1, %s5255_s26   ;;  %s10401_s24 = smov %s5251_s25 }
 0x33b   : > { %p14_p5 = scmp.ge.s32.totalorder %s17_s26, 4   ;;  %s10402_s25 = smov %s10404_s27 }
 0x33d   :  { %16 = sbr.rel (!%p14_p5) target bundleno = 2 (0x2), region = 94 }

</bundles_post_ra>
